<compile_context>
chip_gen: v6e
topology: v6e:2x2x1
jax: 0.10.0
libtpu: 0.0.40
codegen_flags: <defaults>
</compile_context>

<pallas_src>
import functools
import math

import numpy as np
import jax
import jax.numpy as jnp
from jax.experimental import pallas as pl
from jax.experimental.pallas import tpu as pltpu


def _round_up(x, m):
    return ((x + m - 1) // m) * m


def _bn_fold(bn, eps=1e-5):
    scale = bn["gamma"] / jnp.sqrt(bn["var"] + eps)
    shift = bn["beta"] - bn["mean"] * scale
    return scale, shift


# --------------------------------------------------------------------------
# Kernel 1: fused matmul + bias + ReLU (conv1 via bf16 im2col, Cin=1)
# --------------------------------------------------------------------------
def _matmul_bias_act_kernel(a_ref, b_ref, bias_ref, o_ref, *, relu):
    acc = jnp.dot(a_ref[...], b_ref[...], preferred_element_type=jnp.float32)
    acc = acc + bias_ref[...]
    if relu:
        acc = jnp.maximum(acc, 0.0)
    o_ref[...] = acc.astype(o_ref.dtype)


def fused_matmul_bias_act(a, b, bias, relu, tm=1024):
    """relu(A @ B + bias); bf16 operands, f32 accumulate, bf16 output.
    No M/K padding: cdiv grid, partial last M block rides (rows independent)."""
    M, K = a.shape
    _, N = b.shape
    tm = min(tm, _round_up(M, 8))
    return pl.pallas_call(
        functools.partial(_matmul_bias_act_kernel, relu=relu),
        out_shape=jax.ShapeDtypeStruct((M, N), jnp.bfloat16),
        grid=(pl.cdiv(M, tm),),
        in_specs=[
            pl.BlockSpec((tm, K), lambda i: (i, 0)),
            pl.BlockSpec((K, N), lambda i: (0, 0)),
            pl.BlockSpec((1, N), lambda i: (0, 0)),
        ],
        out_specs=pl.BlockSpec((tm, N), lambda i: (i, 0)),
        compiler_params=pltpu.CompilerParams(
            dimension_semantics=("parallel",)),
    )(a.astype(jnp.bfloat16), b.astype(jnp.bfloat16),
      bias.reshape(1, N).astype(jnp.float32))


def conv7x7_s2_bn_relu(x, w, bn):
    """conv1: 7x7 stride-2 pad-3 + folded eval-mode BN + ReLU.  x NHWC bf16.
    Cin=1, so the im2col duplication is tiny once built directly in bf16."""
    B, H, W, Cin = x.shape
    Cout, _, kh, kw = w.shape
    stride, pad = 2, 3
    Ho = (H + 2 * pad - kh) // stride + 1
    Wo = (W + 2 * pad - kw) // stride + 1
    scale, shift = _bn_fold(bn)
    wmat = (jnp.transpose(w, (2, 3, 1, 0)).reshape(kh * kw * Cin, Cout)
            * scale[None, :])
    xp = jnp.pad(x, ((0, 0), (pad, pad), (pad, pad), (0, 0)))
    cols = [xp[:, i:i + stride * Ho:stride, j:j + stride * Wo:stride, :]
            for i in range(kh) for j in range(kw)]
    patches = jnp.stack(cols, axis=3).reshape(B * Ho * Wo, kh * kw * Cin)
    out = fused_matmul_bias_act(patches, wmat, shift, relu=True)
    return out.reshape(B, Ho, Wo, Cout)


# --------------------------------------------------------------------------
# Kernel 2: direct 3x3 stride-1 conv, BN/bias/residual/ReLU fused (no im2col)
# --------------------------------------------------------------------------
def _conv3x3_row_kernel(*refs, wo, relu, has_res):
    if has_res:
        x0_ref, x1_ref, x2_ref, w_ref, bias_ref, res_ref, o_ref = refs
    else:
        x0_ref, x1_ref, x2_ref, w_ref, bias_ref, o_ref = refs
        res_ref = None
    acc = None
    for i, xr in enumerate((x0_ref, x1_ref, x2_ref)):
        for j in range(3):
            p = xr[0, 0, j:j + wo, :]                       # (wo, Cin) bf16
            c = jnp.dot(p, w_ref[3 * i + j],
                        preferred_element_type=jnp.float32)
            acc = c if acc is None else acc + c
    acc = acc + bias_ref[...]
    if res_ref is not None:
        acc = acc + res_ref[0, 0].astype(jnp.float32)
    if relu:
        acc = jnp.maximum(acc, 0.0)
    o_ref[0, 0] = acc.astype(o_ref.dtype)


def conv3x3_bn_act(x, w, bn, relu, residual=None):
    """3x3 s1 p1 conv + folded BN (+ residual) + ReLU.  Grid (B, out_row); the
    padded input is read through three row-shifted views of the same array, so
    no patch matrix ever hits HBM (~3x bf16 read vs. 18x f32 before).
    TODO(synk): at very large H, tile several output rows per grid step
    (resident image + pl.ds) to amortize per-step overhead."""
    B, H, W, Cin = x.shape
    Cout = w.shape[0]
    scale, shift = _bn_fold(bn)
    wt = (jnp.transpose(w, (2, 3, 1, 0)) * scale[None, None, None, :]
          ).reshape(9, Cin, Cout).astype(jnp.bfloat16)
    bias = shift.reshape(1, Cout).astype(jnp.float32)
    xp = jnp.pad(x, ((0, 0), (1, 1), (1, 1), (0, 0)))
    Wp = W + 2

    def tap_spec(i):
        return pl.BlockSpec((1, 1, Wp, Cin),
                            lambda b, r, i=i: (b, r + i, 0, 0))

    in_specs = [tap_spec(0), tap_spec(1), tap_spec(2),
                pl.BlockSpec((9, Cin, Cout), lambda b, r: (0, 0, 0)),
                pl.BlockSpec((1, Cout), lambda b, r: (0, 0))]
    args = [xp, xp, xp, wt, bias]
    if residual is not None:
        in_specs.append(pl.BlockSpec((1, 1, W, Cout),
                                     lambda b, r: (b, r, 0, 0)))
        args.append(residual)

    return pl.pallas_call(
        functools.partial(_conv3x3_row_kernel, wo=W, relu=relu,
                          has_res=residual is not None),
        out_shape=jax.ShapeDtypeStruct((B, H, W, Cout), jnp.bfloat16),
        grid=(B, H),
        in_specs=in_specs,
        out_specs=pl.BlockSpec((1, 1, W, Cout), lambda b, r: (b, r, 0, 0)),
        compiler_params=pltpu.CompilerParams(
            dimension_semantics=("parallel", "parallel")),
    )(*args)


def basic_block(x, p):
    out = conv3x3_bn_act(x, p["w1"], p["bn1"], relu=True)
    # conv2 + BN2 + residual add + ReLU fused in one epilogue
    out = conv3x3_bn_act(out, p["w2"], p["bn2"], relu=True, residual=x)
    return out


# --------------------------------------------------------------------------
# Kernel 3: 3x3 stride-2 pad-1 max pool as an in-kernel stencil
# --------------------------------------------------------------------------
def _maxpool_kernel(ee_ref, eo_ref, oe_ref, oo_ref, o_ref):
    ho, wo = o_ref.shape[1], o_ref.shape[2]
    ee = ee_ref[0]
    eo = eo_ref[0]
    oe = oe_ref[0]
    oo = oo_ref[0]
    m = ee[0:ho, 0:wo]
    m = jnp.maximum(m, eo[0:ho, 0:wo])
    m = jnp.maximum(m, ee[0:ho, 1:wo + 1])
    m = jnp.maximum(m, oe[0:ho, 0:wo])
    m = jnp.maximum(m, oo[0:ho, 0:wo])
    m = jnp.maximum(m, oe[0:ho, 1:wo + 1])
    m = jnp.maximum(m, ee[1:ho + 1, 0:wo])
    m = jnp.maximum(m, eo[1:ho + 1, 0:wo])
    m = jnp.maximum(m, ee[1:ho + 1, 1:wo + 1])
    o_ref[0] = m


def maxpool3x3_s2_p1(x):
    """bf16 max pool: the wrapper only does a cheap parity split of the padded
    input (even/odd rows x cols); the 9-way window max runs in one kernel."""
    B, H, W, C = x.shape
    Ho = (H - 1) // 2 + 1
    Wo = (W - 1) // 2 + 1
    neg = float(jnp.finfo(jnp.bfloat16).min)      # bf16-safe sentinel
    xp = jnp.pad(x, ((0, 0), (1, 1), (1, 1), (0, 0)), constant_values=neg)
    ee = xp[:, 0::2, 0::2, :][:, :Ho + 1, :Wo + 1, :]
    eo = xp[:, 0::2, 1::2, :][:, :Ho + 1, :Wo, :]
    oe = xp[:, 1::2, 0::2, :][:, :Ho, :Wo + 1, :]
    oo = xp[:, 1::2, 1::2, :][:, :Ho, :Wo, :]
    return pl.pallas_call(
        _maxpool_kernel,
        out_shape=jax.ShapeDtypeStruct((B, Ho, Wo, C), x.dtype),
        grid=(B,),
        in_specs=[
            pl.BlockSpec((1, Ho + 1, Wo + 1, C), lambda b: (b, 0, 0, 0)),
            pl.BlockSpec((1, Ho + 1, Wo, C), lambda b: (b, 0, 0, 0)),
            pl.BlockSpec((1, Ho, Wo + 1, C), lambda b: (b, 0, 0, 0)),
            pl.BlockSpec((1, Ho, Wo, C), lambda b: (b, 0, 0, 0)),
        ],
        out_specs=pl.BlockSpec((1, Ho, Wo, C), lambda b: (b, 0, 0, 0)),
        compiler_params=pltpu.CompilerParams(
            dimension_semantics=("parallel",)),
    )(ee, eo, oe, oo)


# --------------------------------------------------------------------------
# Kernel 4: fused GCN head (GCNConv+ReLU -> GCNConv -> per-graph mean)
# --------------------------------------------------------------------------
def _gcn_fused_kernel(x_ref, dinv_ref, row_ref, col_ref,
                      w1_ref, b1_ref, w2_ref, b2_ref, o_ref, *, hf, wf):
    n = hf * wf
    dinv = dinv_ref[...]                      # (n, 1) f32  = D^-1/2
    row = row_ref[...]                        # (n, 1) int32 grid row
    col = col_ref[...]                        # (n, 1) int32 grid col

    def aggregate(t):
        # A_norm @ t for the 8-neighbour grid graph with self loops:
        # dinv * stencil_sum(dinv * t); shifts along the flattened node axis
        # are XLU rolls with row/col boundary masks (no dense (n,n) adjacency).
        y = t * dinv
        acc = y
        for di in (-1, 0, 1):
            for dj in (-1, 0, 1):
                if di == 0 and dj == 0:
                    continue
                s = di * wf + dj
                r = pltpu.roll(y, shift=(-s) % n, axis=0)
                conds = []
                if di == 1:
                    conds.append(row < hf - 1)
                if di == -1:
                    conds.append(row > 0)
                if dj == 1:
                    conds.append(col < wf - 1)
                if dj == -1:
                    conds.append(col > 0)
                ok = conds[0]
                for c in conds[1:]:
                    ok = jnp.logical_and(ok, c)
                acc = acc + jnp.where(ok, r, 0.0)
        return acc * dinv

    x = x_ref[0]                                            # (n, Cin) bf16
    t1 = jnp.dot(x, w1_ref[...], preferred_element_type=jnp.float32)
    h1 = jnp.maximum(aggregate(t1) + b1_ref[...], 0.0)      # GCNConv1 + ReLU
    # TODO(synk): F.dropout after layer 1 is identity in eval mode.
    g1 = aggregate(h1)                                      # (A h1) W2 == A (h1 W2)
    h2 = jnp.dot(g1.astype(jnp.bfloat16), w2_ref[...],
                 preferred_element_type=jnp.float32) + b2_ref[...]
    o_ref[0] = jnp.mean(h2, axis=0, keepdims=True)          # scatter_mean


def _grid_norm_factors(hf, wf):
    """D^-1/2 and (row, col) ids for the 8-neighbour hf x wf grid + self loops."""
    i = np.arange(hf)
    j = np.arange(wf)
    rv = 3 - (i == 0).astype(np.int32) - (i == hf - 1).astype(np.int32)
    cv = 3 - (j == 0).astype(np.int32) - (j == wf - 1).astype(np.int32)
    deg = rv[:, None] * cv[None, :]             # |3x3 window ∩ grid| = rowsum(A+I)
    dinv = (1.0 / np.sqrt(deg.astype(np.float32))).reshape(-1, 1)
    row_id = np.repeat(i, wf).reshape(-1, 1).astype(np.int32)
    col_id = np.tile(j, hf).reshape(-1, 1).astype(np.int32)
    return jnp.asarray(dinv), jnp.asarray(row_id), jnp.asarray(col_id)


def gcn_head(nodes, params, hf, wf):
    B, n, cin = nodes.shape
    hidden = params["gcn1_w"].shape[1]
    out_c = params["gcn2_w"].shape[1]
    dinv, row_id, col_id = _grid_norm_factors(hf, wf)
    out = pl.pallas_call(
        functools.partial(_gcn_fused_kernel, hf=hf, wf=wf),
        out_shape=jax.ShapeDtypeStruct((B, 1, out_c), jnp.float32),
        grid=(B,),
        in_specs=[
            pl.BlockSpec((1, n, cin), lambda b: (b, 0, 0)),
            pl.BlockSpec((n, 1), lambda b: (0, 0)),
            pl.BlockSpec((n, 1), lambda b: (0, 0)),
            pl.BlockSpec((n, 1), lambda b: (0, 0)),
            pl.BlockSpec((cin, hidden), lambda b: (0, 0)),
            pl.BlockSpec((1, hidden), lambda b: (0, 0)),
            pl.BlockSpec((hidden, out_c), lambda b: (0, 0)),
            pl.BlockSpec((1, out_c), lambda b: (0, 0)),
        ],
        out_specs=pl.BlockSpec((1, 1, out_c), lambda b: (b, 0, 0)),
        compiler_params=pltpu.CompilerParams(
            dimension_semantics=("parallel",)),
    )(nodes.astype(jnp.bfloat16), dinv, row_id, col_id,
      params["gcn1_w"].astype(jnp.bfloat16),
      params["gcn1_b"].reshape(1, hidden).astype(jnp.float32),
      params["gcn2_w"].astype(jnp.bfloat16),
      params["gcn2_b"].reshape(1, out_c).astype(jnp.float32))
    return out.reshape(B, out_c)


# --------------------------------------------------------------------------
# parameters & forward
# --------------------------------------------------------------------------
def init_params(key, in_nodes_c, hidden, out_c):
    ks = jax.random.split(key, 8)

    def kaiming(k, shape):            # mode='fan_out', nonlinearity='relu'
        fan_out = shape[0] * shape[2] * shape[3]
        return math.sqrt(2.0 / fan_out) * jax.random.normal(
            k, shape, dtype=jnp.float32)

    def bn(c):
        return dict(gamma=jnp.ones((c,), jnp.float32),
                    beta=jnp.zeros((c,), jnp.float32),
                    mean=jnp.zeros((c,), jnp.float32),
                    var=jnp.ones((c,), jnp.float32))

    def glorot(k, fi, fo):
        lim = math.sqrt(6.0 / (fi + fo))
        return jax.random.uniform(k, (fi, fo), jnp.float32, -lim, lim)

    return {
        "conv1_w": kaiming(ks[0], (64, 1, 7, 7)),
        "bn1": bn(64),
        "block": {
            "w1": kaiming(ks[1], (64, 64, 3, 3)), "bn1": bn(64),
            "w2": kaiming(ks[2], (64, 64, 3, 3)), "bn2": bn(64),
        },
        "gcn1_w": glorot(ks[3], in_nodes_c, hidden),
        "gcn1_b": jnp.zeros((hidden,), jnp.float32),
        "gcn2_w": glorot(ks[4], hidden, out_c),
        "gcn2_b": jnp.zeros((out_c,), jnp.float32),
    }


def gcn_forward(x, params):
    # NCHW -> NHWC once, bf16 activations end-to-end afterwards.
    x = jnp.transpose(x, (0, 2, 3, 1)).astype(jnp.bfloat16)

    # ResNet backbone (num_resblock = [1])
    x = conv7x7_s2_bn_relu(x, params["conv1_w"], params["bn1"])
    x = maxpool3x3_s2_p1(x)
    x = basic_block(x, params["block"])

    # flatten to nodes: NHWC -> (B, H*W, C) == view(B,C,-1).transpose(1,2)
    B, Hf, Wf, C = x.shape
    nodes = x.reshape(B, Hf * Wf, C)

    # fused GCNConv+ReLU -> GCNConv -> scatter_mean (num_gcnlayer = 2)
    return gcn_head(nodes, params, Hf, Wf)


# --------------------------------------------------------------------------
if __name__ == "__main__":
    B, H_IN, W_IN = 2, 32, 32          # small stand-in for (B, 1, 487, 400)
    HIDDEN, OUT = 32, 6                # hidden_channels, out_channels

    key = jax.random.PRNGKey(0)
    kx, kp = jax.random.split(key)
    x = jax.random.normal(kx, (B, 1, H_IN, W_IN), dtype=jnp.float32)
    params = init_params(kp, in_nodes_c=64, hidden=HIDDEN, out_c=OUT)

    fwd = jax.jit(gcn_forward)
    out = fwd(x, params)
    jax.block_until_ready(out)
    assert out.shape == (B, OUT), out.shape
    assert bool(jnp.all(jnp.isfinite(out)))
    print("KERNEL_OK")
</pallas_src>

<mosaic_0001>
module attributes {stable_mosaic.version = 11 : i64} {
  func.func @_matmul_bias_act_kernel(%arg0: i32, %arg1: memref<512x49xbf16, #tpu.memory_space<vmem>>, %arg2: memref<49x64xbf16, #tpu.memory_space<vmem>>, %arg3: memref<1x64xf32, #tpu.memory_space<vmem>>, %arg4: memref<512x64xbf16, #tpu.memory_space<vmem>>) attributes {dimension_semantics = [#tpu.dimension_semantics<parallel>], iteration_bounds = array<i64: 1>, scalar_prefetch = 0 : i64, scratch_operands = 0 : i64, tpu.core_type = #tpu.core_type<tc>, window_params = [{transform_indices = @transform_0, window_bounds = array<i64: 512, 49>}, {pipeline_mode = #tpu.pipeline_mode<synchronous>, transform_indices = @transform_1, window_bounds = array<i64: 49, 64>}, {pipeline_mode = #tpu.pipeline_mode<synchronous>, transform_indices = @transform_2, window_bounds = array<i64: 1, 64>}, {transform_indices = @transform_3, window_bounds = array<i64: 512, 64>}]} {
    %c0 = arith.constant 0 : index
    %c0_0 = arith.constant 0 : index
    %0 = vector.load %arg1[%c0, %c0_0] : memref<512x49xbf16, #tpu.memory_space<vmem>>, vector<512x49xbf16>
    %c0_1 = arith.constant 0 : index
    %c0_2 = arith.constant 0 : index
    %1 = vector.load %arg2[%c0_1, %c0_2] : memref<49x64xbf16, #tpu.memory_space<vmem>>, vector<49x64xbf16>
    %cst = arith.constant dense<0.000000e+00> : vector<512x64xf32>
    %2 = tpu.matmul %0, %1, %cst {dimension_numbers = #tpu.dot_dimension_numbers<[1], [0], [0], [1], [0, 0, 1, 1], [], []>} : vector<512x49xbf16>, vector<49x64xbf16>, vector<512x64xf32> -> vector<512x64xf32>
    %c0_3 = arith.constant 0 : index
    %c0_4 = arith.constant 0 : index
    %3 = vector.load %arg3[%c0_3, %c0_4] : memref<1x64xf32, #tpu.memory_space<vmem>>, vector<1x64xf32>
    %4 = vector.broadcast %3 : vector<1x64xf32> to vector<512x64xf32>
    %5 = arith.addf %2, %4 : vector<512x64xf32>
    %cst_5 = arith.constant 0.000000e+00 : f32
    %6 = vector.broadcast %cst_5 : f32 to vector<512x64xf32>
    %7 = arith.maximumf %5, %6 : vector<512x64xf32>
    %8 = arith.truncf %7 : vector<512x64xf32> to vector<512x64xbf16>
    %c0_6 = arith.constant 0 : index
    %c0_7 = arith.constant 0 : index
    %9 = vector.load %arg4[%c0_6, %c0_7] : memref<512x64xbf16, #tpu.memory_space<vmem>>, vector<512x64xbf16>
    tpu.vector_store %arg4[%c0_6, %c0_7], %8 {strides = array<i32>} : memref<512x64xbf16, #tpu.memory_space<vmem>>, vector<512x64xbf16>,
    return
  }
  func.func @transform_0(%arg0: i32) -> (i32, i32) {
    %c0_i32 = arith.constant 0 : i32
    %c0_i32_0 = arith.constant 0 : i32
    return %arg0, %c0_i32 : i32, i32
  }
  func.func @transform_1(%arg0: i32) -> (i32, i32) {
    %c0_i32 = arith.constant 0 : i32
    %c0_i32_0 = arith.constant 0 : i32
    %c0_i32_1 = arith.constant 0 : i32
    return %c0_i32, %c0_i32_0 : i32, i32
  }
  func.func @transform_2(%arg0: i32) -> (i32, i32) {
    %c0_i32 = arith.constant 0 : i32
    %c0_i32_0 = arith.constant 0 : i32
    %c0_i32_1 = arith.constant 0 : i32
    return %c0_i32, %c0_i32_0 : i32, i32
  }
  func.func @transform_3(%arg0: i32) -> (i32, i32) {
    %c0_i32 = arith.constant 0 : i32
    %c0_i32_0 = arith.constant 0 : i32
    return %arg0, %c0_i32 : i32, i32
  }
}

module attributes {stable_mosaic.version = 11 : i64} {
  func.func @_maxpool_kernel(%arg0: i32, %arg1: memref<1x9x9x64xbf16, #tpu.memory_space<vmem>>, %arg2: memref<1x9x8x64xbf16, #tpu.memory_space<vmem>>, %arg3: memref<1x8x9x64xbf16, #tpu.memory_space<vmem>>, %arg4: memref<1x8x8x64xbf16, #tpu.memory_space<vmem>>, %arg5: memref<1x8x8x64xbf16, #tpu.memory_space<vmem>>) attributes {dimension_semantics = [#tpu.dimension_semantics<parallel>], iteration_bounds = array<i64: 2>, scalar_prefetch = 0 : i64, scratch_operands = 0 : i64, tpu.core_type = #tpu.core_type<tc>, window_params = [{transform_indices = @transform_0, window_bounds = array<i64: 1, 9, 9, 64>}, {transform_indices = @transform_1, window_bounds = array<i64: 1, 9, 8, 64>}, {transform_indices = @transform_2, window_bounds = array<i64: 1, 8, 9, 64>}, {transform_indices = @transform_3, window_bounds = array<i64: 1, 8, 8, 64>}, {transform_indices = @transform_4, window_bounds = array<i64: 1, 8, 8, 64>}]} {
    %c0 = arith.constant 0 : index
    %c0_0 = arith.constant 0 : index
    %c0_1 = arith.constant 0 : index
    %c0_2 = arith.constant 0 : index
    %0 = vector.load %arg1[%c0, %c0_0, %c0_1, %c0_2] : memref<1x9x9x64xbf16, #tpu.memory_space<vmem>>, vector<1x9x9x64xbf16>
    %1 = vector.shape_cast %0 : vector<1x9x9x64xbf16> to vector<9x9x64xbf16>
    %c0_3 = arith.constant 0 : index
    %c0_4 = arith.constant 0 : index
    %c0_5 = arith.constant 0 : index
    %c0_6 = arith.constant 0 : index
    %2 = vector.load %arg2[%c0_3, %c0_4, %c0_5, %c0_6] : memref<1x9x8x64xbf16, #tpu.memory_space<vmem>>, vector<1x9x8x64xbf16>
    %3 = vector.shape_cast %2 : vector<1x9x8x64xbf16> to vector<9x8x64xbf16>
    %c0_7 = arith.constant 0 : index
    %c0_8 = arith.constant 0 : index
    %c0_9 = arith.constant 0 : index
    %c0_10 = arith.constant 0 : index
    %4 = vector.load %arg3[%c0_7, %c0_8, %c0_9, %c0_10] : memref<1x8x9x64xbf16, #tpu.memory_space<vmem>>, vector<1x8x9x64xbf16>
    %5 = vector.shape_cast %4 : vector<1x8x9x64xbf16> to vector<8x9x64xbf16>
    %c0_11 = arith.constant 0 : index
    %c0_12 = arith.constant 0 : index
    %c0_13 = arith.constant 0 : index
    %c0_14 = arith.constant 0 : index
    %6 = vector.load %arg4[%c0_11, %c0_12, %c0_13, %c0_14] : memref<1x8x8x64xbf16, #tpu.memory_space<vmem>>, vector<1x8x8x64xbf16>
    %7 = vector.shape_cast %6 : vector<1x8x8x64xbf16> to vector<8x8x64xbf16>
    %8 = vector.extract_strided_slice %1 {offsets = [0, 0, 0], sizes = [8, 8, 64], strides = [1, 1, 1]} : vector<9x9x64xbf16> to vector<8x8x64xbf16>
    %9 = vector.extract_strided_slice %3 {offsets = [0, 0, 0], sizes = [8, 8, 64], strides = [1, 1, 1]} : vector<9x8x64xbf16> to vector<8x8x64xbf16>
    %10 = arith.maximumf %8, %9 : vector<8x8x64xbf16>
    %11 = vector.extract_strided_slice %1 {offsets = [0, 1, 0], sizes = [8, 8, 64], strides = [1, 1, 1]} : vector<9x9x64xbf16> to vector<8x8x64xbf16>
    %12 = arith.maximumf %10, %11 : vector<8x8x64xbf16>
    %13 = vector.extract_strided_slice %5 {offsets = [0, 0, 0], sizes = [8, 8, 64], strides = [1, 1, 1]} : vector<8x9x64xbf16> to vector<8x8x64xbf16>
    %14 = arith.maximumf %12, %13 : vector<8x8x64xbf16>
    %15 = arith.maximumf %14, %7 : vector<8x8x64xbf16>
    %16 = vector.extract_strided_slice %5 {offsets = [0, 1, 0], sizes = [8, 8, 64], strides = [1, 1, 1]} : vector<8x9x64xbf16> to vector<8x8x64xbf16>
    %17 = arith.maximumf %15, %16 : vector<8x8x64xbf16>
    %18 = vector.extract_strided_slice %1 {offsets = [1, 0, 0], sizes = [8, 8, 64], strides = [1, 1, 1]} : vector<9x9x64xbf16> to vector<8x8x64xbf16>
    %19 = arith.maximumf %17, %18 : vector<8x8x64xbf16>
    %20 = vector.extract_strided_slice %3 {offsets = [1, 0, 0], sizes = [8, 8, 64], strides = [1, 1, 1]} : vector<9x8x64xbf16> to vector<8x8x64xbf16>
    %21 = arith.maximumf %19, %20 : vector<8x8x64xbf16>
    %22 = vector.extract_strided_slice %1 {offsets = [1, 1, 0], sizes = [8, 8, 64], strides = [1, 1, 1]} : vector<9x9x64xbf16> to vector<8x8x64xbf16>
    %23 = arith.maximumf %21, %22 : vector<8x8x64xbf16>
    %c0_15 = arith.constant 0 : index
    %c0_16 = arith.constant 0 : index
    %c0_17 = arith.constant 0 : index
    %c0_18 = arith.constant 0 : index
    %24 = vector.load %arg5[%c0_15, %c0_16, %c0_17, %c0_18] : memref<1x8x8x64xbf16, #tpu.memory_space<vmem>>, vector<1x8x8x64xbf16>
    %25 = vector.shape_cast %24 : vector<1x8x8x64xbf16> to vector<8x8x64xbf16>
    %26 = vector.shape_cast %23 : vector<8x8x64xbf16> to vector<1x8x8x64xbf16>
    tpu.vector_store %arg5[%c0_15, %c0_16, %c0_17, %c0_18], %26 {strides = array<i32>} : memref<1x8x8x64xbf16, #tpu.memory_space<vmem>>, vector<1x8x8x64xbf16>,
    return
  }
  func.func @transform_0(%arg0: i32) -> (i32, i32, i32, i32) {
    %c0_i32 = arith.constant 0 : i32
    %c0_i32_0 = arith.constant 0 : i32
    %c0_i32_1 = arith.constant 0 : i32
    %c0_i32_2 = arith.constant 0 : i32
    return %arg0, %c0_i32, %c0_i32_0, %c0_i32_1 : i32, i32, i32, i32
  }
  func.func @transform_1(%arg0: i32) -> (i32, i32, i32, i32) {
    %c0_i32 = arith.constant 0 : i32
    %c0_i32_0 = arith.constant 0 : i32
    %c0_i32_1 = arith.constant 0 : i32
    %c0_i32_2 = arith.constant 0 : i32
    return %arg0, %c0_i32, %c0_i32_0, %c0_i32_1 : i32, i32, i32, i32
  }
  func.func @transform_2(%arg0: i32) -> (i32, i32, i32, i32) {
    %c0_i32 = arith.constant 0 : i32
    %c0_i32_0 = arith.constant 0 : i32
    %c0_i32_1 = arith.constant 0 : i32
    %c0_i32_2 = arith.constant 0 : i32
    return %arg0, %c0_i32, %c0_i32_0, %c0_i32_1 : i32, i32, i32, i32
  }
  func.func @transform_3(%arg0: i32) -> (i32, i32, i32, i32) {
    %c0_i32 = arith.constant 0 : i32
    %c0_i32_0 = arith.constant 0 : i32
    %c0_i32_1 = arith.constant 0 : i32
    %c0_i32_2 = arith.constant 0 : i32
    return %arg0, %c0_i32, %c0_i32_0, %c0_i32_1 : i32, i32, i32, i32
  }
  func.func @transform_4(%arg0: i32) -> (i32, i32, i32, i32) {
    %c0_i32 = arith.constant 0 : i32
    %c0_i32_0 = arith.constant 0 : i32
    %c0_i32_1 = arith.constant 0 : i32
    %c0_i32_2 = arith.constant 0 : i32
    return %arg0, %c0_i32, %c0_i32_0, %c0_i32_1 : i32, i32, i32, i32
  }
}

module attributes {stable_mosaic.version = 11 : i64} {
  func.func @_conv3x3_row_kernel(%arg0: i32, %arg1: i32, %arg2: memref<1x1x10x64xbf16, #tpu.memory_space<vmem>>, %arg3: memref<1x1x10x64xbf16, #tpu.memory_space<vmem>>, %arg4: memref<1x1x10x64xbf16, #tpu.memory_space<vmem>>, %arg5: memref<9x64x64xbf16, #tpu.memory_space<vmem>>, %arg6: memref<1x64xf32, #tpu.memory_space<vmem>>, %arg7: memref<1x1x8x64xbf16, #tpu.memory_space<vmem>>) attributes {dimension_semantics = [#tpu.dimension_semantics<parallel>, #tpu.dimension_semantics<parallel>], iteration_bounds = array<i64: 2, 8>, scalar_prefetch = 0 : i64, scratch_operands = 0 : i64, tpu.core_type = #tpu.core_type<tc>, window_params = [{transform_indices = @transform_0, window_bounds = array<i64: 1, 1, 10, 64>}, {transform_indices = @transform_1, window_bounds = array<i64: 1, 1, 10, 64>}, {transform_indices = @transform_2, window_bounds = array<i64: 1, 1, 10, 64>}, {pipeline_mode = #tpu.pipeline_mode<synchronous>, transform_indices = @transform_3, window_bounds = array<i64: 9, 64, 64>}, {pipeline_mode = #tpu.pipeline_mode<synchronous>, transform_indices = @transform_4, window_bounds = array<i64: 1, 64>}, {transform_indices = @transform_5, window_bounds = array<i64: 1, 1, 8, 64>}]} {
    %c0 = arith.constant 0 : index
    %c0_0 = arith.constant 0 : index
    %c0_1 = arith.constant 0 : index
    %c0_2 = arith.constant 0 : index
    %0 = vector.load %arg2[%c0, %c0_0, %c0_1, %c0_2] : memref<1x1x10x64xbf16, #tpu.memory_space<vmem>>, vector<1x1x8x64xbf16>
    %1 = vector.shape_cast %0 : vector<1x1x8x64xbf16> to vector<8x64xbf16>
    %c0_3 = arith.constant 0 : index
    %c0_4 = arith.constant 0 : index
    %c0_5 = arith.constant 0 : index
    %2 = vector.load %arg5[%c0_3, %c0_4, %c0_5] : memref<9x64x64xbf16, #tpu.memory_space<vmem>>, vector<1x64x64xbf16>
    %3 = vector.shape_cast %2 : vector<1x64x64xbf16> to vector<64x64xbf16>
    %cst = arith.constant dense<0.000000e+00> : vector<8x64xf32>
    %4 = tpu.matmul %1, %3, %cst {dimension_numbers = #tpu.dot_dimension_numbers<[1], [0], [0], [1], [0, 0, 1, 1], [], []>} : vector<8x64xbf16>, vector<64x64xbf16>, vector<8x64xf32> -> vector<8x64xf32>
    %c0_6 = arith.constant 0 : index
    %c0_7 = arith.constant 0 : index
    %c1 = arith.constant 1 : index
    %c0_8 = arith.constant 0 : index
    %5 = vector.load %arg2[%c0_6, %c0_7, %c1, %c0_8] : memref<1x1x10x64xbf16, #tpu.memory_space<vmem>>, vector<1x1x8x64xbf16>
    %6 = vector.shape_cast %5 : vector<1x1x8x64xbf16> to vector<8x64xbf16>
    %c1_9 = arith.constant 1 : index
    %c0_10 = arith.constant 0 : index
    %c0_11 = arith.constant 0 : index
    %7 = vector.load %arg5[%c1_9, %c0_10, %c0_11] : memref<9x64x64xbf16, #tpu.memory_space<vmem>>, vector<1x64x64xbf16>
    %8 = vector.shape_cast %7 : vector<1x64x64xbf16> to vector<64x64xbf16>
    %cst_12 = arith.constant dense<0.000000e+00> : vector<8x64xf32>
    %9 = tpu.matmul %6, %8, %cst_12 {dimension_numbers = #tpu.dot_dimension_numbers<[1], [0], [0], [1], [0, 0, 1, 1], [], []>} : vector<8x64xbf16>, vector<64x64xbf16>, vector<8x64xf32> -> vector<8x64xf32>
    %10 = arith.addf %4, %9 : vector<8x64xf32>
    %c0_13 = arith.constant 0 : index
    %c0_14 = arith.constant 0 : index
    %c2 = arith.constant 2 : index
    %c0_15 = arith.constant 0 : index
    %11 = vector.load %arg2[%c0_13, %c0_14, %c2, %c0_15] : memref<1x1x10x64xbf16, #tpu.memory_space<vmem>>, vector<1x1x8x64xbf16>
    %12 = vector.shape_cast %11 : vector<1x1x8x64xbf16> to vector<8x64xbf16>
    %c2_16 = arith.constant 2 : index
    %c0_17 = arith.constant 0 : index
    %c0_18 = arith.constant 0 : index
    %13 = vector.load %arg5[%c2_16, %c0_17, %c0_18] : memref<9x64x64xbf16, #tpu.memory_space<vmem>>, vector<1x64x64xbf16>
    %14 = vector.shape_cast %13 : vector<1x64x64xbf16> to vector<64x64xbf16>
    %cst_19 = arith.constant dense<0.000000e+00> : vector<8x64xf32>
    %15 = tpu.matmul %12, %14, %cst_19 {dimension_numbers = #tpu.dot_dimension_numbers<[1], [0], [0], [1], [0, 0, 1, 1], [], []>} : vector<8x64xbf16>, vector<64x64xbf16>, vector<8x64xf32> -> vector<8x64xf32>
    %16 = arith.addf %10, %15 : vector<8x64xf32>
    %c0_20 = arith.constant 0 : index
    %c0_21 = arith.constant 0 : index
    %c0_22 = arith.constant 0 : index
    %c0_23 = arith.constant 0 : index
    %17 = vector.load %arg3[%c0_20, %c0_21, %c0_22, %c0_23] : memref<1x1x10x64xbf16, #tpu.memory_space<vmem>>, vector<1x1x8x64xbf16>
    %18 = vector.shape_cast %17 : vector<1x1x8x64xbf16> to vector<8x64xbf16>
    %c3 = arith.constant 3 : index
    %c0_24 = arith.constant 0 : index
    %c0_25 = arith.constant 0 : index
    %19 = vector.load %arg5[%c3, %c0_24, %c0_25] : memref<9x64x64xbf16, #tpu.memory_space<vmem>>, vector<1x64x64xbf16>
    %20 = vector.shape_cast %19 : vector<1x64x64xbf16> to vector<64x64xbf16>
    %cst_26 = arith.constant dense<0.000000e+00> : vector<8x64xf32>
    %21 = tpu.matmul %18, %20, %cst_26 {dimension_numbers = #tpu.dot_dimension_numbers<[1], [0], [0], [1], [0, 0, 1, 1], [], []>} : vector<8x64xbf16>, vector<64x64xbf16>, vector<8x64xf32> -> vector<8x64xf32>
    %22 = arith.addf %16, %21 : vector<8x64xf32>
    %c0_27 = arith.constant 0 : index
    %c0_28 = arith.constant 0 : index
    %c1_29 = arith.constant 1 : index
    %c0_30 = arith.constant 0 : index
    %23 = vector.load %arg3[%c0_27, %c0_28, %c1_29, %c0_30] : memref<1x1x10x64xbf16, #tpu.memory_space<vmem>>, vector<1x1x8x64xbf16>
    %24 = vector.shape_cast %23 : vector<1x1x8x64xbf16> to vector<8x64xbf16>
    %c4 = arith.constant 4 : index
    %c0_31 = arith.constant 0 : index
    %c0_32 = arith.constant 0 : index
    %25 = vector.load %arg5[%c4, %c0_31, %c0_32] : memref<9x64x64xbf16, #tpu.memory_space<vmem>>, vector<1x64x64xbf16>
    %26 = vector.shape_cast %25 : vector<1x64x64xbf16> to vector<64x64xbf16>
    %cst_33 = arith.constant dense<0.000000e+00> : vector<8x64xf32>
    %27 = tpu.matmul %24, %26, %cst_33 {dimension_numbers = #tpu.dot_dimension_numbers<[1], [0], [0], [1], [0, 0, 1, 1], [], []>} : vector<8x64xbf16>, vector<64x64xbf16>, vector<8x64xf32> -> vector<8x64xf32>
    %28 = arith.addf %22, %27 : vector<8x64xf32>
    %c0_34 = arith.constant 0 : index
    %c0_35 = arith.constant 0 : index
    %c2_36 = arith.constant 2 : index
    %c0_37 = arith.constant 0 : index
    %29 = vector.load %arg3[%c0_34, %c0_35, %c2_36, %c0_37] : memref<1x1x10x64xbf16, #tpu.memory_space<vmem>>, vector<1x1x8x64xbf16>
    %30 = vector.shape_cast %29 : vector<1x1x8x64xbf16> to vector<8x64xbf16>
    %c5 = arith.constant 5 : index
    %c0_38 = arith.constant 0 : index
    %c0_39 = arith.constant 0 : index
    %31 = vector.load %arg5[%c5, %c0_38, %c0_39] : memref<9x64x64xbf16, #tpu.memory_space<vmem>>, vector<1x64x64xbf16>
    %32 = vector.shape_cast %31 : vector<1x64x64xbf16> to vector<64x64xbf16>
    %cst_40 = arith.constant dense<0.000000e+00> : vector<8x64xf32>
    %33 = tpu.matmul %30, %32, %cst_40 {dimension_numbers = #tpu.dot_dimension_numbers<[1], [0], [0], [1], [0, 0, 1, 1], [], []>} : vector<8x64xbf16>, vector<64x64xbf16>, vector<8x64xf32> -> vector<8x64xf32>
    %34 = arith.addf %28, %33 : vector<8x64xf32>
    %c0_41 = arith.constant 0 : index
    %c0_42 = arith.constant 0 : index
    %c0_43 = arith.constant 0 : index
    %c0_44 = arith.constant 0 : index
    %35 = vector.load %arg4[%c0_41, %c0_42, %c0_43, %c0_44] : memref<1x1x10x64xbf16, #tpu.memory_space<vmem>>, vector<1x1x8x64xbf16>
    %36 = vector.shape_cast %35 : vector<1x1x8x64xbf16> to vector<8x64xbf16>
    %c6 = arith.constant 6 : index
    %c0_45 = arith.constant 0 : index
    %c0_46 = arith.constant 0 : index
    %37 = vector.load %arg5[%c6, %c0_45, %c0_46] : memref<9x64x64xbf16, #tpu.memory_space<vmem>>, vector<1x64x64xbf16>
    %38 = vector.shape_cast %37 : vector<1x64x64xbf16> to vector<64x64xbf16>
    %cst_47 = arith.constant dense<0.000000e+00> : vector<8x64xf32>
    %39 = tpu.matmul %36, %38, %cst_47 {dimension_numbers = #tpu.dot_dimension_numbers<[1], [0], [0], [1], [0, 0, 1, 1], [], []>} : vector<8x64xbf16>, vector<64x64xbf16>, vector<8x64xf32> -> vector<8x64xf32>
    %40 = arith.addf %34, %39 : vector<8x64xf32>
    %c0_48 = arith.constant 0 : index
    %c0_49 = arith.constant 0 : index
    %c1_50 = arith.constant 1 : index
    %c0_51 = arith.constant 0 : index
    %41 = vector.load %arg4[%c0_48, %c0_49, %c1_50, %c0_51] : memref<1x1x10x64xbf16, #tpu.memory_space<vmem>>, vector<1x1x8x64xbf16>
    %42 = vector.shape_cast %41 : vector<1x1x8x64xbf16> to vector<8x64xbf16>
    %c7 = arith.constant 7 : index
    %c0_52 = arith.constant 0 : index
    %c0_53 = arith.constant 0 : index
    %43 = vector.load %arg5[%c7, %c0_52, %c0_53] : memref<9x64x64xbf16, #tpu.memory_space<vmem>>, vector<1x64x64xbf16>
    %44 = vector.shape_cast %43 : vector<1x64x64xbf16> to vector<64x64xbf16>
    %cst_54 = arith.constant dense<0.000000e+00> : vector<8x64xf32>
    %45 = tpu.matmul %42, %44, %cst_54 {dimension_numbers = #tpu.dot_dimension_numbers<[1], [0], [0], [1], [0, 0, 1, 1], [], []>} : vector<8x64xbf16>, vector<64x64xbf16>, vector<8x64xf32> -> vector<8x64xf32>
    %46 = arith.addf %40, %45 : vector<8x64xf32>
    %c0_55 = arith.constant 0 : index
    %c0_56 = arith.constant 0 : index
    %c2_57 = arith.constant 2 : index
    %c0_58 = arith.constant 0 : index
    %47 = vector.load %arg4[%c0_55, %c0_56, %c2_57, %c0_58] : memref<1x1x10x64xbf16, #tpu.memory_space<vmem>>, vector<1x1x8x64xbf16>
    %48 = vector.shape_cast %47 : vector<1x1x8x64xbf16> to vector<8x64xbf16>
    %c8 = arith.constant 8 : index
    %c0_59 = arith.constant 0 : index
    %c0_60 = arith.constant 0 : index
    %49 = vector.load %arg5[%c8, %c0_59, %c0_60] : memref<9x64x64xbf16, #tpu.memory_space<vmem>>, vector<1x64x64xbf16>
    %50 = vector.shape_cast %49 : vector<1x64x64xbf16> to vector<64x64xbf16>
    %cst_61 = arith.constant dense<0.000000e+00> : vector<8x64xf32>
    %51 = tpu.matmul %48, %50, %cst_61 {dimension_numbers = #tpu.dot_dimension_numbers<[1], [0], [0], [1], [0, 0, 1, 1], [], []>} : vector<8x64xbf16>, vector<64x64xbf16>, vector<8x64xf32> -> vector<8x64xf32>
    %52 = arith.addf %46, %51 : vector<8x64xf32>
    %c0_62 = arith.constant 0 : index
    %c0_63 = arith.constant 0 : index
    %53 = vector.load %arg6[%c0_62, %c0_63] : memref<1x64xf32, #tpu.memory_space<vmem>>, vector<1x64xf32>
    %54 = vector.broadcast %53 : vector<1x64xf32> to vector<8x64xf32>
    %55 = arith.addf %52, %54 : vector<8x64xf32>
    %cst_64 = arith.constant 0.000000e+00 : f32
    %56 = vector.broadcast %cst_64 : f32 to vector<8x64xf32>
    %57 = arith.maximumf %55, %56 : vector<8x64xf32>
    %58 = arith.truncf %57 : vector<8x64xf32> to vector<8x64xbf16>
    %c0_65 = arith.constant 0 : index
    %c0_66 = arith.constant 0 : index
    %c0_67 = arith.constant 0 : index
    %c0_68 = arith.constant 0 : index
    %59 = vector.load %arg7[%c0_65, %c0_66, %c0_67, %c0_68] : memref<1x1x8x64xbf16, #tpu.memory_space<vmem>>, vector<1x1x8x64xbf16>
    %60 = vector.shape_cast %59 : vector<1x1x8x64xbf16> to vector<8x64xbf16>
    %61 = vector.shape_cast %58 : vector<8x64xbf16> to vector<1x1x8x64xbf16>
    tpu.vector_store %arg7[%c0_65, %c0_66, %c0_67, %c0_68], %61 {strides = array<i32>} : memref<1x1x8x64xbf16, #tpu.memory_space<vmem>>, vector<1x1x8x64xbf16>,
    return
  }
  func.func @transform_0(%arg0: i32, %arg1: i32) -> (i32, i32, i32, i32) {
    %c0_i32 = arith.constant 0 : i32
    %0 = arith.addi %arg1, %c0_i32 : i32
    %c0_i32_0 = arith.constant 0 : i32
    %c0_i32_1 = arith.constant 0 : i32
    %c0_i32_2 = arith.constant 0 : i32
    return %arg0, %0, %c0_i32_0, %c0_i32_1 : i32, i32, i32, i32
  }
  func.func @transform_1(%arg0: i32, %arg1: i32) -> (i32, i32, i32, i32) {
    %c1_i32 = arith.constant 1 : i32
    %0 = arith.addi %arg1, %c1_i32 : i32
    %c0_i32 = arith.constant 0 : i32
    %c0_i32_0 = arith.constant 0 : i32
    %c0_i32_1 = arith.constant 0 : i32
    return %arg0, %0, %c0_i32, %c0_i32_0 : i32, i32, i32, i32
  }
  func.func @transform_2(%arg0: i32, %arg1: i32) -> (i32, i32, i32, i32) {
    %c2_i32 = arith.constant 2 : i32
    %0 = arith.addi %arg1, %c2_i32 : i32
    %c0_i32 = arith.constant 0 : i32
    %c0_i32_0 = arith.constant 0 : i32
    %c0_i32_1 = arith.constant 0 : i32
    return %arg0, %0, %c0_i32, %c0_i32_0 : i32, i32, i32, i32
  }
  func.func @transform_3(%arg0: i32, %arg1: i32) -> (i32, i32, i32) {
    %c0_i32 = arith.constant 0 : i32
    %c0_i32_0 = arith.constant 0 : i32
    %c0_i32_1 = arith.constant 0 : i32
    %c0_i32_2 = arith.constant 0 : i32
    return %c0_i32, %c0_i32_0, %c0_i32_1 : i32, i32, i32
  }
  func.func @transform_4(%arg0: i32, %arg1: i32) -> (i32, i32) {
    %c0_i32 = arith.constant 0 : i32
    %c0_i32_0 = arith.constant 0 : i32
    %c0_i32_1 = arith.constant 0 : i32
    return %c0_i32, %c0_i32_0 : i32, i32
  }
  func.func @transform_5(%arg0: i32, %arg1: i32) -> (i32, i32, i32, i32) {
    %c0_i32 = arith.constant 0 : i32
    %c0_i32_0 = arith.constant 0 : i32
    %c0_i32_1 = arith.constant 0 : i32
    return %arg0, %arg1, %c0_i32, %c0_i32_0 : i32, i32, i32, i32
  }
}

module attributes {stable_mosaic.version = 11 : i64} {
  func.func @_conv3x3_row_kernel(%arg0: i32, %arg1: i32, %arg2: memref<1x1x10x64xbf16, #tpu.memory_space<vmem>>, %arg3: memref<1x1x10x64xbf16, #tpu.memory_space<vmem>>, %arg4: memref<1x1x10x64xbf16, #tpu.memory_space<vmem>>, %arg5: memref<9x64x64xbf16, #tpu.memory_space<vmem>>, %arg6: memref<1x64xf32, #tpu.memory_space<vmem>>, %arg7: memref<1x1x8x64xbf16, #tpu.memory_space<vmem>>, %arg8: memref<1x1x8x64xbf16, #tpu.memory_space<vmem>>) attributes {dimension_semantics = [#tpu.dimension_semantics<parallel>, #tpu.dimension_semantics<parallel>], iteration_bounds = array<i64: 2, 8>, scalar_prefetch = 0 : i64, scratch_operands = 0 : i64, tpu.core_type = #tpu.core_type<tc>, window_params = [{transform_indices = @transform_0, window_bounds = array<i64: 1, 1, 10, 64>}, {transform_indices = @transform_1, window_bounds = array<i64: 1, 1, 10, 64>}, {transform_indices = @transform_2, window_bounds = array<i64: 1, 1, 10, 64>}, {pipeline_mode = #tpu.pipeline_mode<synchronous>, transform_indices = @transform_3, window_bounds = array<i64: 9, 64, 64>}, {pipeline_mode = #tpu.pipeline_mode<synchronous>, transform_indices = @transform_4, window_bounds = array<i64: 1, 64>}, {transform_indices = @transform_5, window_bounds = array<i64: 1, 1, 8, 64>}, {transform_indices = @transform_6, window_bounds = array<i64: 1, 1, 8, 64>}]} {
    %c0 = arith.constant 0 : index
    %c0_0 = arith.constant 0 : index
    %c0_1 = arith.constant 0 : index
    %c0_2 = arith.constant 0 : index
    %0 = vector.load %arg2[%c0, %c0_0, %c0_1, %c0_2] : memref<1x1x10x64xbf16, #tpu.memory_space<vmem>>, vector<1x1x8x64xbf16>
    %1 = vector.shape_cast %0 : vector<1x1x8x64xbf16> to vector<8x64xbf16>
    %c0_3 = arith.constant 0 : index
    %c0_4 = arith.constant 0 : index
    %c0_5 = arith.constant 0 : index
    %2 = vector.load %arg5[%c0_3, %c0_4, %c0_5] : memref<9x64x64xbf16, #tpu.memory_space<vmem>>, vector<1x64x64xbf16>
    %3 = vector.shape_cast %2 : vector<1x64x64xbf16> to vector<64x64xbf16>
    %cst = arith.constant dense<0.000000e+00> : vector<8x64xf32>
    %4 = tpu.matmul %1, %3, %cst {dimension_numbers = #tpu.dot_dimension_numbers<[1], [0], [0], [1], [0, 0, 1, 1], [], []>} : vector<8x64xbf16>, vector<64x64xbf16>, vector<8x64xf32> -> vector<8x64xf32>
    %c0_6 = arith.constant 0 : index
    %c0_7 = arith.constant 0 : index
    %c1 = arith.constant 1 : index
    %c0_8 = arith.constant 0 : index
    %5 = vector.load %arg2[%c0_6, %c0_7, %c1, %c0_8] : memref<1x1x10x64xbf16, #tpu.memory_space<vmem>>, vector<1x1x8x64xbf16>
    %6 = vector.shape_cast %5 : vector<1x1x8x64xbf16> to vector<8x64xbf16>
    %c1_9 = arith.constant 1 : index
    %c0_10 = arith.constant 0 : index
    %c0_11 = arith.constant 0 : index
    %7 = vector.load %arg5[%c1_9, %c0_10, %c0_11] : memref<9x64x64xbf16, #tpu.memory_space<vmem>>, vector<1x64x64xbf16>
    %8 = vector.shape_cast %7 : vector<1x64x64xbf16> to vector<64x64xbf16>
    %cst_12 = arith.constant dense<0.000000e+00> : vector<8x64xf32>
    %9 = tpu.matmul %6, %8, %cst_12 {dimension_numbers = #tpu.dot_dimension_numbers<[1], [0], [0], [1], [0, 0, 1, 1], [], []>} : vector<8x64xbf16>, vector<64x64xbf16>, vector<8x64xf32> -> vector<8x64xf32>
    %10 = arith.addf %4, %9 : vector<8x64xf32>
    %c0_13 = arith.constant 0 : index
    %c0_14 = arith.constant 0 : index
    %c2 = arith.constant 2 : index
    %c0_15 = arith.constant 0 : index
    %11 = vector.load %arg2[%c0_13, %c0_14, %c2, %c0_15] : memref<1x1x10x64xbf16, #tpu.memory_space<vmem>>, vector<1x1x8x64xbf16>
    %12 = vector.shape_cast %11 : vector<1x1x8x64xbf16> to vector<8x64xbf16>
    %c2_16 = arith.constant 2 : index
    %c0_17 = arith.constant 0 : index
    %c0_18 = arith.constant 0 : index
    %13 = vector.load %arg5[%c2_16, %c0_17, %c0_18] : memref<9x64x64xbf16, #tpu.memory_space<vmem>>, vector<1x64x64xbf16>
    %14 = vector.shape_cast %13 : vector<1x64x64xbf16> to vector<64x64xbf16>
    %cst_19 = arith.constant dense<0.000000e+00> : vector<8x64xf32>
    %15 = tpu.matmul %12, %14, %cst_19 {dimension_numbers = #tpu.dot_dimension_numbers<[1], [0], [0], [1], [0, 0, 1, 1], [], []>} : vector<8x64xbf16>, vector<64x64xbf16>, vector<8x64xf32> -> vector<8x64xf32>
    %16 = arith.addf %10, %15 : vector<8x64xf32>
    %c0_20 = arith.constant 0 : index
    %c0_21 = arith.constant 0 : index
    %c0_22 = arith.constant 0 : index
    %c0_23 = arith.constant 0 : index
    %17 = vector.load %arg3[%c0_20, %c0_21, %c0_22, %c0_23] : memref<1x1x10x64xbf16, #tpu.memory_space<vmem>>, vector<1x1x8x64xbf16>
    %18 = vector.shape_cast %17 : vector<1x1x8x64xbf16> to vector<8x64xbf16>
    %c3 = arith.constant 3 : index
    %c0_24 = arith.constant 0 : index
    %c0_25 = arith.constant 0 : index
    %19 = vector.load %arg5[%c3, %c0_24, %c0_25] : memref<9x64x64xbf16, #tpu.memory_space<vmem>>, vector<1x64x64xbf16>
    %20 = vector.shape_cast %19 : vector<1x64x64xbf16> to vector<64x64xbf16>
    %cst_26 = arith.constant dense<0.000000e+00> : vector<8x64xf32>
    %21 = tpu.matmul %18, %20, %cst_26 {dimension_numbers = #tpu.dot_dimension_numbers<[1], [0], [0], [1], [0, 0, 1, 1], [], []>} : vector<8x64xbf16>, vector<64x64xbf16>, vector<8x64xf32> -> vector<8x64xf32>
    %22 = arith.addf %16, %21 : vector<8x64xf32>
    %c0_27 = arith.constant 0 : index
    %c0_28 = arith.constant 0 : index
    %c1_29 = arith.constant 1 : index
    %c0_30 = arith.constant 0 : index
    %23 = vector.load %arg3[%c0_27, %c0_28, %c1_29, %c0_30] : memref<1x1x10x64xbf16, #tpu.memory_space<vmem>>, vector<1x1x8x64xbf16>
    %24 = vector.shape_cast %23 : vector<1x1x8x64xbf16> to vector<8x64xbf16>
    %c4 = arith.constant 4 : index
    %c0_31 = arith.constant 0 : index
    %c0_32 = arith.constant 0 : index
    %25 = vector.load %arg5[%c4, %c0_31, %c0_32] : memref<9x64x64xbf16, #tpu.memory_space<vmem>>, vector<1x64x64xbf16>
    %26 = vector.shape_cast %25 : vector<1x64x64xbf16> to vector<64x64xbf16>
    %cst_33 = arith.constant dense<0.000000e+00> : vector<8x64xf32>
    %27 = tpu.matmul %24, %26, %cst_33 {dimension_numbers = #tpu.dot_dimension_numbers<[1], [0], [0], [1], [0, 0, 1, 1], [], []>} : vector<8x64xbf16>, vector<64x64xbf16>, vector<8x64xf32> -> vector<8x64xf32>
    %28 = arith.addf %22, %27 : vector<8x64xf32>
    %c0_34 = arith.constant 0 : index
    %c0_35 = arith.constant 0 : index
    %c2_36 = arith.constant 2 : index
    %c0_37 = arith.constant 0 : index
    %29 = vector.load %arg3[%c0_34, %c0_35, %c2_36, %c0_37] : memref<1x1x10x64xbf16, #tpu.memory_space<vmem>>, vector<1x1x8x64xbf16>
    %30 = vector.shape_cast %29 : vector<1x1x8x64xbf16> to vector<8x64xbf16>
    %c5 = arith.constant 5 : index
    %c0_38 = arith.constant 0 : index
    %c0_39 = arith.constant 0 : index
    %31 = vector.load %arg5[%c5, %c0_38, %c0_39] : memref<9x64x64xbf16, #tpu.memory_space<vmem>>, vector<1x64x64xbf16>
    %32 = vector.shape_cast %31 : vector<1x64x64xbf16> to vector<64x64xbf16>
    %cst_40 = arith.constant dense<0.000000e+00> : vector<8x64xf32>
    %33 = tpu.matmul %30, %32, %cst_40 {dimension_numbers = #tpu.dot_dimension_numbers<[1], [0], [0], [1], [0, 0, 1, 1], [], []>} : vector<8x64xbf16>, vector<64x64xbf16>, vector<8x64xf32> -> vector<8x64xf32>
    %34 = arith.addf %28, %33 : vector<8x64xf32>
    %c0_41 = arith.constant 0 : index
    %c0_42 = arith.constant 0 : index
    %c0_43 = arith.constant 0 : index
    %c0_44 = arith.constant 0 : index
    %35 = vector.load %arg4[%c0_41, %c0_42, %c0_43, %c0_44] : memref<1x1x10x64xbf16, #tpu.memory_space<vmem>>, vector<1x1x8x64xbf16>
    %36 = vector.shape_cast %35 : vector<1x1x8x64xbf16> to vector<8x64xbf16>
    %c6 = arith.constant 6 : index
    %c0_45 = arith.constant 0 : index
    %c0_46 = arith.constant 0 : index
    %37 = vector.load %arg5[%c6, %c0_45, %c0_46] : memref<9x64x64xbf16, #tpu.memory_space<vmem>>, vector<1x64x64xbf16>
    %38 = vector.shape_cast %37 : vector<1x64x64xbf16> to vector<64x64xbf16>
    %cst_47 = arith.constant dense<0.000000e+00> : vector<8x64xf32>
    %39 = tpu.matmul %36, %38, %cst_47 {dimension_numbers = #tpu.dot_dimension_numbers<[1], [0], [0], [1], [0, 0, 1, 1], [], []>} : vector<8x64xbf16>, vector<64x64xbf16>, vector<8x64xf32> -> vector<8x64xf32>
    %40 = arith.addf %34, %39 : vector<8x64xf32>
    %c0_48 = arith.constant 0 : index
    %c0_49 = arith.constant 0 : index
    %c1_50 = arith.constant 1 : index
    %c0_51 = arith.constant 0 : index
    %41 = vector.load %arg4[%c0_48, %c0_49, %c1_50, %c0_51] : memref<1x1x10x64xbf16, #tpu.memory_space<vmem>>, vector<1x1x8x64xbf16>
    %42 = vector.shape_cast %41 : vector<1x1x8x64xbf16> to vector<8x64xbf16>
    %c7 = arith.constant 7 : index
    %c0_52 = arith.constant 0 : index
    %c0_53 = arith.constant 0 : index
    %43 = vector.load %arg5[%c7, %c0_52, %c0_53] : memref<9x64x64xbf16, #tpu.memory_space<vmem>>, vector<1x64x64xbf16>
    %44 = vector.shape_cast %43 : vector<1x64x64xbf16> to vector<64x64xbf16>
    %cst_54 = arith.constant dense<0.000000e+00> : vector<8x64xf32>
    %45 = tpu.matmul %42, %44, %cst_54 {dimension_numbers = #tpu.dot_dimension_numbers<[1], [0], [0], [1], [0, 0, 1, 1], [], []>} : vector<8x64xbf16>, vector<64x64xbf16>, vector<8x64xf32> -> vector<8x64xf32>
    %46 = arith.addf %40, %45 : vector<8x64xf32>
    %c0_55 = arith.constant 0 : index
    %c0_56 = arith.constant 0 : index
    %c2_57 = arith.constant 2 : index
    %c0_58 = arith.constant 0 : index
    %47 = vector.load %arg4[%c0_55, %c0_56, %c2_57, %c0_58] : memref<1x1x10x64xbf16, #tpu.memory_space<vmem>>, vector<1x1x8x64xbf16>
    %48 = vector.shape_cast %47 : vector<1x1x8x64xbf16> to vector<8x64xbf16>
    %c8 = arith.constant 8 : index
    %c0_59 = arith.constant 0 : index
    %c0_60 = arith.constant 0 : index
    %49 = vector.load %arg5[%c8, %c0_59, %c0_60] : memref<9x64x64xbf16, #tpu.memory_space<vmem>>, vector<1x64x64xbf16>
    %50 = vector.shape_cast %49 : vector<1x64x64xbf16> to vector<64x64xbf16>
    %cst_61 = arith.constant dense<0.000000e+00> : vector<8x64xf32>
    %51 = tpu.matmul %48, %50, %cst_61 {dimension_numbers = #tpu.dot_dimension_numbers<[1], [0], [0], [1], [0, 0, 1, 1], [], []>} : vector<8x64xbf16>, vector<64x64xbf16>, vector<8x64xf32> -> vector<8x64xf32>
    %52 = arith.addf %46, %51 : vector<8x64xf32>
    %c0_62 = arith.constant 0 : index
    %c0_63 = arith.constant 0 : index
    %53 = vector.load %arg6[%c0_62, %c0_63] : memref<1x64xf32, #tpu.memory_space<vmem>>, vector<1x64xf32>
    %54 = vector.broadcast %53 : vector<1x64xf32> to vector<8x64xf32>
    %55 = arith.addf %52, %54 : vector<8x64xf32>
    %c0_64 = arith.constant 0 : index
    %c0_65 = arith.constant 0 : index
    %c0_66 = arith.constant 0 : index
    %c0_67 = arith.constant 0 : index
    %56 = vector.load %arg7[%c0_64, %c0_65, %c0_66, %c0_67] : memref<1x1x8x64xbf16, #tpu.memory_space<vmem>>, vector<1x1x8x64xbf16>
    %57 = vector.shape_cast %56 : vector<1x1x8x64xbf16> to vector<8x64xbf16>
    %58 = arith.extf %57 : vector<8x64xbf16> to vector<8x64xf32>
    %59 = arith.addf %55, %58 : vector<8x64xf32>
    %cst_68 = arith.constant 0.000000e+00 : f32
    %60 = vector.broadcast %cst_68 : f32 to vector<8x64xf32>
    %61 = arith.maximumf %59, %60 : vector<8x64xf32>
    %62 = arith.truncf %61 : vector<8x64xf32> to vector<8x64xbf16>
    %c0_69 = arith.constant 0 : index
    %c0_70 = arith.constant 0 : index
    %c0_71 = arith.constant 0 : index
    %c0_72 = arith.constant 0 : index
    %63 = vector.load %arg8[%c0_69, %c0_70, %c0_71, %c0_72] : memref<1x1x8x64xbf16, #tpu.memory_space<vmem>>, vector<1x1x8x64xbf16>
    %64 = vector.shape_cast %63 : vector<1x1x8x64xbf16> to vector<8x64xbf16>
    %65 = vector.shape_cast %62 : vector<8x64xbf16> to vector<1x1x8x64xbf16>
    tpu.vector_store %arg8[%c0_69, %c0_70, %c0_71, %c0_72], %65 {strides = array<i32>} : memref<1x1x8x64xbf16, #tpu.memory_space<vmem>>, vector<1x1x8x64xbf16>,
    return
  }
  func.func @transform_0(%arg0: i32, %arg1: i32) -> (i32, i32, i32, i32) {
    %c0_i32 = arith.constant 0 : i32
    %0 = arith.addi %arg1, %c0_i32 : i32
    %c0_i32_0 = arith.constant 0 : i32
    %c0_i32_1 = arith.constant 0 : i32
    %c0_i32_2 = arith.constant 0 : i32
    return %arg0, %0, %c0_i32_0, %c0_i32_1 : i32, i32, i32, i32
  }
  func.func @transform_1(%arg0: i32, %arg1: i32) -> (i32, i32, i32, i32) {
    %c1_i32 = arith.constant 1 : i32
    %0 = arith.addi %arg1, %c1_i32 : i32
    %c0_i32 = arith.constant 0 : i32
    %c0_i32_0 = arith.constant 0 : i32
    %c0_i32_1 = arith.constant 0 : i32
    return %arg0, %0, %c0_i32, %c0_i32_0 : i32, i32, i32, i32
  }
  func.func @transform_2(%arg0: i32, %arg1: i32) -> (i32, i32, i32, i32) {
    %c2_i32 = arith.constant 2 : i32
    %0 = arith.addi %arg1, %c2_i32 : i32
    %c0_i32 = arith.constant 0 : i32
    %c0_i32_0 = arith.constant 0 : i32
    %c0_i32_1 = arith.constant 0 : i32
    return %arg0, %0, %c0_i32, %c0_i32_0 : i32, i32, i32, i32
  }
  func.func @transform_3(%arg0: i32, %arg1: i32) -> (i32, i32, i32) {
    %c0_i32 = arith.constant 0 : i32
    %c0_i32_0 = arith.constant 0 : i32
    %c0_i32_1 = arith.constant 0 : i32
    %c0_i32_2 = arith.constant 0 : i32
    return %c0_i32, %c0_i32_0, %c0_i32_1 : i32, i32, i32
  }
  func.func @transform_4(%arg0: i32, %arg1: i32) -> (i32, i32) {
    %c0_i32 = arith.constant 0 : i32
    %c0_i32_0 = arith.constant 0 : i32
    %c0_i32_1 = arith.constant 0 : i32
    return %c0_i32, %c0_i32_0 : i32, i32
  }
  func.func @transform_5(%arg0: i32, %arg1: i32) -> (i32, i32, i32, i32) {
    %c0_i32 = arith.constant 0 : i32
    %c0_i32_0 = arith.constant 0 : i32
    %c0_i32_1 = arith.constant 0 : i32
    return %arg0, %arg1, %c0_i32, %c0_i32_0 : i32, i32, i32, i32
  }
  func.func @transform_6(%arg0: i32, %arg1: i32) -> (i32, i32, i32, i32) {
    %c0_i32 = arith.constant 0 : i32
    %c0_i32_0 = arith.constant 0 : i32
    %c0_i32_1 = arith.constant 0 : i32
    return %arg0, %arg1, %c0_i32, %c0_i32_0 : i32, i32, i32, i32
  }
}

module attributes {stable_mosaic.version = 11 : i64} {
  func.func @_gcn_fused_kernel(%arg0: i32, %arg1: memref<1x64x64xbf16, #tpu.memory_space<vmem>>, %arg2: memref<64x1xf32, #tpu.memory_space<vmem>>, %arg3: memref<64x1xi32, #tpu.memory_space<vmem>>, %arg4: memref<64x1xi32, #tpu.memory_space<vmem>>, %arg5: memref<64x32xbf16, #tpu.memory_space<vmem>>, %arg6: memref<1x32xf32, #tpu.memory_space<vmem>>, %arg7: memref<32x6xbf16, #tpu.memory_space<vmem>>, %arg8: memref<1x6xf32, #tpu.memory_space<vmem>>, %arg9: memref<1x1x6xf32, #tpu.memory_space<vmem>>) attributes {dimension_semantics = [#tpu.dimension_semantics<parallel>], iteration_bounds = array<i64: 2>, scalar_prefetch = 0 : i64, scratch_operands = 0 : i64, tpu.core_type = #tpu.core_type<tc>, window_params = [{transform_indices = @transform_0, window_bounds = array<i64: 1, 64, 64>}, {pipeline_mode = #tpu.pipeline_mode<synchronous>, transform_indices = @transform_1, window_bounds = array<i64: 64, 1>}, {pipeline_mode = #tpu.pipeline_mode<synchronous>, transform_indices = @transform_2, window_bounds = array<i64: 64, 1>}, {pipeline_mode = #tpu.pipeline_mode<synchronous>, transform_indices = @transform_3, window_bounds = array<i64: 64, 1>}, {pipeline_mode = #tpu.pipeline_mode<synchronous>, transform_indices = @transform_4, window_bounds = array<i64: 64, 32>}, {pipeline_mode = #tpu.pipeline_mode<synchronous>, transform_indices = @transform_5, window_bounds = array<i64: 1, 32>}, {pipeline_mode = #tpu.pipeline_mode<synchronous>, transform_indices = @transform_6, window_bounds = array<i64: 32, 6>}, {pipeline_mode = #tpu.pipeline_mode<synchronous>, transform_indices = @transform_7, window_bounds = array<i64: 1, 6>}, {transform_indices = @transform_8, window_bounds = array<i64: 1, 1, 6>}]} {
    %c0 = arith.constant 0 : index
    %c0_0 = arith.constant 0 : index
    %0 = vector.load %arg2[%c0, %c0_0] : memref<64x1xf32, #tpu.memory_space<vmem>>, vector<64x1xf32>
    %c0_1 = arith.constant 0 : index
    %c0_2 = arith.constant 0 : index
    %1 = vector.load %arg3[%c0_1, %c0_2] : memref<64x1xi32, #tpu.memory_space<vmem>>, vector<64x1xi32>
    %c0_3 = arith.constant 0 : index
    %c0_4 = arith.constant 0 : index
    %2 = vector.load %arg4[%c0_3, %c0_4] : memref<64x1xi32, #tpu.memory_space<vmem>>, vector<64x1xi32>
    %c0_5 = arith.constant 0 : index
    %c0_6 = arith.constant 0 : index
    %c0_7 = arith.constant 0 : index
    %3 = vector.load %arg1[%c0_5, %c0_6, %c0_7] : memref<1x64x64xbf16, #tpu.memory_space<vmem>>, vector<1x64x64xbf16>
    %4 = vector.shape_cast %3 : vector<1x64x64xbf16> to vector<64x64xbf16>
    %c0_8 = arith.constant 0 : index
    %c0_9 = arith.constant 0 : index
    %5 = vector.load %arg5[%c0_8, %c0_9] : memref<64x32xbf16, #tpu.memory_space<vmem>>, vector<64x32xbf16>
    %cst = arith.constant dense<0.000000e+00> : vector<64x32xf32>
    %6 = tpu.matmul %4, %5, %cst {dimension_numbers = #tpu.dot_dimension_numbers<[1], [0], [0], [1], [0, 0, 1, 1], [], []>} : vector<64x64xbf16>, vector<64x32xbf16>, vector<64x32xf32> -> vector<64x32xf32>
    %7 = vector.broadcast %0 : vector<64x1xf32> to vector<64x32xf32>
    %8 = arith.mulf %6, %7 : vector<64x32xf32>
    %c9_i32 = arith.constant 9 : i32
    %9 = tpu.dynamic_rotate %8 by %c9_i32 dim 0 : vector<64x32xf32>, i32 -> vector<64x32xf32>
    %c0_i32 = arith.constant 0 : i32
    %10 = vector.broadcast %c0_i32 : i32 to vector<64x1xi32>
    %11 = arith.cmpi sgt, %1, %10 : vector<64x1xi32>
    %c0_i32_10 = arith.constant 0 : i32
    %12 = vector.broadcast %c0_i32_10 : i32 to vector<64x1xi32>
    %13 = arith.cmpi sgt, %2, %12 : vector<64x1xi32>
    %14 = arith.andi %11, %13 : vector<64x1xi1>
    %cst_11 = arith.constant 0.000000e+00 : f32
    %15 = vector.shape_cast %14 : vector<64x1xi1> to vector<64x1xi1>
    %16 = vector.broadcast %15 : vector<64x1xi1> to vector<64x32xi1>
    %17 = vector.broadcast %cst_11 : f32 to vector<64x32xf32>
    %18 = arith.select %16, %9, %17 : vector<64x32xi1>, vector<64x32xf32>
    %19 = arith.addf %8, %18 : vector<64x32xf32>
    %c8_i32 = arith.constant 8 : i32
    %20 = tpu.dynamic_rotate %8 by %c8_i32 dim 0 : vector<64x32xf32>, i32 -> vector<64x32xf32>
    %c0_i32_12 = arith.constant 0 : i32
    %21 = vector.broadcast %c0_i32_12 : i32 to vector<64x1xi32>
    %22 = arith.cmpi sgt, %1, %21 : vector<64x1xi32>
    %cst_13 = arith.constant 0.000000e+00 : f32
    %23 = vector.shape_cast %22 : vector<64x1xi1> to vector<64x1xi1>
    %24 = vector.broadcast %23 : vector<64x1xi1> to vector<64x32xi1>
    %25 = vector.broadcast %cst_13 : f32 to vector<64x32xf32>
    %26 = arith.select %24, %20, %25 : vector<64x32xi1>, vector<64x32xf32>
    %27 = arith.addf %19, %26 : vector<64x32xf32>
    %c7_i32 = arith.constant 7 : i32
    %28 = tpu.dynamic_rotate %8 by %c7_i32 dim 0 : vector<64x32xf32>, i32 -> vector<64x32xf32>
    %c0_i32_14 = arith.constant 0 : i32
    %29 = vector.broadcast %c0_i32_14 : i32 to vector<64x1xi32>
    %30 = arith.cmpi sgt, %1, %29 : vector<64x1xi32>
    %c7_i32_15 = arith.constant 7 : i32
    %31 = vector.broadcast %c7_i32_15 : i32 to vector<64x1xi32>
    %32 = arith.cmpi slt, %2, %31 : vector<64x1xi32>
    %33 = arith.andi %30, %32 : vector<64x1xi1>
    %cst_16 = arith.constant 0.000000e+00 : f32
    %34 = vector.shape_cast %33 : vector<64x1xi1> to vector<64x1xi1>
    %35 = vector.broadcast %34 : vector<64x1xi1> to vector<64x32xi1>
    %36 = vector.broadcast %cst_16 : f32 to vector<64x32xf32>
    %37 = arith.select %35, %28, %36 : vector<64x32xi1>, vector<64x32xf32>
    %38 = arith.addf %27, %37 : vector<64x32xf32>
    %c1_i32 = arith.constant 1 : i32
    %39 = tpu.dynamic_rotate %8 by %c1_i32 dim 0 : vector<64x32xf32>, i32 -> vector<64x32xf32>
    %c0_i32_17 = arith.constant 0 : i32
    %40 = vector.broadcast %c0_i32_17 : i32 to vector<64x1xi32>
    %41 = arith.cmpi sgt, %2, %40 : vector<64x1xi32>
    %cst_18 = arith.constant 0.000000e+00 : f32
    %42 = vector.shape_cast %41 : vector<64x1xi1> to vector<64x1xi1>
    %43 = vector.broadcast %42 : vector<64x1xi1> to vector<64x32xi1>
    %44 = vector.broadcast %cst_18 : f32 to vector<64x32xf32>
    %45 = arith.select %43, %39, %44 : vector<64x32xi1>, vector<64x32xf32>
    %46 = arith.addf %38, %45 : vector<64x32xf32>
    %c63_i32 = arith.constant 63 : i32
    %47 = tpu.dynamic_rotate %8 by %c63_i32 dim 0 : vector<64x32xf32>, i32 -> vector<64x32xf32>
    %c7_i32_19 = arith.constant 7 : i32
    %48 = vector.broadcast %c7_i32_19 : i32 to vector<64x1xi32>
    %49 = arith.cmpi slt, %2, %48 : vector<64x1xi32>
    %cst_20 = arith.constant 0.000000e+00 : f32
    %50 = vector.shape_cast %49 : vector<64x1xi1> to vector<64x1xi1>
    %51 = vector.broadcast %50 : vector<64x1xi1> to vector<64x32xi1>
    %52 = vector.broadcast %cst_20 : f32 to vector<64x32xf32>
    %53 = arith.select %51, %47, %52 : vector<64x32xi1>, vector<64x32xf32>
    %54 = arith.addf %46, %53 : vector<64x32xf32>
    %c57_i32 = arith.constant 57 : i32
    %55 = tpu.dynamic_rotate %8 by %c57_i32 dim 0 : vector<64x32xf32>, i32 -> vector<64x32xf32>
    %c7_i32_21 = arith.constant 7 : i32
    %56 = vector.broadcast %c7_i32_21 : i32 to vector<64x1xi32>
    %57 = arith.cmpi slt, %1, %56 : vector<64x1xi32>
    %c0_i32_22 = arith.constant 0 : i32
    %58 = vector.broadcast %c0_i32_22 : i32 to vector<64x1xi32>
    %59 = arith.cmpi sgt, %2, %58 : vector<64x1xi32>
    %60 = arith.andi %57, %59 : vector<64x1xi1>
    %cst_23 = arith.constant 0.000000e+00 : f32
    %61 = vector.shape_cast %60 : vector<64x1xi1> to vector<64x1xi1>
    %62 = vector.broadcast %61 : vector<64x1xi1> to vector<64x32xi1>
    %63 = vector.broadcast %cst_23 : f32 to vector<64x32xf32>
    %64 = arith.select %62, %55, %63 : vector<64x32xi1>, vector<64x32xf32>
    %65 = arith.addf %54, %64 : vector<64x32xf32>
    %c56_i32 = arith.constant 56 : i32
    %66 = tpu.dynamic_rotate %8 by %c56_i32 dim 0 : vector<64x32xf32>, i32 -> vector<64x32xf32>
    %c7_i32_24 = arith.constant 7 : i32
    %67 = vector.broadcast %c7_i32_24 : i32 to vector<64x1xi32>
    %68 = arith.cmpi slt, %1, %67 : vector<64x1xi32>
    %cst_25 = arith.constant 0.000000e+00 : f32
    %69 = vector.shape_cast %68 : vector<64x1xi1> to vector<64x1xi1>
    %70 = vector.broadcast %69 : vector<64x1xi1> to vector<64x32xi1>
    %71 = vector.broadcast %cst_25 : f32 to vector<64x32xf32>
    %72 = arith.select %70, %66, %71 : vector<64x32xi1>, vector<64x32xf32>
    %73 = arith.addf %65, %72 : vector<64x32xf32>
    %c55_i32 = arith.constant 55 : i32
    %74 = tpu.dynamic_rotate %8 by %c55_i32 dim 0 : vector<64x32xf32>, i32 -> vector<64x32xf32>
    %c7_i32_26 = arith.constant 7 : i32
    %75 = vector.broadcast %c7_i32_26 : i32 to vector<64x1xi32>
    %76 = arith.cmpi slt, %1, %75 : vector<64x1xi32>
    %c7_i32_27 = arith.constant 7 : i32
    %77 = vector.broadcast %c7_i32_27 : i32 to vector<64x1xi32>
    %78 = arith.cmpi slt, %2, %77 : vector<64x1xi32>
    %79 = arith.andi %76, %78 : vector<64x1xi1>
    %cst_28 = arith.constant 0.000000e+00 : f32
    %80 = vector.shape_cast %79 : vector<64x1xi1> to vector<64x1xi1>
    %81 = vector.broadcast %80 : vector<64x1xi1> to vector<64x32xi1>
    %82 = vector.broadcast %cst_28 : f32 to vector<64x32xf32>
    %83 = arith.select %81, %74, %82 : vector<64x32xi1>, vector<64x32xf32>
    %84 = arith.addf %73, %83 : vector<64x32xf32>
    %85 = vector.broadcast %0 : vector<64x1xf32> to vector<64x32xf32>
    %86 = arith.mulf %84, %85 : vector<64x32xf32>
    %c0_29 = arith.constant 0 : index
    %c0_30 = arith.constant 0 : index
    %87 = vector.load %arg6[%c0_29, %c0_30] : memref<1x32xf32, #tpu.memory_space<vmem>>, vector<1x32xf32>
    %88 = vector.broadcast %87 : vector<1x32xf32> to vector<64x32xf32>
    %89 = arith.addf %86, %88 : vector<64x32xf32>
    %cst_31 = arith.constant 0.000000e+00 : f32
    %90 = vector.broadcast %cst_31 : f32 to vector<64x32xf32>
    %91 = arith.maximumf %89, %90 : vector<64x32xf32>
    %92 = vector.broadcast %0 : vector<64x1xf32> to vector<64x32xf32>
    %93 = arith.mulf %91, %92 : vector<64x32xf32>
    %c9_i32_32 = arith.constant 9 : i32
    %94 = tpu.dynamic_rotate %93 by %c9_i32_32 dim 0 : vector<64x32xf32>, i32 -> vector<64x32xf32>
    %c0_i32_33 = arith.constant 0 : i32
    %95 = vector.broadcast %c0_i32_33 : i32 to vector<64x1xi32>
    %96 = arith.cmpi sgt, %1, %95 : vector<64x1xi32>
    %c0_i32_34 = arith.constant 0 : i32
    %97 = vector.broadcast %c0_i32_34 : i32 to vector<64x1xi32>
    %98 = arith.cmpi sgt, %2, %97 : vector<64x1xi32>
    %99 = arith.andi %96, %98 : vector<64x1xi1>
    %cst_35 = arith.constant 0.000000e+00 : f32
    %100 = vector.shape_cast %99 : vector<64x1xi1> to vector<64x1xi1>
    %101 = vector.broadcast %100 : vector<64x1xi1> to vector<64x32xi1>
    %102 = vector.broadcast %cst_35 : f32 to vector<64x32xf32>
    %103 = arith.select %101, %94, %102 : vector<64x32xi1>, vector<64x32xf32>
    %104 = arith.addf %93, %103 : vector<64x32xf32>
    %c8_i32_36 = arith.constant 8 : i32
    %105 = tpu.dynamic_rotate %93 by %c8_i32_36 dim 0 : vector<64x32xf32>, i32 -> vector<64x32xf32>
    %c0_i32_37 = arith.constant 0 : i32
    %106 = vector.broadcast %c0_i32_37 : i32 to vector<64x1xi32>
    %107 = arith.cmpi sgt, %1, %106 : vector<64x1xi32>
    %cst_38 = arith.constant 0.000000e+00 : f32
    %108 = vector.shape_cast %107 : vector<64x1xi1> to vector<64x1xi1>
    %109 = vector.broadcast %108 : vector<64x1xi1> to vector<64x32xi1>
    %110 = vector.broadcast %cst_38 : f32 to vector<64x32xf32>
    %111 = arith.select %109, %105, %110 : vector<64x32xi1>, vector<64x32xf32>
    %112 = arith.addf %104, %111 : vector<64x32xf32>
    %c7_i32_39 = arith.constant 7 : i32
    %113 = tpu.dynamic_rotate %93 by %c7_i32_39 dim 0 : vector<64x32xf32>, i32 -> vector<64x32xf32>
    %c0_i32_40 = arith.constant 0 : i32
    %114 = vector.broadcast %c0_i32_40 : i32 to vector<64x1xi32>
    %115 = arith.cmpi sgt, %1, %114 : vector<64x1xi32>
    %c7_i32_41 = arith.constant 7 : i32
    %116 = vector.broadcast %c7_i32_41 : i32 to vector<64x1xi32>
    %117 = arith.cmpi slt, %2, %116 : vector<64x1xi32>
    %118 = arith.andi %115, %117 : vector<64x1xi1>
    %cst_42 = arith.constant 0.000000e+00 : f32
    %119 = vector.shape_cast %118 : vector<64x1xi1> to vector<64x1xi1>
    %120 = vector.broadcast %119 : vector<64x1xi1> to vector<64x32xi1>
    %121 = vector.broadcast %cst_42 : f32 to vector<64x32xf32>
    %122 = arith.select %120, %113, %121 : vector<64x32xi1>, vector<64x32xf32>
    %123 = arith.addf %112, %122 : vector<64x32xf32>
    %c1_i32_43 = arith.constant 1 : i32
    %124 = tpu.dynamic_rotate %93 by %c1_i32_43 dim 0 : vector<64x32xf32>, i32 -> vector<64x32xf32>
    %c0_i32_44 = arith.constant 0 : i32
    %125 = vector.broadcast %c0_i32_44 : i32 to vector<64x1xi32>
    %126 = arith.cmpi sgt, %2, %125 : vector<64x1xi32>
    %cst_45 = arith.constant 0.000000e+00 : f32
    %127 = vector.shape_cast %126 : vector<64x1xi1> to vector<64x1xi1>
    %128 = vector.broadcast %127 : vector<64x1xi1> to vector<64x32xi1>
    %129 = vector.broadcast %cst_45 : f32 to vector<64x32xf32>
    %130 = arith.select %128, %124, %129 : vector<64x32xi1>, vector<64x32xf32>
    %131 = arith.addf %123, %130 : vector<64x32xf32>
    %c63_i32_46 = arith.constant 63 : i32
    %132 = tpu.dynamic_rotate %93 by %c63_i32_46 dim 0 : vector<64x32xf32>, i32 -> vector<64x32xf32>
    %c7_i32_47 = arith.constant 7 : i32
    %133 = vector.broadcast %c7_i32_47 : i32 to vector<64x1xi32>
    %134 = arith.cmpi slt, %2, %133 : vector<64x1xi32>
    %cst_48 = arith.constant 0.000000e+00 : f32
    %135 = vector.shape_cast %134 : vector<64x1xi1> to vector<64x1xi1>
    %136 = vector.broadcast %135 : vector<64x1xi1> to vector<64x32xi1>
    %137 = vector.broadcast %cst_48 : f32 to vector<64x32xf32>
    %138 = arith.select %136, %132, %137 : vector<64x32xi1>, vector<64x32xf32>
    %139 = arith.addf %131, %138 : vector<64x32xf32>
    %c57_i32_49 = arith.constant 57 : i32
    %140 = tpu.dynamic_rotate %93 by %c57_i32_49 dim 0 : vector<64x32xf32>, i32 -> vector<64x32xf32>
    %c7_i32_50 = arith.constant 7 : i32
    %141 = vector.broadcast %c7_i32_50 : i32 to vector<64x1xi32>
    %142 = arith.cmpi slt, %1, %141 : vector<64x1xi32>
    %c0_i32_51 = arith.constant 0 : i32
    %143 = vector.broadcast %c0_i32_51 : i32 to vector<64x1xi32>
    %144 = arith.cmpi sgt, %2, %143 : vector<64x1xi32>
    %145 = arith.andi %142, %144 : vector<64x1xi1>
    %cst_52 = arith.constant 0.000000e+00 : f32
    %146 = vector.shape_cast %145 : vector<64x1xi1> to vector<64x1xi1>
    %147 = vector.broadcast %146 : vector<64x1xi1> to vector<64x32xi1>
    %148 = vector.broadcast %cst_52 : f32 to vector<64x32xf32>
    %149 = arith.select %147, %140, %148 : vector<64x32xi1>, vector<64x32xf32>
    %150 = arith.addf %139, %149 : vector<64x32xf32>
    %c56_i32_53 = arith.constant 56 : i32
    %151 = tpu.dynamic_rotate %93 by %c56_i32_53 dim 0 : vector<64x32xf32>, i32 -> vector<64x32xf32>
    %c7_i32_54 = arith.constant 7 : i32
    %152 = vector.broadcast %c7_i32_54 : i32 to vector<64x1xi32>
    %153 = arith.cmpi slt, %1, %152 : vector<64x1xi32>
    %cst_55 = arith.constant 0.000000e+00 : f32
    %154 = vector.shape_cast %153 : vector<64x1xi1> to vector<64x1xi1>
    %155 = vector.broadcast %154 : vector<64x1xi1> to vector<64x32xi1>
    %156 = vector.broadcast %cst_55 : f32 to vector<64x32xf32>
    %157 = arith.select %155, %151, %156 : vector<64x32xi1>, vector<64x32xf32>
    %158 = arith.addf %150, %157 : vector<64x32xf32>
    %c55_i32_56 = arith.constant 55 : i32
    %159 = tpu.dynamic_rotate %93 by %c55_i32_56 dim 0 : vector<64x32xf32>, i32 -> vector<64x32xf32>
    %c7_i32_57 = arith.constant 7 : i32
    %160 = vector.broadcast %c7_i32_57 : i32 to vector<64x1xi32>
    %161 = arith.cmpi slt, %1, %160 : vector<64x1xi32>
    %c7_i32_58 = arith.constant 7 : i32
    %162 = vector.broadcast %c7_i32_58 : i32 to vector<64x1xi32>
    %163 = arith.cmpi slt, %2, %162 : vector<64x1xi32>
    %164 = arith.andi %161, %163 : vector<64x1xi1>
    %cst_59 = arith.constant 0.000000e+00 : f32
    %165 = vector.shape_cast %164 : vector<64x1xi1> to vector<64x1xi1>
    %166 = vector.broadcast %165 : vector<64x1xi1> to vector<64x32xi1>
    %167 = vector.broadcast %cst_59 : f32 to vector<64x32xf32>
    %168 = arith.select %166, %159, %167 : vector<64x32xi1>, vector<64x32xf32>
    %169 = arith.addf %158, %168 : vector<64x32xf32>
    %170 = vector.broadcast %0 : vector<64x1xf32> to vector<64x32xf32>
    %171 = arith.mulf %169, %170 : vector<64x32xf32>
    %172 = arith.truncf %171 : vector<64x32xf32> to vector<64x32xbf16>
    %c0_60 = arith.constant 0 : index
    %c0_61 = arith.constant 0 : index
    %173 = vector.load %arg7[%c0_60, %c0_61] : memref<32x6xbf16, #tpu.memory_space<vmem>>, vector<32x6xbf16>
    %cst_62 = arith.constant dense<0.000000e+00> : vector<64x6xf32>
    %174 = tpu.matmul %172, %173, %cst_62 {dimension_numbers = #tpu.dot_dimension_numbers<[1], [0], [0], [1], [0, 0, 1, 1], [], []>} : vector<64x32xbf16>, vector<32x6xbf16>, vector<64x6xf32> -> vector<64x6xf32>
    %c0_63 = arith.constant 0 : index
    %c0_64 = arith.constant 0 : index
    %175 = vector.load %arg8[%c0_63, %c0_64] : memref<1x6xf32, #tpu.memory_space<vmem>>, vector<1x6xf32>
    %176 = vector.broadcast %175 : vector<1x6xf32> to vector<64x6xf32>
    %177 = arith.addf %174, %176 : vector<64x6xf32>
    %cst_65 = arith.constant dense<0.000000e+00> : vector<6xf32>
    %178 = vector.multi_reduction <add>, %177, %cst_65 [0] : vector<64x6xf32> to vector<6xf32>
    %179 = vector.shape_cast %178 : vector<6xf32> to vector<1x6xf32>
    %cst_66 = arith.constant 6.400000e+01 : f32
    %180 = vector.broadcast %cst_66 : f32 to vector<1x6xf32>
    %181 = arith.divf %179, %180 : vector<1x6xf32>
    %c0_67 = arith.constant 0 : index
    %c0_68 = arith.constant 0 : index
    %c0_69 = arith.constant 0 : index
    %182 = vector.load %arg9[%c0_67, %c0_68, %c0_69] : memref<1x1x6xf32, #tpu.memory_space<vmem>>, vector<1x1x6xf32>
    %183 = vector.shape_cast %182 : vector<1x1x6xf32> to vector<1x6xf32>
    %184 = vector.shape_cast %181 : vector<1x6xf32> to vector<1x1x6xf32>
    tpu.vector_store %arg9[%c0_67, %c0_68, %c0_69], %184 {strides = array<i32>} : memref<1x1x6xf32, #tpu.memory_space<vmem>>, vector<1x1x6xf32>,
    return
  }
  func.func @transform_0(%arg0: i32) -> (i32, i32, i32) {
    %c0_i32 = arith.constant 0 : i32
    %c0_i32_0 = arith.constant 0 : i32
    %c0_i32_1 = arith.constant 0 : i32
    return %arg0, %c0_i32, %c0_i32_0 : i32, i32, i32
  }
  func.func @transform_1(%arg0: i32) -> (i32, i32) {
    %c0_i32 = arith.constant 0 : i32
    %c0_i32_0 = arith.constant 0 : i32
    %c0_i32_1 = arith.constant 0 : i32
    return %c0_i32, %c0_i32_0 : i32, i32
  }
  func.func @transform_2(%arg0: i32) -> (i32, i32) {
    %c0_i32 = arith.constant 0 : i32
    %c0_i32_0 = arith.constant 0 : i32
    %c0_i32_1 = arith.constant 0 : i32
    return %c0_i32, %c0_i32_0 : i32, i32
  }
  func.func @transform_3(%arg0: i32) -> (i32, i32) {
    %c0_i32 = arith.constant 0 : i32
    %c0_i32_0 = arith.constant 0 : i32
    %c0_i32_1 = arith.constant 0 : i32
    return %c0_i32, %c0_i32_0 : i32, i32
  }
  func.func @transform_4(%arg0: i32) -> (i32, i32) {
    %c0_i32 = arith.constant 0 : i32
    %c0_i32_0 = arith.constant 0 : i32
    %c0_i32_1 = arith.constant 0 : i32
    return %c0_i32, %c0_i32_0 : i32, i32
  }
  func.func @transform_5(%arg0: i32) -> (i32, i32) {
    %c0_i32 = arith.constant 0 : i32
    %c0_i32_0 = arith.constant 0 : i32
    %c0_i32_1 = arith.constant 0 : i32
    return %c0_i32, %c0_i32_0 : i32, i32
  }
  func.func @transform_6(%arg0: i32) -> (i32, i32) {
    %c0_i32 = arith.constant 0 : i32
    %c0_i32_0 = arith.constant 0 : i32
    %c0_i32_1 = arith.constant 0 : i32
    return %c0_i32, %c0_i32_0 : i32, i32
  }
  func.func @transform_7(%arg0: i32) -> (i32, i32) {
    %c0_i32 = arith.constant 0 : i32
    %c0_i32_0 = arith.constant 0 : i32
    %c0_i32_1 = arith.constant 0 : i32
    return %c0_i32, %c0_i32_0 : i32, i32
  }
  func.func @transform_8(%arg0: i32) -> (i32, i32, i32) {
    %c0_i32 = arith.constant 0 : i32
    %c0_i32_0 = arith.constant 0 : i32
    %c0_i32_1 = arith.constant 0 : i32
    return %arg0, %c0_i32, %c0_i32_0 : i32, i32, i32
  }
}

</mosaic_0001>

<bundles_post_ra>
// kernel: gcn_forward.6
= control target key start
LH: loop header
LB: loop body
LE: loop exit
PB: predicated region body
PF: predicated region fallthrough
CT: control target
= control target key end

     0   :  { %s792_s15 = smov 0   ;;  %s1049_s0 = inlined_call_operand.vmem [shape: bf16[2,9,9,64], index: 0, kind: input, shape index: {}]   ;;  %s1050_s1 = inlined_call_operand.vmem [shape: bf16[2,9,8,64], index: 1, kind: input, shape index: {}]   ;;  %s1051_s2 = inlined_call_operand.vmem [shape: bf16[2,8,9,64], index: 2, kind: input, shape index: {}]   ;;  %s1052_s3 = inlined_call_operand.vmem [shape: bf16[2,8,8,64], index: 3, kind: input, shape index: {}]   ;;  %s1053_s4 = inlined_call_operand.vmem [shape: bf16[2,8,8,64], index: 4, kind: output, shape index: {}]  }
   0x1 LB: > { %s731_s16 = sadd.s32 4294967295, %s765_s15   ;;  %p735_p0 = scmp.ge.s32.totalorder %s765_s15, 1  ;;  %s765_s15 = sphi %s792_s15, %s14_s15  }
   0x2   : > { %p192_p1 = scmp.lt.s32.totalorder %s765_s15, 3 }
   0x4   : > { %p193_p2 = pnand %p735_p0, %p192_p1 }
   0x5   : > { %p233_p3 = scmp.lt.s32.totalorder (!%p193_p2), %s731_s16, 1 }
   0x6   : > { %196 = sbr.rel (%p193_p2) target bundleno = 81 (0x51), region = 36 }
   0xb   : > { %s1057_s16 = smov (!%p233_p3, %s731_s16), 1  ;;  %vm317_vm0 = vsmask.f32 3328  ;;  %vm318_vm1 = vsmask.f32 7440  ;;  %vm631_vm3 = vcmask 519168  }
   0xc   : > { %s749_s17 = smul.u32 72, %s1057_s16  ;;  %s746_s18 = sshll.u32 %s1057_s16, 6  ;;  %vm854_vm2 = vmor %vm317_vm0, %vm318_vm1 }
   0xd   : > { %s750_s19 = smul.u32 36, %s1057_s16  ;;  %s808_s22 = scalar_lea.vmem %s1051_s2, %s746_s18 }
   0xe   : > { %s813_s25 = scalar_lea.vmem %s1049_s0, %s749_s17  ;;  %v816_v0 = vld [vmem:[%s808_s22] sm:$0xf]  ;;  %v286_v7 = vld [vmem:[%s808_s22 + $0x4] sm:$0x1]  ;;  %v837_v10 = vld [vmem:[%s808_s22 + $0x8] sm:$0xf] }
   0xf   : > { %s821_s28 = scalar_lea.vmem %s1050_s1, %s750_s19  ;;  %v258_v1 = vld [vmem:[%s813_s25] sm:$0xf]  ;;  %v259_v2 = vld [vmem:[%s813_s25 + $0x4] sm:$0x1]  ;;  %v826_v3 = vld [vmem:[%s813_s25 + $0x8] sm:$0xf] }
  0x10   : > { %v261_v4 = vld [vmem:[%s813_s25 + $0xc] sm:$0x1]  ;;  %v276_v5 = vld [vmem:[%s821_s28] sm:$0xf]  ;;  %v831_v6 = vld [vmem:[%s821_s28 + $0x4] sm:$0xf] }
  0x11   : > { %v309_v8 = vmax.bf16 %v276_v5, %v258_v1  ;;  %v310_v9 = vmax.bf16 %v831_v6, %v826_v3  ;;  %v321_v11 = vshrl.u32 %v258_v1, 16  ;;  %v324_v12 = vshll.u32 %v258_v1, 16  ;;  %v844_v19 = vld [vmem:[%s813_s25 + $0x10] sm:$0xf]  ;;  %v847_v24 = vld [vmem:[%s821_s28 + $0x8] sm:$0xf] }
  0x12   : > { %v330_v13 = vshll.u32 %v259_v2, 16  ;;  %v335_v14 = vshrl.u32 %v826_v3, 16  ;;  %v338_v15 = vshll.u32 %v826_v3, 16  ;;  %v344_v16 = vshll.u32 %v261_v4, 16  ;;  %s747_s29 = sshll.u32 %s1057_s16, 5 }
  0x13   : > { %v465_v17 = vshrl.u32 %v816_v0, 16  ;;  %v468_v18 = vshll.u32 %v816_v0, 16  ;;  %v323_v20 = vrot.slane %v321_v11, 4  ;;  %v326_v21 = vrot.slane %v324_v12, 5  ;;  %v263_v36 = vld [vmem:[%s813_s25 + $0x14] sm:$0x1]  ;;  %s868_s6 = scalar_lea.vmem %s1052_s3, %s747_s29  ;;  %s926_s9 = scalar_lea.vmem %s1053_s4, %s747_s29 }
  0x14   : > { %v332_v22 = vrot.slane %v330_v13, 5  ;;  %v337_v23 = vrot.slane %v335_v14, 4  ;;  %v340_v25 = vrot.slane %v338_v15, 5  ;;  %v346_v26 = vrot.slane %v344_v16, 5  ;;  %v288_v37 = vld [vmem:[%s808_s22 + $0xc] sm:$0x1] }
  0x15   : > { %v467_v27 = vrot.slane %v465_v17, 4  ;;  %v470_v28 = vrot.slane %v468_v18, 5  ;;  %v327_v29 = vor.u32 %v326_v21, %v323_v20  ;;  %v474_v30 = vshll.u32 %v286_v7, 16  ;;  %v289_v50 = vld [vmem:[%s808_s22 + $0x10] sm:$0xf] }
  0x16   : > { %v479_v31 = vshrl.u32 %v837_v10, 16  ;;  %v482_v32 = vshll.u32 %v837_v10, 16  ;;  %v341_v34 = vor.u32 %v340_v25, %v337_v23  ;;  %v311_v38 = vmax.bf16 %v847_v24, %v844_v19  ;;  %v881_v57 = vld [vmem:[%s813_s25 + $0x18] sm:$0xf]  ;;  %v884_v58 = vld [vmem:[%s821_s28 + $0xc] sm:$0xf] }
  0x17   : > { %v471_v35 = vor.u32 %v470_v28, %v467_v27  ;;  %v349_v39 = vshrl.u32 %v844_v19, 16  ;;  %v328_v40 = vrot.slane %v327_v29, 4  ;;  %v476_v41 = vrot.slane %v474_v30, 5  ;;  %v301_v59 = vld [vmem:[%s868_s6] sm:$0xf] }
  0x18   : > { %v481_v42 = vrot.slane %v479_v31, 4  ;;  %v484_v43 = vrot.slane %v482_v32, 5  ;;  %v342_v44 = vrot.slane %v341_v34, 4  ;;  %v352_v47 = vshll.u32 %v844_v19, 16  ;;  %v302_v1 = vld [vmem:[%s868_s6 + $0x4] sm:$0xf] }
  0x19   : > { %v472_v45 = vrot.slane %v471_v35, 4  ;;  %v351_v46 = vrot.slane %v349_v39, 4  ;;  %v333_v48 = vsel %vm854_vm2, %v328_v40, %v332_v22  ;;  %v358_v51 = vshll.u32 %v263_v36, 16  ;;  %v290_v13 = vld [vmem:[%s808_s22 + $0x14] sm:$0x1] }
  0x1a   : > { %v485_v49 = vor.u32 %v484_v43, %v481_v42  ;;  %v488_v52 = vshll.u32 %v288_v37, 16  ;;  %v876_v53 = vsel %vm854_vm2, %v342_v44, %v346_v26  ;;  %v440_v54 = vmax.bf16 %v333_v48, %v309_v8  ;;  %v265_v8 = vld [vmem:[%s813_s25 + $0x1c] sm:$0x1]  ;;  %v899_v20 = vld [vmem:[%s808_s22 + $0x18] sm:$0xf] }
  0x1b   : > { %v477_v55 = vsel %vm854_vm2, %v472_v45, %v476_v41  ;;  %v354_v56 = vrot.slane %v352_v47, 5  ;;  %v441_v60 = vmax.bf16 %v876_v53, %v310_v9  ;;  %v360_v61 = vrot.slane %v358_v51, 5  ;;  %v905_v32 = vld [vmem:[%s821_s28 + $0x10] sm:$0xf]  ;;  %v303_v35 = vld [vmem:[%s868_s6 + $0x8] sm:$0xf] }
  0x1c   : > { %v486_v62 = vrot.slane %v485_v49, 4  ;;  %v490_v63 = vrot.slane %v488_v52, 5  ;;  %v448_v2 = vmax.bf16 %v440_v54, %v816_v0  ;;  %v493_v5 = vshrl.u32 %v289_v50, 16  ;;  %v913_v43 = vld [vmem:[%s813_s25 + $0x20] sm:$0xf] }
  0x1d   : > { %v355_v4 = vor.u32 %v354_v56, %v351_v46  ;;  %v496_v7 = vshll.u32 %v289_v50, 16  ;;  %v449_v11 = vmax.bf16 %v441_v60, %v837_v10  ;;  %v312_v9 = vmax.bf16 %v884_v58, %v881_v57  ;;  %v267_v44 = vld [vmem:[%s813_s25 + $0x24] sm:$0x1]  ;;  %v932_v52 = vld [vmem:[%s808_s22 + $0x20] sm:$0xf] }
  0x1e   : > { %v491_v12 = vsel %vm854_vm2, %v486_v62, %v490_v63  ;;  %v363_v14 = vshrl.u32 %v881_v57, 16  ;;  %v456_v15 = vmax.bf16 %v448_v2, %v301_v59  ;;  %v495_v0 = vrot.slane %v493_v5, 4  ;;  %v939_v62 = vld [vmem:[%s821_s28 + $0x14] sm:$0xf]  ;;  %v304_v5 = vld [vmem:[%s868_s6 + $0xc] sm:$0xf] }
  0x1f   : > { %v356_v16 = vrot.slane %v355_v4, 4  ;;  %v498_v17 = vrot.slane %v496_v7, 5  ;;  %v457_v18 = vmax.bf16 %v449_v11, %v302_v1  ;;  %v366_v21 = vshll.u32 %v881_v57, 16  ;;  %v944_v4 = vld [vmem:[%s813_s25 + $0x28] sm:$0xf] }
  0x20   : > { %v365_v10 = vrot.slane %v363_v14, 4  ;;  %v372_v22 = vshll.u32 %v265_v8, 16  ;;  %v584_v23 = vmax.bf16 %v477_v55, %v456_v15  ;;  %v502_v27 = vshll.u32 %v290_v13, 16  ;;  %v269_v15 = vld [vmem:[%s813_s25 + $0x2c] sm:$0x1] }
  0x21   : > { %v361_v25 = vsel %vm854_vm2, %v356_v16, %v360_v61  ;;  %v499_v26 = vor.u32 %v498_v17, %v495_v0  ;;  %v585_v29 = vmax.bf16 %v491_v12, %v457_v18  ;;  %v368_v30 = vrot.slane %v366_v21, 5 }
  0x22   : > { %v442_v28 = vmax.bf16 %v361_v25, %v311_v38  ;;  %v374_v31 = vrot.slane %v372_v22, 5  ;;  %v592_v34 = vmax.bf16 %v584_v23, %v826_v3  ;;  %v504_v37 = vrot.slane %v502_v27, 5 }
  0x23   : > { %v500_v36 = vrot.slane %v499_v26, 4  ;;  %v507_v39 = vshrl.u32 %v899_v20, 16  ;;  %v593_v41 = vmax.bf16 %v585_v29, %v844_v19  ;;  %v369_v42 = vor.u32 %v368_v30, %v365_v10 }
  0x24   : > { %v450_v40 = vmax.bf16 %v442_v28, %v289_v50  ;;  %v510_v38 = vshll.u32 %v899_v20, 16  ;;  %v600_v45 = vmax.bf16 %v592_v34, %v831_v6  ;;  %v313_v47 = vmax.bf16 %v905_v32, %v913_v43  ;;  %v292_v50 = vld [vmem:[%s808_s22 + $0x1c] sm:$0x1] }
  0x25   : > { %v505_v3 = vsel %vm854_vm2, %v500_v36, %v504_v37  ;;  %v509_v46 = vrot.slane %v507_v39, 4  ;;  %v601_v48 = vmax.bf16 %v593_v41, %v847_v24  ;;  %v370_v49 = vrot.slane %v369_v42, 4  ;;  %v974_v41 = vld [vmem:[%s813_s25 + $0x30] sm:$0xf] }
  0x26   : > { %v458_v19 = vmax.bf16 %v450_v40, %v303_v35  ;;  %v512_v6 = vrot.slane %v510_v38, 5  ;;  %v623_v51 = vmax.bf16 %v600_v45, %v876_v53  ;;  %v377_v54 = vshrl.u32 %v913_v43, 16  ;;  %v968_v35 = vld [vmem:[%s821_s28 + $0x18] sm:$0xf]  ;;  %v305_v42 = vld [vmem:[%s868_s6 + $0x10] sm:$0xf] }
  0x27   : > { %v380_v55 = vshll.u32 %v913_v43, 16  ;;  %v386_v56 = vshll.u32 %v267_v44, 16  ;;  %v624_v59 = vmax.bf16 %v601_v48, %v361_v25  ;;  %v375_v60 = vsel %vm854_vm2, %v370_v49, %v374_v31 }
  0x28   : > { %v513_v24 = vor.u32 %v512_v6, %v509_v46  ;;  %v586_v61 = vmax.bf16 %v505_v3, %v458_v19  ;;  %632 = vst.msk [vmem:[%s926_s9] sm:$0xf] %vm631_vm3, %v623_v51  ;;  %v443_v53 = vmax.bf16 %v375_v60, %v312_v9  ;;  %v379_v63 = vrot.slane %v377_v54, 4  ;;  %v271_v46 = vld [vmem:[%s813_s25 + $0x34] sm:$0x1] }
  0x29   : > { %v382_v1 = vrot.slane %v380_v55, 5  ;;  %v388_v2 = vrot.slane %v386_v56, 5  ;;  %633 = vst.msk [vmem:[%s926_s9 + $0x4] sm:$0xf] %vm631_vm3, %v624_v59  ;;  %v516_v11 = vshll.u32 %v292_v50, 16  ;;  %v521_v12 = vshrl.u32 %v932_v52, 16 }
  0x2a   : > { %v594_v7 = vmax.bf16 %v586_v61, %v881_v57  ;;  %v514_v8 = vrot.slane %v513_v24, 4  ;;  %v451_v13 = vmax.bf16 %v443_v53, %v899_v20  ;;  %v524_v9 = vshll.u32 %v932_v52, 16  ;;  %v294_v57 = vld [vmem:[%s808_s22 + $0x24] sm:$0x1]  ;;  %v960_v20 = vld [vmem:[%s808_s22 + $0x28] sm:$0xf] }
  0x2b   : > { %v383_v14 = vor.u32 %v382_v1, %v379_v63  ;;  %v314_v16 = vmax.bf16 %v939_v62, %v944_v4  ;;  %v518_v17 = vrot.slane %v516_v11, 5  ;;  %v523_v18 = vrot.slane %v521_v12, 4  ;;  %v989_v56 = vld [vmem:[%s808_s22 + $0x30] sm:$0xf]  ;;  %v995_v63 = vld [vmem:[%s821_s28 + $0x1c] sm:$0xf] }
  0x2c   : > { %v602_v0 = vmax.bf16 %v594_v7, %v884_v58  ;;  %v391_v10 = vshrl.u32 %v944_v4, 16  ;;  %v459_v21 = vmax.bf16 %v451_v13, %v304_v5  ;;  %v526_v23 = vrot.slane %v524_v9, 5  ;;  %v306_v11 = vld [vmem:[%s868_s6 + $0x14] sm:$0xf] }
  0x2d   : > { %v384_v22 = vrot.slane %v383_v14, 4  ;;  %v394_v25 = vshll.u32 %v944_v4, 16  ;;  %v519_v58 = vsel %vm854_vm2, %v514_v8, %v518_v17  ;;  %v400_v28 = vshll.u32 %v269_v15, 16  ;;  %v998_v8 = vld [vmem:[%s813_s25 + $0x38] sm:$0xf] }
  0x2e   : > { %v625_v26 = vmax.bf16 %v602_v0, %v375_v60  ;;  %v393_v27 = vrot.slane %v391_v10, 4  ;;  %v527_v30 = vor.u32 %v526_v23, %v523_v18  ;;  %v587_v31 = vmax.bf16 %v519_v58, %v459_v21  ;;  %v273_v17 = vld [vmem:[%s813_s25 + $0x3c] sm:$0x1] }
  0x2f   : > { %v389_v29 = vsel %vm854_vm2, %v384_v22, %v388_v2  ;;  %v396_v34 = vrot.slane %v394_v25, 5  ;;  %v402_v37 = vrot.slane %v400_v28, 5  ;;  %v530_v39 = vshll.u32 %v294_v57, 16  ;;  %v299_v28 = vld [vmem:[%s808_s22 + $0x38] sm:$0xf] }
  0x30   : > { %634 = vst.msk [vmem:[%s926_s9 + $0x8] sm:$0xf] %vm631_vm3, %v625_v26  ;;  %v444_v36 = vmax.bf16 %v389_v29, %v313_v47  ;;  %v535_v40 = vshrl.u32 %v960_v20, 16  ;;  %v595_v38 = vmax.bf16 %v587_v31, %v913_v43  ;;  %v528_v45 = vrot.slane %v527_v30, 4 }
  0x31   : > { %v397_v44 = vor.u32 %v396_v34, %v393_v27  ;;  %v538_v3 = vshll.u32 %v960_v20, 16  ;;  %v532_v48 = vrot.slane %v530_v39, 5  ;;  %v315_v49 = vmax.bf16 %v968_v35, %v974_v41  ;;  %v300_v39 = vld [vmem:[%s808_s22 + $0x3c] sm:$0x1] }
  0x32   : > { %v452_v19 = vmax.bf16 %v444_v36, %v932_v52  ;;  %v537_v47 = vrot.slane %v535_v40, 4  ;;  %v603_v6 = vmax.bf16 %v595_v38, %v905_v32  ;;  %v405_v43 = vshrl.u32 %v974_v41, 16  ;;  %v296_v52 = vld [vmem:[%s808_s22 + $0x2c] sm:$0x1] }
  0x33   : > { %v398_v50 = vrot.slane %v397_v44, 4  ;;  %v540_v51 = vrot.slane %v538_v3, 5  ;;  %v533_v55 = vsel %vm854_vm2, %v528_v45, %v532_v48  ;;  %v408_v59 = vshll.u32 %v974_v41, 16  ;;  %v307_v45 = vld [vmem:[%s868_s6 + $0x18] sm:$0xf] }
  0x34   : > { %v460_v54 = vmax.bf16 %v452_v19, %v305_v42  ;;  %v414_v60 = vshll.u32 %v271_v46, 16  ;;  %v626_v24 = vmax.bf16 %v603_v6, %v389_v29  ;;  %v407_v53 = vrot.slane %v405_v43, 4 }
  0x35   : > { %v403_v32 = vsel %vm854_vm2, %v398_v50, %v402_v37  ;;  %v541_v61 = vor.u32 %v540_v51, %v537_v47  ;;  %v410_v5 = vrot.slane %v408_v59, 5  ;;  %v544_v13 = vshll.u32 %v296_v52, 16 }
  0x36   : > { %v445_v1 = vmax.bf16 %v403_v32, %v314_v16  ;;  %v588_v2 = vmax.bf16 %v533_v55, %v460_v54  ;;  %v416_v7 = vrot.slane %v414_v60, 5  ;;  %635 = vst.msk [vmem:[%s926_s9 + $0xc] sm:$0xf] %vm631_vm3, %v626_v24  ;;  %v549_v14 = vshrl.u32 %v989_v56, 16 }
  0x37   : > { %v542_v12 = vrot.slane %v541_v61, 4  ;;  %v552_v9 = vshll.u32 %v989_v56, 16  ;;  %v411_v0 = vor.u32 %v410_v5, %v407_v53  ;;  %v316_v18 = vmax.bf16 %v995_v63, %v998_v8 }
  0x38   : > { %v453_v15 = vmax.bf16 %v445_v1, %v960_v20  ;;  %v596_v16 = vmax.bf16 %v588_v2, %v944_v4  ;;  %v546_v57 = vrot.slane %v544_v13, 5  ;;  %v551_v10 = vrot.slane %v549_v14, 4  ;;  %v298_v20 = vld [vmem:[%s808_s22 + $0x34] sm:$0x1] }
  0x39   : > { %v554_v21 = vrot.slane %v552_v9, 5  ;;  %v419_v22 = vshrl.u32 %v998_v8, 16  ;;  %v412_v26 = vrot.slane %v411_v0, 4  ;;  %v422_v58 = vshll.u32 %v998_v8, 16 }
  0x3a   : > { %v461_v23 = vmax.bf16 %v453_v15, %v306_v11  ;;  %v604_v25 = vmax.bf16 %v596_v16, %v939_v62  ;;  %v547_v4 = vsel %vm854_vm2, %v542_v12, %v546_v57  ;;  %v428_v30 = vshll.u32 %v273_v17, 16  ;;  %v274_v62 = vld [vmem:[%s813_s25 + $0x40] sm:$0xf] }
  0x3b   : > { %v555_v27 = vor.u32 %v554_v21, %v551_v10  ;;  %v421_v29 = vrot.slane %v419_v22, 4  ;;  %v417_v34 = vsel %vm854_vm2, %v412_v26, %v416_v7  ;;  %v424_v37 = vrot.slane %v422_v58, 5  ;;  %v284_v10 = vld [vmem:[%s821_s28 + $0x20] sm:$0xf] }
  0x3c   : > { %v627_v31 = vmax.bf16 %v604_v25, %v403_v32  ;;  %v589_v36 = vmax.bf16 %v547_v4, %v461_v23  ;;  %v446_v40 = vmax.bf16 %v417_v34, %v315_v49  ;;  %v430_v42 = vrot.slane %v428_v30, 5 }
  0x3d   : > { %v556_v38 = vrot.slane %v555_v27, 4  ;;  %v558_v44 = vshll.u32 %v298_v20, 16  ;;  %v425_v46 = vor.u32 %v424_v37, %v421_v29  ;;  %v563_v19 = vshrl.u32 %v299_v28, 16 }
  0x3e   : > { %636 = vst.msk [vmem:[%s926_s9 + $0x10] sm:$0xf] %vm631_vm3, %v627_v31  ;;  %v597_v3 = vmax.bf16 %v589_v36, %v974_v41  ;;  %v566_v48 = vshll.u32 %v299_v28, 16  ;;  %v454_v47 = vmax.bf16 %v446_v40, %v989_v56  ;;  %v572_v50 = vshll.u32 %v300_v39, 16  ;;  %v275_v41 = vld [vmem:[%s813_s25 + $0x44] sm:$0x1] }
  0x3f   : > { %v560_v6 = vrot.slane %v558_v44, 5  ;;  %v609_v51 = vshrl.u32 %v274_v62, 16  ;;  %v426_v43 = vrot.slane %v425_v46, 4  ;;  %v565_v54 = vrot.slane %v563_v19, 4 }
  0x40   : > { %v605_v49 = vmax.bf16 %v597_v3, %v968_v35  ;;  %v568_v55 = vrot.slane %v566_v48, 5  ;;  %v462_v52 = vmax.bf16 %v454_v47, %v307_v45  ;;  %v574_v60 = vrot.slane %v572_v50, 5  ;;  %v308_v35 = vld [vmem:[%s868_s6 + $0x1c] sm:$0xf] }
  0x41   : > { %v561_v59 = vsel %vm854_vm2, %v556_v38, %v560_v6  ;;  %v611_v24 = vrot.slane %v609_v51, 4  ;;  %v431_v56 = vsel %vm854_vm2, %v426_v43, %v430_v42  ;;  %v612_v53 = vshll.u32 %v274_v62, 16 }
  0x42   : > { %v628_v32 = vmax.bf16 %v605_v49, %v417_v34  ;;  %v569_v61 = vor.u32 %v568_v55, %v565_v54  ;;  %v447_v1 = vmax.bf16 %v431_v56, %v316_v18  ;;  %v590_v2 = vmax.bf16 %v561_v59, %v462_v52 }
  0x43   : > { %v614_v7 = vrot.slane %v612_v53, 5  ;;  %v618_v11 = vshll.u32 %v275_v41, 16 }
  0x44   : > { %637 = vst.msk [vmem:[%s926_s9 + $0x14] sm:$0xf] %vm631_vm3, %v628_v32  ;;  %v570_v5 = vrot.slane %v569_v61, 4  ;;  %v455_v12 = vmax.bf16 %v447_v1, %v299_v28  ;;  %v598_v13 = vmax.bf16 %v590_v2, %v998_v8 }
  0x45   : > { %v615_v9 = vor.u32 %v614_v7, %v611_v24  ;;  %v620_v17 = vrot.slane %v618_v11, 5 }
  0x46   : > { %v575_v14 = vsel %vm854_vm2, %v570_v5, %v574_v60  ;;  %v463_v15 = vmax.bf16 %v455_v12, %v308_v35  ;;  %v606_v16 = vmax.bf16 %v598_v13, %v995_v63 }
  0x47   : > { %v616_v0 = vrot.slane %v615_v9, 4 }
  0x48   : > { %v629_v18 = vmax.bf16 %v606_v16, %v431_v56  ;;  %v591_v57 = vmax.bf16 %v575_v14, %v463_v15 }
  0x49   : > { %v621_v22 = vsel %vm854_vm2, %v616_v0, %v620_v17 }
  0x4a   : > { %638 = vst.msk [vmem:[%s926_s9 + $0x18] sm:$0xf] %vm631_vm3, %v629_v18  ;;  %v599_v21 = vmax.bf16 %v591_v57, %v274_v62 }
  0x4c   : > { %v607_v23 = vmax.bf16 %v599_v21, %v284_v10 }
  0x4e   : > { %v630_v8 = vmax.bf16 %v621_v22, %v607_v23 }
  0x50   : > { %639 = vst.msk [vmem:[%s926_s9 + $0x1c] sm:$0xf] %vm631_vm3, %v630_v8 }
  0x51 PF: > { %s14_s15 = sadd.s32 1, %s765_s15  }
  0x52   : > { %p11_p4 = scmp.ge.s32.totalorder %s14_s15, 4  }
  0x54   :  { %13 = sbr.rel (!%p11_p4) target bundleno = 1 (0x1), region = 75 }

// kernel: gcn_forward.5
= control target key start
LH: loop header
LB: loop body
LE: loop exit
PB: predicated region body
PF: predicated region fallthrough
CT: control target
= control target key end

     0   :  { %vm371_vm0 = vcmask 1040384   ;;  %v1405_v1 = vmov 0   ;;  %vm274_vm1 = vcmask 400384   ;;  %vm986_vm2 = vcmask 519168   ;;  %s1891_s1 = inlined_call_operand.vmem [shape: bf16[49,64], index: 1, kind: input, shape index: {}]   ;;  %s1892_s0 = inlined_call_operand.vmem [shape: bf16[512,49], index: 0, kind: input, shape index: {}]   ;;  %s1893_s2 = inlined_call_operand.vmem [shape: f32[1,64], index: 2, kind: input, shape index: {}]   ;;  %s1894_s3 = inlined_call_operand.vmem [shape: bf16[512,64], index: 3, kind: output, shape index: {}]  }
   0x1   :  { %v1369_v0 = vld [vmem:[%s1891_s1 + $0x18] ss:$0 sps:$4 sm:$0x11]   ;;  %v373_v2 = vsel %vm371_vm0, 65535, %v1405_v1  ;;  %v1370_v4 = vld [vmem:[%s1891_s1 + $0x10] sm:$0xff]   ;;  %v1373_v5 = vld [vmem:[%s1892_s0] sm:$0xff]  }
   0x2   :  { %v375_v3 = vand.u32 %v1369_v0, %v373_v2  ;;  %v1374_v6 = vld [vmem:[%s1892_s0 + $0x80] sm:$0xff]   ;;  %v1371_v7 = vld [vmem:[%s1891_s1 + $0x8] sm:$0xff]   ;;  %1296 = vmatprep.mubr.msk.bf16.mxu0 %vm274_vm1, %v1373_v5  ;;  %v1377_v11 = vld [vmem:[%s1892_s0 + $0x10] sm:$0xff]  }
   0x3   :  { %1328 = vmatprep.mubr.msk.bf16.mxu1 %vm274_vm1, %v1374_v6  ;;  %v1372_v8 = vld [vmem:[%s1891_s1] sm:$0xff]   ;;  %v1375_v9 = vld [vmem:[%s1892_s0 + $0x8] sm:$0xff]   ;;  %v1378_v12 = vld [vmem:[%s1892_s0 + $0x90] sm:$0xff]  }
   0x4   :  { %1288 = vmatprep.subr.bf16.mxu0 %v375_v3  ;;  %1360 = vmatprep.subr.bf16.mxu1 %v375_v3  ;;  %v1376_v10 = vld [vmem:[%s1892_s0 + $0x88] sm:$0xff]   ;;  %v1379_v13 = vld [vmem:[%s1892_s0 + $0x18] sm:$0xff]   ;;  %v1381_v15 = vld [vmem:[%s1892_s0 + $0x20] sm:$0xff]  }
   0x5   :  { %1289 = vmatpush3.bf16.msra.mxu0 %v375_v3  ;;  %1364 = vmatpush3.bf16.msra.mxu1 %v375_v3  ;;  %v1380_v14 = vld [vmem:[%s1892_s0 + $0x98] sm:$0xff]   ;;  %v1382_v16 = vld [vmem:[%s1892_s0 + $0xa0] sm:$0xff]   ;;  %v1383_v17 = vld [vmem:[%s1892_s0 + $0x28] sm:$0xff]  }
   0x6   :  { %1290 = vmatprep.subr.bf16.mxu0 %v1370_v4  ;;  %1361 = vmatprep.subr.bf16.mxu1 %v1370_v4  ;;  %v1384_v18 = vld [vmem:[%s1892_s0 + $0xa8] sm:$0xff]   ;;  %v1385_v19 = vld [vmem:[%s1892_s0 + $0x30] sm:$0xff]   ;;  %v1387_v21 = vld [vmem:[%s1892_s0 + $0x38] sm:$0xff]  }
   0x7   :  { %v1386_v20 = vld [vmem:[%s1892_s0 + $0xb0] sm:$0xff]   ;;  %v1388_v22 = vld [vmem:[%s1892_s0 + $0xb8] sm:$0xff]   ;;  %v1389_v23 = vld [vmem:[%s1892_s0 + $0x40] sm:$0xff]  }
   0x8   :  { %v1390_v24 = vld [vmem:[%s1892_s0 + $0xc0] sm:$0xff]   ;;  %v1391_v25 = vld [vmem:[%s1892_s0 + $0x48] sm:$0xff]   ;;  %v1393_v27 = vld [vmem:[%s1892_s0 + $0x50] sm:$0xff]  }
   0x9   :  { %1291 = vmatpush3.bf16.msra.mxu0 %v1370_v4  ;;  %1365 = vmatpush3.bf16.msra.mxu1 %v1370_v4  ;;  %v1392_v26 = vld [vmem:[%s1892_s0 + $0xc8] sm:$0xff]   ;;  %v1394_v28 = vld [vmem:[%s1892_s0 + $0xd0] sm:$0xff]   ;;  %v1395_v29 = vld [vmem:[%s1892_s0 + $0x58] sm:$0xff]  }
   0xa   :  { %1292 = vmatprep.subr.bf16.mxu0 %v1371_v7  ;;  %1362 = vmatprep.subr.bf16.mxu1 %v1371_v7  ;;  %v1396_v30 = vld [vmem:[%s1892_s0 + $0xd8] sm:$0xff]   ;;  %v1397_v31 = vld [vmem:[%s1892_s0 + $0x60] sm:$0xff]   ;;  %v1399_v33 = vld [vmem:[%s1892_s0 + $0x68] sm:$0xff]  }
   0xb   :  { %v1398_v32 = vld [vmem:[%s1892_s0 + $0xe0] sm:$0xff]   ;;  %v1400_v34 = vld [vmem:[%s1892_s0 + $0xe8] sm:$0xff]   ;;  %v1401_v35 = vld [vmem:[%s1892_s0 + $0x70] sm:$0xff]  }
   0xc   :  { %v1402_v36 = vld [vmem:[%s1892_s0 + $0xf0] sm:$0xff]   ;;  %v1403_v37 = vld [vmem:[%s1892_s0 + $0x78] sm:$0xff]   ;;  %v1569_v39 = vld [vmem:[%s1893_s2] ss:$0 sm:$0xff] }
   0xd   :  { %1293 = vmatpush3.bf16.msra.mxu0 %v1371_v7  ;;  %1366 = vmatpush3.bf16.msra.mxu1 %v1371_v7  ;;  %v1404_v38 = vld [vmem:[%s1892_s0 + $0xf8] sm:$0xff]  }
   0xe   :  { %1294 = vmatprep.subr.bf16.mxu0 %v1372_v8  ;;  %1363 = vmatprep.subr.bf16.mxu1 %v1372_v8 }
  0x11   :  { %1295 = vmatpush3.bf16.msra.mxu0 %v1372_v8  ;;  %1367 = vmatpush3.bf16.msra.mxu1 %v1372_v8 }
  0x14   :  { %1297 = vmatmul.mubr.msk.bf16.vlgmr.msra.gmra.mxu0 %vm274_vm1, %v1375_v9  ;;  %1329 = vmatmul.mubr.msk.bf16.vlgmr.msra.gmra.mxu1 %vm274_vm1, %v1376_v10 }
  0x15   :  { %1300 = vmatprep.mubr.msk.bf16.mxu0 %vm274_vm1, %v1377_v11  ;;  %1332 = vmatprep.mubr.msk.bf16.mxu1 %vm274_vm1, %v1378_v12 }
  0x1c   :  { %1301 = vmatmul.mubr.msk.bf16.gmra.mxu0 %vm274_vm1, %v1379_v13  ;;  %1333 = vmatmul.mubr.msk.bf16.gmra.mxu1 %vm274_vm1, %v1380_v14 }
  0x1d   :  { %1304 = vmatprep.mubr.msk.bf16.mxu0 %vm274_vm1, %v1381_v15  ;;  %1336 = vmatprep.mubr.msk.bf16.mxu1 %vm274_vm1, %v1382_v16 }
  0x24   :  { %1305 = vmatmul.mubr.msk.bf16.gmra.mxu0 %vm274_vm1, %v1383_v17  ;;  %1337 = vmatmul.mubr.msk.bf16.gmra.mxu1 %vm274_vm1, %v1384_v18 }
  0x25   :  { %1308 = vmatprep.mubr.msk.bf16.mxu0 %vm274_vm1, %v1385_v19  ;;  %1340 = vmatprep.mubr.msk.bf16.mxu1 %vm274_vm1, %v1386_v20 }
  0x2c   :  { %1309 = vmatmul.mubr.msk.bf16.gmra.mxu0 %vm274_vm1, %v1387_v21  ;;  %1341 = vmatmul.mubr.msk.bf16.gmra.mxu1 %vm274_vm1, %v1388_v22 }
  0x2d   :  { %1312 = vmatprep.mubr.msk.bf16.mxu0 %vm274_vm1, %v1389_v23  ;;  %1344 = vmatprep.mubr.msk.bf16.mxu1 %vm274_vm1, %v1390_v24 }
  0x34   :  { %1313 = vmatmul.mubr.msk.bf16.gmra.mxu0 %vm274_vm1, %v1391_v25  ;;  %1345 = vmatmul.mubr.msk.bf16.gmra.mxu1 %vm274_vm1, %v1392_v26 }
  0x35   :  { %1316 = vmatprep.mubr.msk.bf16.mxu0 %vm274_vm1, %v1393_v27  ;;  %1348 = vmatprep.mubr.msk.bf16.mxu1 %vm274_vm1, %v1394_v28 }
  0x3c   :  { %1317 = vmatmul.mubr.msk.bf16.gmra.mxu0 %vm274_vm1, %v1395_v29  ;;  %1349 = vmatmul.mubr.msk.bf16.gmra.mxu1 %vm274_vm1, %v1396_v30 }
  0x3d   :  { %1320 = vmatprep.mubr.msk.bf16.mxu0 %vm274_vm1, %v1397_v31  ;;  %1352 = vmatprep.mubr.msk.bf16.mxu1 %vm274_vm1, %v1398_v32 }
  0x44   :  { %1321 = vmatmul.mubr.msk.bf16.gmra.mxu0 %vm274_vm1, %v1399_v33  ;;  %1353 = vmatmul.mubr.msk.bf16.gmra.mxu1 %vm274_vm1, %v1400_v34 }
  0x45   :  { %1324 = vmatprep.mubr.msk.bf16.mxu0 %vm274_vm1, %v1401_v35  ;;  %1356 = vmatprep.mubr.msk.bf16.mxu1 %vm274_vm1, %v1402_v36 }
  0x4c   :  { %1325 = vmatmul.mubr.msk.bf16.gmra.mxu0 %vm274_vm1, %v1403_v37  ;;  %1357 = vmatmul.mubr.msk.bf16.gmra.mxu1 %vm274_vm1, %v1404_v38 }
  0xd4   :  { %v1298_v40 = vpop.f32.mrf.mxu0  ;;  %v1330_v41 = vpop.f32.mrf.mxu1 }
  0xd5   :  { %v420_v42 = vadd.f32 %v1298_v40, %v1569_v39  ;;  %v548_v43 = vadd.f32 %v1330_v41, %v1569_v39 }
  0xd6   :  { %v411_v44 = vpop.f32.mrf.mxu0  ;;  %v539_v45 = vpop.f32.mrf.mxu1 }
  0xd7   :  { %v668_v46 = vmax.f32 %v420_v42, 0.0  ;;  %v700_v47 = vmax.f32 %v548_v43, 0.0  ;;  %v412_v48 = vadd.f32 %v1569_v39, %v411_v44  ;;  %v540_v49 = vadd.f32 %v1569_v39, %v539_v45 }
  0xd8   :  { %v1299_v50 = vpop.f32.mrf.mxu0  ;;  %v1331_v51 = vpop.f32.mrf.mxu1 }
  0xd9   :  { %v1190_v52 = vpack.c.bf16 %v668_v46, %v668_v46  ;;  %v1222_v53 = vpack.c.bf16 %v700_v47, %v700_v47  ;;  %v666_v54 = vmax.f32 %v412_v48, 0.0  ;;  %v698_v55 = vmax.f32 %v540_v49, 0.0 }
  0xda   :  { %v423_v56 = vadd.f32 %v1299_v50, %v1569_v39  ;;  %v551_v57 = vadd.f32 %v1331_v51, %v1569_v39  ;;  %v414_v58 = vpop.f32.mrf.mxu0  ;;  %v542_v59 = vpop.f32.mrf.mxu1 }
  0xdb   :  { %989 = vst.msk [vmem:[%s1894_s3 + $0x8] sm:$0xf] %vm986_vm2, %v1190_v52  ;;  %1021 = vst.msk [vmem:[%s1894_s3 + $0x88] sm:$0xf] %vm986_vm2, %v1222_v53  ;;  %v1188_v60 = vpack.c.bf16 %v666_v54, %v666_v54  ;;  %v1220_v61 = vpack.c.bf16 %v698_v55, %v698_v55  ;;  %v415_v62 = vadd.f32 %v1569_v39, %v414_v58 }
  0xdc   :  { %v543_v63 = vadd.f32 %v1569_v39, %v542_v59  ;;  %v669_v0 = vmax.f32 %v423_v56, 0.0  ;;  %v701_v1 = vmax.f32 %v551_v57, 0.0  ;;  %v1302_v2 = vpop.f32.mrf.mxu0  ;;  %v1334_v3 = vpop.f32.mrf.mxu1 }
  0xdd   :  { %987 = vst.msk [vmem:[%s1894_s3] sm:$0xf] %vm986_vm2, %v1188_v60  ;;  %1019 = vst.msk [vmem:[%s1894_s3 + $0x80] sm:$0xf] %vm986_vm2, %v1220_v61  ;;  %v667_v4 = vmax.f32 %v415_v62, 0.0  ;;  %v436_v6 = vadd.f32 %v1302_v2, %v1569_v39  ;;  %v564_v7 = vadd.f32 %v1334_v3, %v1569_v39 }
  0xde   :  { %v699_v5 = vmax.f32 %v543_v63, 0.0  ;;  %v1191_v8 = vpack.c.bf16 %v669_v0, %v669_v0  ;;  %v1223_v9 = vpack.c.bf16 %v701_v1, %v701_v1  ;;  %v427_v10 = vpop.f32.mrf.mxu0  ;;  %v555_v11 = vpop.f32.mrf.mxu1 }
  0xdf   :  { %v1189_v12 = vpack.c.bf16 %v667_v4, %v667_v4  ;;  %v672_v14 = vmax.f32 %v436_v6, 0.0  ;;  %v704_v15 = vmax.f32 %v564_v7, 0.0  ;;  %v428_v16 = vadd.f32 %v1569_v39, %v427_v10 }
  0xe0   :  { %v1221_v13 = vpack.c.bf16 %v699_v5, %v699_v5  ;;  %990 = vst.msk [vmem:[%s1894_s3 + $0xc] sm:$0xf] %vm986_vm2, %v1191_v8  ;;  %1022 = vst.msk [vmem:[%s1894_s3 + $0x8c] sm:$0xf] %vm986_vm2, %v1223_v9  ;;  %v556_v17 = vadd.f32 %v1569_v39, %v555_v11  ;;  %v1303_v18 = vpop.f32.mrf.mxu0  ;;  %v1335_v19 = vpop.f32.mrf.mxu1 }
  0xe1   :  { %988 = vst.msk [vmem:[%s1894_s3 + $0x4] sm:$0xf] %vm986_vm2, %v1189_v12  ;;  %v1194_v20 = vpack.c.bf16 %v672_v14, %v672_v14  ;;  %v1226_v21 = vpack.c.bf16 %v704_v15, %v704_v15  ;;  %v439_v22 = vadd.f32 %v1303_v18, %v1569_v39  ;;  %v567_v23 = vadd.f32 %v1335_v19, %v1569_v39 }
  0xe2   :  { %1020 = vst.msk [vmem:[%s1894_s3 + $0x84] sm:$0xf] %vm986_vm2, %v1221_v13  ;;  %v670_v24 = vmax.f32 %v428_v16, 0.0  ;;  %v702_v25 = vmax.f32 %v556_v17, 0.0  ;;  %v430_v26 = vpop.f32.mrf.mxu0  ;;  %v558_v27 = vpop.f32.mrf.mxu1 }
  0xe3   :  { %993 = vst.msk [vmem:[%s1894_s3 + $0x18] sm:$0xf] %vm986_vm2, %v1194_v20  ;;  %1025 = vst.msk [vmem:[%s1894_s3 + $0x98] sm:$0xf] %vm986_vm2, %v1226_v21  ;;  %v673_v28 = vmax.f32 %v439_v22, 0.0  ;;  %v705_v29 = vmax.f32 %v567_v23, 0.0  ;;  %v431_v30 = vadd.f32 %v1569_v39, %v430_v26  ;;  %v559_v31 = vadd.f32 %v1569_v39, %v558_v27 }
  0xe4   :  { %v1192_v32 = vpack.c.bf16 %v670_v24, %v670_v24  ;;  %v1224_v33 = vpack.c.bf16 %v702_v25, %v702_v25  ;;  %v1306_v34 = vpop.f32.mrf.mxu0  ;;  %v1338_v35 = vpop.f32.mrf.mxu1 }
  0xe5   :  { %v1195_v36 = vpack.c.bf16 %v673_v28, %v673_v28  ;;  %v1227_v37 = vpack.c.bf16 %v705_v29, %v705_v29  ;;  %v671_v38 = vmax.f32 %v431_v30, 0.0  ;;  %v703_v40 = vmax.f32 %v559_v31, 0.0 }
  0xe6   :  { %991 = vst.msk [vmem:[%s1894_s3 + $0x10] sm:$0xf] %vm986_vm2, %v1192_v32  ;;  %1023 = vst.msk [vmem:[%s1894_s3 + $0x90] sm:$0xf] %vm986_vm2, %v1224_v33  ;;  %v452_v41 = vadd.f32 %v1306_v34, %v1569_v39  ;;  %v580_v42 = vadd.f32 %v1338_v35, %v1569_v39  ;;  %v443_v43 = vpop.f32.mrf.mxu0  ;;  %v571_v44 = vpop.f32.mrf.mxu1 }
  0xe7   :  { %994 = vst.msk [vmem:[%s1894_s3 + $0x1c] sm:$0xf] %vm986_vm2, %v1195_v36  ;;  %1026 = vst.msk [vmem:[%s1894_s3 + $0x9c] sm:$0xf] %vm986_vm2, %v1227_v37  ;;  %v1193_v45 = vpack.c.bf16 %v671_v38, %v671_v38  ;;  %v1225_v46 = vpack.c.bf16 %v703_v40, %v703_v40  ;;  %v444_v47 = vadd.f32 %v1569_v39, %v443_v43 }
  0xe8   :  { %v572_v48 = vadd.f32 %v1569_v39, %v571_v44  ;;  %v676_v49 = vmax.f32 %v452_v41, 0.0  ;;  %v708_v50 = vmax.f32 %v580_v42, 0.0  ;;  %v1307_v51 = vpop.f32.mrf.mxu0  ;;  %v1339_v52 = vpop.f32.mrf.mxu1 }
  0xe9   :  { %992 = vst.msk [vmem:[%s1894_s3 + $0x14] sm:$0xf] %vm986_vm2, %v1193_v45  ;;  %1024 = vst.msk [vmem:[%s1894_s3 + $0x94] sm:$0xf] %vm986_vm2, %v1225_v46  ;;  %v674_v53 = vmax.f32 %v444_v47, 0.0  ;;  %v455_v55 = vadd.f32 %v1307_v51, %v1569_v39  ;;  %v583_v56 = vadd.f32 %v1339_v52, %v1569_v39 }
  0xea   :  { %v706_v54 = vmax.f32 %v572_v48, 0.0  ;;  %v1198_v57 = vpack.c.bf16 %v676_v49, %v676_v49  ;;  %v1230_v58 = vpack.c.bf16 %v708_v50, %v708_v50  ;;  %v446_v59 = vpop.f32.mrf.mxu0  ;;  %v574_v60 = vpop.f32.mrf.mxu1 }
  0xeb   :  { %v1196_v61 = vpack.c.bf16 %v674_v53, %v674_v53  ;;  %v677_v63 = vmax.f32 %v455_v55, 0.0  ;;  %v709_v0 = vmax.f32 %v583_v56, 0.0  ;;  %v447_v1 = vadd.f32 %v1569_v39, %v446_v59 }
  0xec   :  { %v1228_v62 = vpack.c.bf16 %v706_v54, %v706_v54  ;;  %997 = vst.msk [vmem:[%s1894_s3 + $0x28] sm:$0xf] %vm986_vm2, %v1198_v57  ;;  %1029 = vst.msk [vmem:[%s1894_s3 + $0xa8] sm:$0xf] %vm986_vm2, %v1230_v58  ;;  %v575_v2 = vadd.f32 %v1569_v39, %v574_v60  ;;  %v1310_v3 = vpop.f32.mrf.mxu0  ;;  %v1342_v4 = vpop.f32.mrf.mxu1 }
  0xed   :  { %995 = vst.msk [vmem:[%s1894_s3 + $0x20] sm:$0xf] %vm986_vm2, %v1196_v61  ;;  %v1199_v5 = vpack.c.bf16 %v677_v63, %v677_v63  ;;  %v1231_v6 = vpack.c.bf16 %v709_v0, %v709_v0  ;;  %v468_v7 = vadd.f32 %v1310_v3, %v1569_v39  ;;  %v596_v8 = vadd.f32 %v1342_v4, %v1569_v39 }
  0xee   :  { %1027 = vst.msk [vmem:[%s1894_s3 + $0xa0] sm:$0xf] %vm986_vm2, %v1228_v62  ;;  %v675_v9 = vmax.f32 %v447_v1, 0.0  ;;  %v707_v10 = vmax.f32 %v575_v2, 0.0  ;;  %v459_v11 = vpop.f32.mrf.mxu0  ;;  %v587_v12 = vpop.f32.mrf.mxu1 }
  0xef   :  { %998 = vst.msk [vmem:[%s1894_s3 + $0x2c] sm:$0xf] %vm986_vm2, %v1199_v5  ;;  %1030 = vst.msk [vmem:[%s1894_s3 + $0xac] sm:$0xf] %vm986_vm2, %v1231_v6  ;;  %v680_v13 = vmax.f32 %v468_v7, 0.0  ;;  %v712_v14 = vmax.f32 %v596_v8, 0.0  ;;  %v460_v15 = vadd.f32 %v1569_v39, %v459_v11  ;;  %v588_v16 = vadd.f32 %v1569_v39, %v587_v12 }
  0xf0   :  { %v1197_v17 = vpack.c.bf16 %v675_v9, %v675_v9  ;;  %v1229_v18 = vpack.c.bf16 %v707_v10, %v707_v10  ;;  %v1311_v19 = vpop.f32.mrf.mxu0  ;;  %v1343_v20 = vpop.f32.mrf.mxu1 }
  0xf1   :  { %v1202_v21 = vpack.c.bf16 %v680_v13, %v680_v13  ;;  %v1234_v22 = vpack.c.bf16 %v712_v14, %v712_v14  ;;  %v678_v23 = vmax.f32 %v460_v15, 0.0  ;;  %v710_v24 = vmax.f32 %v588_v16, 0.0 }
  0xf2   :  { %996 = vst.msk [vmem:[%s1894_s3 + $0x24] sm:$0xf] %vm986_vm2, %v1197_v17  ;;  %1028 = vst.msk [vmem:[%s1894_s3 + $0xa4] sm:$0xf] %vm986_vm2, %v1229_v18  ;;  %v471_v25 = vadd.f32 %v1311_v19, %v1569_v39  ;;  %v599_v26 = vadd.f32 %v1343_v20, %v1569_v39  ;;  %v462_v27 = vpop.f32.mrf.mxu0  ;;  %v590_v28 = vpop.f32.mrf.mxu1 }
  0xf3   :  { %1001 = vst.msk [vmem:[%s1894_s3 + $0x38] sm:$0xf] %vm986_vm2, %v1202_v21  ;;  %1033 = vst.msk [vmem:[%s1894_s3 + $0xb8] sm:$0xf] %vm986_vm2, %v1234_v22  ;;  %v1200_v29 = vpack.c.bf16 %v678_v23, %v678_v23  ;;  %v1232_v30 = vpack.c.bf16 %v710_v24, %v710_v24  ;;  %v463_v31 = vadd.f32 %v1569_v39, %v462_v27 }
  0xf4   :  { %v591_v32 = vadd.f32 %v1569_v39, %v590_v28  ;;  %v681_v33 = vmax.f32 %v471_v25, 0.0  ;;  %v713_v34 = vmax.f32 %v599_v26, 0.0  ;;  %v1314_v35 = vpop.f32.mrf.mxu0  ;;  %v1346_v36 = vpop.f32.mrf.mxu1 }
  0xf5   :  { %999 = vst.msk [vmem:[%s1894_s3 + $0x30] sm:$0xf] %vm986_vm2, %v1200_v29  ;;  %1031 = vst.msk [vmem:[%s1894_s3 + $0xb0] sm:$0xf] %vm986_vm2, %v1232_v30  ;;  %v679_v37 = vmax.f32 %v463_v31, 0.0  ;;  %v484_v40 = vadd.f32 %v1314_v35, %v1569_v39  ;;  %v612_v41 = vadd.f32 %v1346_v36, %v1569_v39 }
  0xf6   :  { %v711_v38 = vmax.f32 %v591_v32, 0.0  ;;  %v1203_v42 = vpack.c.bf16 %v681_v33, %v681_v33  ;;  %v1235_v43 = vpack.c.bf16 %v713_v34, %v713_v34  ;;  %v475_v44 = vpop.f32.mrf.mxu0  ;;  %v603_v45 = vpop.f32.mrf.mxu1 }
  0xf7   :  { %v1201_v46 = vpack.c.bf16 %v679_v37, %v679_v37  ;;  %v684_v48 = vmax.f32 %v484_v40, 0.0  ;;  %v716_v49 = vmax.f32 %v612_v41, 0.0  ;;  %v476_v50 = vadd.f32 %v1569_v39, %v475_v44 }
  0xf8   :  { %v1233_v47 = vpack.c.bf16 %v711_v38, %v711_v38  ;;  %1002 = vst.msk [vmem:[%s1894_s3 + $0x3c] sm:$0xf] %vm986_vm2, %v1203_v42  ;;  %1034 = vst.msk [vmem:[%s1894_s3 + $0xbc] sm:$0xf] %vm986_vm2, %v1235_v43  ;;  %v604_v51 = vadd.f32 %v1569_v39, %v603_v45  ;;  %v1315_v52 = vpop.f32.mrf.mxu0  ;;  %v1347_v53 = vpop.f32.mrf.mxu1 }
  0xf9   :  { %1000 = vst.msk [vmem:[%s1894_s3 + $0x34] sm:$0xf] %vm986_vm2, %v1201_v46  ;;  %v1206_v54 = vpack.c.bf16 %v684_v48, %v684_v48  ;;  %v1238_v55 = vpack.c.bf16 %v716_v49, %v716_v49  ;;  %v487_v56 = vadd.f32 %v1315_v52, %v1569_v39  ;;  %v615_v57 = vadd.f32 %v1347_v53, %v1569_v39 }
  0xfa   :  { %1032 = vst.msk [vmem:[%s1894_s3 + $0xb4] sm:$0xf] %vm986_vm2, %v1233_v47  ;;  %v682_v58 = vmax.f32 %v476_v50, 0.0  ;;  %v714_v59 = vmax.f32 %v604_v51, 0.0  ;;  %v478_v60 = vpop.f32.mrf.mxu0  ;;  %v606_v61 = vpop.f32.mrf.mxu1 }
  0xfb   :  { %1005 = vst.msk [vmem:[%s1894_s3 + $0x48] sm:$0xf] %vm986_vm2, %v1206_v54  ;;  %1037 = vst.msk [vmem:[%s1894_s3 + $0xc8] sm:$0xf] %vm986_vm2, %v1238_v55  ;;  %v685_v62 = vmax.f32 %v487_v56, 0.0  ;;  %v717_v63 = vmax.f32 %v615_v57, 0.0  ;;  %v479_v0 = vadd.f32 %v1569_v39, %v478_v60  ;;  %v607_v1 = vadd.f32 %v1569_v39, %v606_v61 }
  0xfc   :  { %v1204_v2 = vpack.c.bf16 %v682_v58, %v682_v58  ;;  %v1236_v3 = vpack.c.bf16 %v714_v59, %v714_v59  ;;  %v1318_v4 = vpop.f32.mrf.mxu0  ;;  %v1350_v5 = vpop.f32.mrf.mxu1 }
  0xfd   :  { %v1207_v6 = vpack.c.bf16 %v685_v62, %v685_v62  ;;  %v1239_v7 = vpack.c.bf16 %v717_v63, %v717_v63  ;;  %v683_v8 = vmax.f32 %v479_v0, 0.0  ;;  %v715_v9 = vmax.f32 %v607_v1, 0.0 }
  0xfe   :  { %1003 = vst.msk [vmem:[%s1894_s3 + $0x40] sm:$0xf] %vm986_vm2, %v1204_v2  ;;  %1035 = vst.msk [vmem:[%s1894_s3 + $0xc0] sm:$0xf] %vm986_vm2, %v1236_v3  ;;  %v500_v10 = vadd.f32 %v1318_v4, %v1569_v39  ;;  %v628_v11 = vadd.f32 %v1350_v5, %v1569_v39  ;;  %v491_v12 = vpop.f32.mrf.mxu0  ;;  %v619_v13 = vpop.f32.mrf.mxu1 }
  0xff   :  { %1006 = vst.msk [vmem:[%s1894_s3 + $0x4c] sm:$0xf] %vm986_vm2, %v1207_v6  ;;  %1038 = vst.msk [vmem:[%s1894_s3 + $0xcc] sm:$0xf] %vm986_vm2, %v1239_v7  ;;  %v1205_v14 = vpack.c.bf16 %v683_v8, %v683_v8  ;;  %v1237_v15 = vpack.c.bf16 %v715_v9, %v715_v9  ;;  %v492_v16 = vadd.f32 %v1569_v39, %v491_v12 }
 0x100   :  { %v620_v17 = vadd.f32 %v1569_v39, %v619_v13  ;;  %v688_v18 = vmax.f32 %v500_v10, 0.0  ;;  %v720_v19 = vmax.f32 %v628_v11, 0.0  ;;  %v1319_v20 = vpop.f32.mrf.mxu0  ;;  %v1351_v21 = vpop.f32.mrf.mxu1 }
 0x101   :  { %1004 = vst.msk [vmem:[%s1894_s3 + $0x44] sm:$0xf] %vm986_vm2, %v1205_v14  ;;  %1036 = vst.msk [vmem:[%s1894_s3 + $0xc4] sm:$0xf] %vm986_vm2, %v1237_v15  ;;  %v686_v22 = vmax.f32 %v492_v16, 0.0  ;;  %v503_v24 = vadd.f32 %v1319_v20, %v1569_v39  ;;  %v631_v25 = vadd.f32 %v1351_v21, %v1569_v39 }
 0x102   :  { %v718_v23 = vmax.f32 %v620_v17, 0.0  ;;  %v1210_v26 = vpack.c.bf16 %v688_v18, %v688_v18  ;;  %v1242_v27 = vpack.c.bf16 %v720_v19, %v720_v19  ;;  %v494_v28 = vpop.f32.mrf.mxu0  ;;  %v622_v29 = vpop.f32.mrf.mxu1 }
 0x103   :  { %v1208_v30 = vpack.c.bf16 %v686_v22, %v686_v22  ;;  %v689_v32 = vmax.f32 %v503_v24, 0.0  ;;  %v721_v33 = vmax.f32 %v631_v25, 0.0  ;;  %v495_v34 = vadd.f32 %v1569_v39, %v494_v28 }
 0x104   :  { %v1240_v31 = vpack.c.bf16 %v718_v23, %v718_v23  ;;  %1009 = vst.msk [vmem:[%s1894_s3 + $0x58] sm:$0xf] %vm986_vm2, %v1210_v26  ;;  %1041 = vst.msk [vmem:[%s1894_s3 + $0xd8] sm:$0xf] %vm986_vm2, %v1242_v27  ;;  %v623_v35 = vadd.f32 %v1569_v39, %v622_v29  ;;  %v1322_v36 = vpop.f32.mrf.mxu0  ;;  %v1354_v37 = vpop.f32.mrf.mxu1 }
 0x105   :  { %1007 = vst.msk [vmem:[%s1894_s3 + $0x50] sm:$0xf] %vm986_vm2, %v1208_v30  ;;  %v1211_v38 = vpack.c.bf16 %v689_v32, %v689_v32  ;;  %v1243_v40 = vpack.c.bf16 %v721_v33, %v721_v33  ;;  %v516_v41 = vadd.f32 %v1322_v36, %v1569_v39  ;;  %v644_v42 = vadd.f32 %v1354_v37, %v1569_v39 }
 0x106   :  { %1039 = vst.msk [vmem:[%s1894_s3 + $0xd0] sm:$0xf] %vm986_vm2, %v1240_v31  ;;  %v687_v43 = vmax.f32 %v495_v34, 0.0  ;;  %v719_v44 = vmax.f32 %v623_v35, 0.0  ;;  %v507_v45 = vpop.f32.mrf.mxu0  ;;  %v635_v46 = vpop.f32.mrf.mxu1 }
 0x107   :  { %1010 = vst.msk [vmem:[%s1894_s3 + $0x5c] sm:$0xf] %vm986_vm2, %v1211_v38  ;;  %1042 = vst.msk [vmem:[%s1894_s3 + $0xdc] sm:$0xf] %vm986_vm2, %v1243_v40  ;;  %v692_v47 = vmax.f32 %v516_v41, 0.0  ;;  %v724_v48 = vmax.f32 %v644_v42, 0.0  ;;  %v508_v49 = vadd.f32 %v1569_v39, %v507_v45  ;;  %v636_v50 = vadd.f32 %v1569_v39, %v635_v46 }
 0x108   :  { %v1209_v51 = vpack.c.bf16 %v687_v43, %v687_v43  ;;  %v1241_v52 = vpack.c.bf16 %v719_v44, %v719_v44  ;;  %v1323_v53 = vpop.f32.mrf.mxu0  ;;  %v1355_v54 = vpop.f32.mrf.mxu1 }
 0x109   :  { %v1214_v55 = vpack.c.bf16 %v692_v47, %v692_v47  ;;  %v1246_v56 = vpack.c.bf16 %v724_v48, %v724_v48  ;;  %v690_v57 = vmax.f32 %v508_v49, 0.0  ;;  %v722_v58 = vmax.f32 %v636_v50, 0.0 }
 0x10a   :  { %1008 = vst.msk [vmem:[%s1894_s3 + $0x54] sm:$0xf] %vm986_vm2, %v1209_v51  ;;  %1040 = vst.msk [vmem:[%s1894_s3 + $0xd4] sm:$0xf] %vm986_vm2, %v1241_v52  ;;  %v519_v59 = vadd.f32 %v1323_v53, %v1569_v39  ;;  %v647_v60 = vadd.f32 %v1355_v54, %v1569_v39  ;;  %v510_v61 = vpop.f32.mrf.mxu0  ;;  %v638_v62 = vpop.f32.mrf.mxu1 }
 0x10b   :  { %1013 = vst.msk [vmem:[%s1894_s3 + $0x68] sm:$0xf] %vm986_vm2, %v1214_v55  ;;  %1045 = vst.msk [vmem:[%s1894_s3 + $0xe8] sm:$0xf] %vm986_vm2, %v1246_v56  ;;  %v1212_v63 = vpack.c.bf16 %v690_v57, %v690_v57  ;;  %v1244_v0 = vpack.c.bf16 %v722_v58, %v722_v58  ;;  %v511_v1 = vadd.f32 %v1569_v39, %v510_v61 }
 0x10c   :  { %v639_v2 = vadd.f32 %v1569_v39, %v638_v62  ;;  %v693_v3 = vmax.f32 %v519_v59, 0.0  ;;  %v725_v4 = vmax.f32 %v647_v60, 0.0  ;;  %v1326_v5 = vpop.f32.mrf.mxu0  ;;  %v1358_v6 = vpop.f32.mrf.mxu1 }
 0x10d   :  { %1011 = vst.msk [vmem:[%s1894_s3 + $0x60] sm:$0xf] %vm986_vm2, %v1212_v63  ;;  %1043 = vst.msk [vmem:[%s1894_s3 + $0xe0] sm:$0xf] %vm986_vm2, %v1244_v0  ;;  %v691_v7 = vmax.f32 %v511_v1, 0.0  ;;  %v532_v9 = vadd.f32 %v1326_v5, %v1569_v39  ;;  %v660_v10 = vadd.f32 %v1358_v6, %v1569_v39 }
 0x10e   :  { %v723_v8 = vmax.f32 %v639_v2, 0.0  ;;  %v1215_v11 = vpack.c.bf16 %v693_v3, %v693_v3  ;;  %v1247_v12 = vpack.c.bf16 %v725_v4, %v725_v4  ;;  %v523_v13 = vpop.f32.mrf.mxu0  ;;  %v651_v14 = vpop.f32.mrf.mxu1 }
 0x10f   :  { %v1213_v15 = vpack.c.bf16 %v691_v7, %v691_v7  ;;  %v696_v17 = vmax.f32 %v532_v9, 0.0  ;;  %v728_v18 = vmax.f32 %v660_v10, 0.0  ;;  %v524_v19 = vadd.f32 %v1569_v39, %v523_v13 }
 0x110   :  { %v1245_v16 = vpack.c.bf16 %v723_v8, %v723_v8  ;;  %1014 = vst.msk [vmem:[%s1894_s3 + $0x6c] sm:$0xf] %vm986_vm2, %v1215_v11  ;;  %1046 = vst.msk [vmem:[%s1894_s3 + $0xec] sm:$0xf] %vm986_vm2, %v1247_v12  ;;  %v652_v20 = vadd.f32 %v1569_v39, %v651_v14  ;;  %v1327_v21 = vpop.f32.mrf.mxu0  ;;  %v1359_v22 = vpop.f32.mrf.mxu1 }
 0x111   :  { %1012 = vst.msk [vmem:[%s1894_s3 + $0x64] sm:$0xf] %vm986_vm2, %v1213_v15  ;;  %v1218_v23 = vpack.c.bf16 %v696_v17, %v696_v17  ;;  %v1250_v24 = vpack.c.bf16 %v728_v18, %v728_v18  ;;  %v535_v25 = vadd.f32 %v1327_v21, %v1569_v39  ;;  %v663_v26 = vadd.f32 %v1359_v22, %v1569_v39 }
 0x112   :  { %1044 = vst.msk [vmem:[%s1894_s3 + $0xe4] sm:$0xf] %vm986_vm2, %v1245_v16  ;;  %v694_v27 = vmax.f32 %v524_v19, 0.0  ;;  %v726_v28 = vmax.f32 %v652_v20, 0.0  ;;  %v526_v29 = vpop.f32.mrf.mxu0  ;;  %v654_v30 = vpop.f32.mrf.mxu1 }
 0x113   :  { %1017 = vst.msk [vmem:[%s1894_s3 + $0x78] sm:$0xf] %vm986_vm2, %v1218_v23  ;;  %1049 = vst.msk [vmem:[%s1894_s3 + $0xf8] sm:$0xf] %vm986_vm2, %v1250_v24  ;;  %v697_v31 = vmax.f32 %v535_v25, 0.0  ;;  %v729_v32 = vmax.f32 %v663_v26, 0.0  ;;  %v527_v33 = vadd.f32 %v1569_v39, %v526_v29  ;;  %v655_v34 = vadd.f32 %v1569_v39, %v654_v30 }
 0x114   :  { %v1216_v35 = vpack.c.bf16 %v694_v27, %v694_v27  ;;  %v1248_v36 = vpack.c.bf16 %v726_v28, %v726_v28 }
 0x115   :  { %v1219_v37 = vpack.c.bf16 %v697_v31, %v697_v31  ;;  %v1251_v38 = vpack.c.bf16 %v729_v32, %v729_v32  ;;  %v695_v40 = vmax.f32 %v527_v33, 0.0  ;;  %v727_v41 = vmax.f32 %v655_v34, 0.0 }
 0x116   :  { %1015 = vst.msk [vmem:[%s1894_s3 + $0x70] sm:$0xf] %vm986_vm2, %v1216_v35  ;;  %1047 = vst.msk [vmem:[%s1894_s3 + $0xf0] sm:$0xf] %vm986_vm2, %v1248_v36 }
 0x117   :  { %1018 = vst.msk [vmem:[%s1894_s3 + $0x7c] sm:$0xf] %vm986_vm2, %v1219_v37  ;;  %1050 = vst.msk [vmem:[%s1894_s3 + $0xfc] sm:$0xf] %vm986_vm2, %v1251_v38  ;;  %v1217_v39 = vpack.c.bf16 %v695_v40, %v695_v40  ;;  %v1249_v42 = vpack.c.bf16 %v727_v41, %v727_v41 }
 0x119   :  { %1016 = vst.msk [vmem:[%s1894_s3 + $0x74] sm:$0xf] %vm986_vm2, %v1217_v39  ;;  %1048 = vst.msk [vmem:[%s1894_s3 + $0xf4] sm:$0xf] %vm986_vm2, %v1249_v42 }

// kernel: gcn_forward.7
= control target key start
LH: loop header
LB: loop body
LE: loop exit
PB: predicated region body
PF: predicated region fallthrough
CT: control target
= control target key end

     0   :  { %s1676_s18 = smov 0   ;;  %s1678_s19 = smov 0   ;;  %s1945_s0 = inlined_call_operand.vmem [shape: bf16[2,10,10,64], index: 0, kind: input, shape index: {}, may-alias: {0,1,2}]   ;;  %s1946_s1 = inlined_call_operand.vmem [shape: bf16[2,10,10,64], index: 1, kind: input, shape index: {}, may-alias: {0,1,2}]   ;;  %s1947_s2 = inlined_call_operand.vmem [shape: bf16[2,10,10,64], index: 2, kind: input, shape index: {}, may-alias: {0,1,2}]   ;;  %s1948_s3 = inlined_call_operand.vmem [shape: bf16[9,64,64], index: 3, kind: input, shape index: {}]   ;;  %s1949_s4 = inlined_call_operand.vmem [shape: f32[1,64], index: 4, kind: input, shape index: {}]   ;;  %s1950_s5 = inlined_call_operand.vmem [shape: bf16[2,8,8,64], index: 5, kind: output, shape index: {}]  }
   0x1   :  { %s1680_s20 = smov 0   ;;  %s1682_s21 = smov 0  }
   0x2   :  { %s1684_s22 = smov 0  }
   0x3 LB: > { %s24_s23 = sadd.s32 1, %s1634_s20  ;;  %s27_s24 = sadd.s32 1, %s1638_s21  ;;  %s1642_s22 = sphi %s1684_s22, %s15_s22   ;;  %s1638_s21 = sphi %s1682_s21, %s1954_s21   ;;  %s1634_s20 = sphi %s1680_s20, %s1953_s20   ;;  %s1630_s19 = sphi %s1678_s19, %s1952_s19   ;;  %s1626_s18 = sphi %s1676_s18, %s1951_s18  }
   0x4   : > { %p25_p0 = scmp.ge.s32.totalorder %s24_s23, 8  ;;  %p1239_p1 = scmp.ge.s32.totalorder %s1642_s22, 1 }
   0x5   : > { %p247_p2 = scmp.lt.s32.totalorder %s1642_s22, 17 }
   0x6   : > { %s1956_s23 = smov (%p25_p0, %s24_s23), 0  ;;  %s1958_s24 = smov (!%p25_p0, %s27_s24), %s1638_s21 }
   0x7   : > { %p248_p3 = pnand %p1239_p1, %p247_p2  ;;  %p29_p4 = scmp.ge.s32.totalorder %s1958_s24, 2 }
   0x8   : > { %p302_p5 = scmp.lt.s32.totalorder (!%p248_p3), %s1630_s19, 1  ;;  %p304_p6 = scmp.lt.s32.totalorder (!%p248_p3), %s1626_s18, 9 }
   0x9   : > { %s1960_s24 = smov (%p29_p4, %s1958_s24), 0  ;;  %251 = sbr.rel (%p248_p3) target bundleno = 297 (0x129), region = 40 }
   0xa   : > { %s311_s6 = sadd.s32 (!%p248_p3), 1, %s1626_s18  ;;  %s322_s28 = sadd.s32 (!%p248_p3), 2, %s1626_s18 }
   0xb   : > { %p314_p7 = scmp.lt.s32.totalorder (!%p248_p3), %s311_s6, 9  ;;  %p325_p8 = scmp.lt.s32.totalorder (!%p248_p3), %s322_s28, 9 }
   0xc   : > { %p335_p9 = scmp.lt.s32.totalorder (!%p248_p3), %s1626_s18, 7 }
   0xe   : > { %v1562_v0 = vld [vmem:[%s1948_s3 + $0x38] sm:$0xff]   ;;  %v1644_v1 = vmov 0.0   ;;  %v1564_v3 = vld [vmem:[%s1948_s3 + $0x30] sm:$0xff]   ;;  %vm1645_vm0 = vmmov 0   ;;  %s1962_s19 = smov (!%p302_p5, %s1630_s19), 1  ;;  %v1566_v5 = vld [vmem:[%s1948_s3 + $0x28] sm:$0xff]  }
   0xf   : > { %1411 = vmatprep.subr.bf16.mxu0 %v1644_v1  ;;  %1423 = vmatprep.subr.bf16.mxu1 %v1644_v1  ;;  %v1563_v2 = vld [vmem:[%s1948_s3 + $0x18] sm:$0xff]   ;;  %v1565_v4 = vld [vmem:[%s1948_s3 + $0x10] sm:$0xff]   ;;  %s305_s8 = scalar_select %p304_p6, %s1626_s18, 9  ;;  %v1567_v6 = vld [vmem:[%s1948_s3 + $0x8] sm:$0xff]   ;;  %vm397_vm1 = vcmask 523264   ;;  %vm1102_vm2 = vcmask 519168  }
  0x10   : > { %1412 = vmatpush3.bf16.msra.mxu0 %v1562_v0  ;;  %1419 = vmatprep.mubr.msk.bf16.mxu0 %vm1645_vm0, %v1644_v1  ;;  %s1740_s11 = smul.u32 20, %s1962_s19  ;;  %v1568_v7 = vld [vmem:[%s1948_s3 + $0x20] sm:$0xff]   ;;  %v1572_v14 = vld [vmem:[%s1948_s3 + $0x78] sm:$0xff]   ;;  %s1964_s6 = smov (!%p314_p7, %s311_s6), 9  ;;  %v1574_v18 = vld [vmem:[%s1948_s3 + $0x70] sm:$0xff]  }
  0x11   : > { %1424 = vmatpush3.bf16.msra.mxu1 %v1563_v2  ;;  %1413 = vmatprep.subr.bf16.mxu0 %v1644_v1  ;;  %s1240_s14 = sshll.u32 %s305_s8, 1  ;;  %v1569_v8 = vld [vmem:[%s1948_s3] sm:$0xff]   ;;  %v1571_v16 = vld [vmem:[%s1948_s3 + $0x58] sm:$0xff]   ;;  %v1573_v19 = vld [vmem:[%s1948_s3 + $0x50] sm:$0xff]   ;;  %s1966_s28 = smov (!%p325_p8, %s322_s28), 9 }
  0x12   : > { %1425 = vmatprep.subr.bf16.mxu1 %v1644_v1  ;;  %1431 = vmatprep.mubr.msk.bf16.mxu1 %vm1645_vm0, %v1644_v1  ;;  %s308_s15 = sadd.s32 %s1740_s11, %s1240_s14  ;;  %s1242_s14 = sshll.u32 %s1964_s6, 1  ;;  %v1576_v20 = vld [vmem:[%s1948_s3 + $0x68] sm:$0xff]   ;;  %v1578_v23 = vld [vmem:[%s1948_s3 + $0x60] sm:$0xff]   ;;  %v1582_v26 = vld [vmem:[%s1948_s3 + $0xb8] sm:$0xff]  }
  0x13   : > { %s1241_s25 = sshll.u32 %s308_s15, 2  ;;  %s318_s17 = sadd.s32 %s1740_s11, %s1242_s14  ;;  %v1575_v22 = vld [vmem:[%s1948_s3 + $0x48] sm:$0xff]   ;;  %v1577_v25 = vld [vmem:[%s1948_s3 + $0x40] sm:$0xff]   ;;  %v1580_v29 = vld [vmem:[%s1948_s3 + $0x98] sm:$0xff]  }
  0x14   : > { %1414 = vmatpush3.bf16.msra.mxu0 %v1564_v3  ;;  %s1757_s30 = scalar_lea.vmem %s1945_s0, %s1241_s25  ;;  %s1243_s27 = sshll.u32 %s318_s17, 2  ;;  %v1584_v32 = vld [vmem:[%s1948_s3 + $0xb0] sm:$0xff]   ;;  %v1586_v35 = vld [vmem:[%s1948_s3 + $0xa8] sm:$0xff]   ;;  %v1588_v40 = vld [vmem:[%s1948_s3 + $0xa0] sm:$0xff]  }
  0x15   : > { %1426 = vmatpush3.bf16.msra.mxu1 %v1565_v4  ;;  %1415 = vmatprep.subr.bf16.mxu0 %v1644_v1  ;;  %v342_v9 = vld [vmem:[%s1757_s30] sm:$0xf]  ;;  %v351_v10 = vld [vmem:[%s1757_s30 + $0x4] sm:$0x1]  ;;  %v1583_v34 = vld [vmem:[%s1948_s3 + $0x90] sm:$0xff]   ;;  %s1968_s18 = smov (!%p335_p9, %s1626_s18), 7 }
  0x16   : > { %1427 = vmatprep.subr.bf16.mxu1 %v1644_v1  ;;  %v1256_v11 = vcombine.low %v342_v9, %v351_v10  ;;  %v508_v21 = vld [vmem:[%s1757_s30] sm:$0xe]  ;;  %s1803_s30 = scalar_lea.vmem %s1946_s1, %s1243_s27  ;;  %s1244_s27 = sshll.u32 %s1966_s28, 1  ;;  %v1585_v38 = vld [vmem:[%s1948_s3 + $0x88] sm:$0xff]   ;;  %v1591_v45 = vld [vmem:[%s1948_s3 + $0xf8] sm:$0xff]  }
  0x17   : > { %v1275_v24 = vcombine.low %v508_v21, %v351_v10  ;;  %v590_v27 = vld [vmem:[%s1803_s30] sm:$0xf]  ;;  %v669_v31 = vld [vmem:[%s1803_s30 + $0x4] sm:$0x1]  ;;  %s329_s28 = sadd.s32 %s1740_s11, %s1244_s27  ;;  %v1589_v49 = vld [vmem:[%s1948_s3 + $0xd8] sm:$0xff]  }
  0x18   : > { %1416 = vmatpush3.bf16.msra.mxu0 %v1566_v5  ;;  %v367_v12 = vshrl.u32 %v1256_v11, 16  ;;  %v369_v13 = vshll.u32 %v1256_v11, 16  ;;  %v668_v30 = vld [vmem:[%s1803_s30] sm:$0xf]  ;;  %s1245_s12 = sshll.u32 %s329_s28, 2  ;;  %v1593_v51 = vld [vmem:[%s1948_s3 + $0xf0] sm:$0xff]  }
  0x19   : > { %1428 = vmatpush3.bf16.msra.mxu1 %v1567_v6  ;;  %1417 = vmatprep.subr.bf16.mxu0 %v1644_v1  ;;  %v521_v28 = vrot.slane %v1275_v24, 1  ;;  %v1302_v33 = vcombine.low %v668_v30, %v669_v31  ;;  %v759_v36 = vld [vmem:[%s1803_s30] sm:$0xe]  ;;  %s1852_s15 = scalar_lea.vmem %s1947_s2, %s1245_s12  ;;  %v1592_v52 = vld [vmem:[%s1948_s3 + $0xd0] sm:$0xff]   ;;  %v1595_v54 = vld [vmem:[%s1948_s3 + $0xe8] sm:$0xff]  }
  0x1a   : > { %1429 = vmatprep.subr.bf16.mxu1 %v1644_v1  ;;  %v371_v15 = vrot.slane %v369_v13, 1  ;;  %v1316_v39 = vcombine.low %v759_v36, %v669_v31  ;;  %v1587_v43 = vld [vmem:[%s1948_s3 + $0x80] sm:$0xff]   ;;  %v1594_v55 = vld [vmem:[%s1948_s3 + $0xc8] sm:$0xff]   ;;  %v1599_v62 = vld [vmem:[%s1948_s3 + $0x118] sm:$0xff]  }
  0x1b   : > { %v687_v37 = vshll.u32 %v1302_v33, 16  ;;  %v685_v41 = vshrl.u32 %v1302_v33, 16  ;;  %v919_v46 = vld [vmem:[%s1852_s15] sm:$0xf]  ;;  %v920_v47 = vld [vmem:[%s1852_s15 + $0x4] sm:$0x1] }
  0x1c   : > { %1418 = vmatpush3.bf16.msra.mxu0 %v1568_v7  ;;  %v372_v17 = vor.u32 %v371_v15, %v367_v12  ;;  %v772_v44 = vrot.slane %v1316_v39, 1  ;;  %v1343_v50 = vcombine.low %v919_v46, %v920_v47  ;;  %v1597_v58 = vld [vmem:[%s1948_s3 + $0xe0] sm:$0xff]   ;;  %v1600_v63 = vld [vmem:[%s1948_s3 + $0x110] sm:$0xff]   ;;  %v1601_v0 = vld [vmem:[%s1948_s3 + $0x108] sm:$0xff]  }
  0x1d   : > { %1430 = vmatpush3.bf16.msra.mxu1 %v1569_v8  ;;  %1435 = vmatprep.subr.bf16.mxu0 %v1644_v1  ;;  %v689_v42 = vrot.slane %v687_v37, 1  ;;  %v1596_v59 = vld [vmem:[%s1948_s3 + $0xc0] sm:$0xff]  }
  0x1e   : > { %1447 = vmatprep.subr.bf16.mxu1 %v1644_v1  ;;  %v938_v53 = vshll.u32 %v1343_v50, 16  ;;  %v936_v56 = vshrl.u32 %v1343_v50, 16  ;;  %v841_v61 = vld [vmem:[%s1852_s15] sm:$0xf] }
  0x1f   : > { %1420 = vmatmul.mubr.msk.bf16.vlgmr.msra.gmra.mxu0 %vm397_vm1, %v372_v17  ;;  %v690_v48 = vor.u32 %v689_v42, %v685_v41  ;;  %v1010_v2 = vld [vmem:[%s1852_s15] sm:$0xe]  ;;  %s1246_s15 = sshll.u32 %s1962_s19, 3 }
  0x20   : > { %1432 = vmatmul.mubr.msk.bf16.vlgmr.msra.gmra.mxu1 %vm397_vm1, %v342_v9  ;;  %1436 = vmatpush3.bf16.msra.mxu0 %v1571_v16  ;;  %v940_v57 = vrot.slane %v938_v53, 1  ;;  %v1357_v3 = vcombine.low %v1010_v2, %v920_v47  ;;  %v1602_v4 = vld [vmem:[%s1948_s3 + $0x100] sm:$0xff]   ;;  %s338_s28 = sadd.s32 %s1246_s15, %s1968_s18 }
  0x21   : > { %1448 = vmatpush3.bf16.msra.mxu1 %v1572_v14  ;;  %1455 = vmatprep.mubr.msk.bf16.mxu1 %vm1645_vm0, %v1644_v1  ;;  %s1247_s12 = sshll.u32 %s338_s28, 2 }
  0x22   : > { %1449 = vmatprep.subr.bf16.mxu1 %v1644_v1  ;;  %1443 = vmatprep.mubr.msk.bf16.mxu0 %vm1645_vm0, %v1644_v1  ;;  %v941_v60 = vor.u32 %v940_v57, %v936_v56  ;;  %v1023_v5 = vrot.slane %v1357_v3, 1  ;;  %s340_s11 = scalar_lea.vmem %s1950_s5, %s1247_s12 }
  0x23   : > { %1437 = vmatprep.subr.bf16.mxu0 %v1644_v1 }
  0x24   : > { %1438 = vmatpush3.bf16.msra.mxu0 %v1573_v19 }
  0x25   : > { %1450 = vmatpush3.bf16.msra.mxu1 %v1574_v18  ;;  %1439 = vmatprep.subr.bf16.mxu0 %v1644_v1 }
  0x26   : > { %1451 = vmatprep.subr.bf16.mxu1 %v1644_v1 }
  0x28   : > { %1440 = vmatpush3.bf16.msra.mxu0 %v1575_v22 }
  0x29   : > { %1452 = vmatpush3.bf16.msra.mxu1 %v1576_v20  ;;  %1441 = vmatprep.subr.bf16.mxu0 %v1644_v1 }
  0x2a   : > { %1453 = vmatprep.subr.bf16.mxu1 %v1644_v1 }
  0x2c   : > { %1442 = vmatpush3.bf16.msra.mxu0 %v1577_v25 }
  0x2d   : > { %1454 = vmatpush3.bf16.msra.mxu1 %v1578_v23  ;;  %1459 = vmatprep.subr.bf16.mxu0 %v1644_v1 }
  0x2e   : > { %1471 = vmatprep.subr.bf16.mxu1 %v1644_v1 }
  0x2f   : > { %1444 = vmatmul.mubr.msk.bf16.vlgmr.msra.gmra.mxu0 %vm397_vm1, %v521_v28 }
  0x30   : > { %1456 = vmatmul.mubr.msk.bf16.vlgmr.msra.gmra.mxu1 %vm397_vm1, %v590_v27  ;;  %1460 = vmatpush3.bf16.msra.mxu0 %v1580_v29 }
  0x31   : > { %1472 = vmatpush3.bf16.msra.mxu1 %v1582_v26  ;;  %1479 = vmatprep.mubr.msk.bf16.mxu1 %vm1645_vm0, %v1644_v1 }
  0x32   : > { %1473 = vmatprep.subr.bf16.mxu1 %v1644_v1  ;;  %1467 = vmatprep.mubr.msk.bf16.mxu0 %vm1645_vm0, %v1644_v1 }
  0x33   : > { %1461 = vmatprep.subr.bf16.mxu0 %v1644_v1 }
  0x34   : > { %1462 = vmatpush3.bf16.msra.mxu0 %v1583_v34 }
  0x35   : > { %1474 = vmatpush3.bf16.msra.mxu1 %v1584_v32  ;;  %1463 = vmatprep.subr.bf16.mxu0 %v1644_v1 }
  0x36   : > { %1475 = vmatprep.subr.bf16.mxu1 %v1644_v1 }
  0x38   : > { %1464 = vmatpush3.bf16.msra.mxu0 %v1585_v38 }
  0x39   : > { %1476 = vmatpush3.bf16.msra.mxu1 %v1586_v35  ;;  %1465 = vmatprep.subr.bf16.mxu0 %v1644_v1 }
  0x3a   : > { %1477 = vmatprep.subr.bf16.mxu1 %v1644_v1 }
  0x3c   : > { %1466 = vmatpush3.bf16.msra.mxu0 %v1587_v43 }
  0x3d   : > { %1478 = vmatpush3.bf16.msra.mxu1 %v1588_v40  ;;  %1483 = vmatprep.subr.bf16.mxu0 %v1644_v1 }
  0x3e   : > { %1495 = vmatprep.subr.bf16.mxu1 %v1644_v1 }
  0x3f   : > { %1468 = vmatmul.mubr.msk.bf16.vlgmr.msra.gmra.mxu0 %vm397_vm1, %v690_v48 }
  0x40   : > { %1480 = vmatmul.mubr.msk.bf16.vlgmr.msra.gmra.mxu1 %vm397_vm1, %v772_v44  ;;  %1484 = vmatpush3.bf16.msra.mxu0 %v1589_v49 }
  0x41   : > { %1496 = vmatpush3.bf16.msra.mxu1 %v1591_v45  ;;  %1503 = vmatprep.mubr.msk.bf16.mxu1 %vm1645_vm0, %v1644_v1  ;;  %v1363_v45 = vld [vmem:[%s1949_s4] ss:$0 sm:$0xff] }
  0x42   : > { %1497 = vmatprep.subr.bf16.mxu1 %v1644_v1  ;;  %1491 = vmatprep.mubr.msk.bf16.mxu0 %vm1645_vm0, %v1644_v1 }
  0x43   : > { %1485 = vmatprep.subr.bf16.mxu0 %v1644_v1 }
  0x44   : > { %1486 = vmatpush3.bf16.msra.mxu0 %v1592_v52 }
  0x45   : > { %1498 = vmatpush3.bf16.msra.mxu1 %v1593_v51  ;;  %1487 = vmatprep.subr.bf16.mxu0 %v1644_v1 }
  0x46   : > { %1499 = vmatprep.subr.bf16.mxu1 %v1644_v1 }
  0x48   : > { %1488 = vmatpush3.bf16.msra.mxu0 %v1594_v55 }
  0x49   : > { %1500 = vmatpush3.bf16.msra.mxu1 %v1595_v54  ;;  %1489 = vmatprep.subr.bf16.mxu0 %v1644_v1 }
  0x4a   : > { %1501 = vmatprep.subr.bf16.mxu1 %v1644_v1 }
  0x4c   : > { %1490 = vmatpush3.bf16.msra.mxu0 %v1596_v59 }
  0x4d   : > { %1502 = vmatpush3.bf16.msra.mxu1 %v1597_v58  ;;  %1507 = vmatprep.subr.bf16.mxu0 %v1644_v1 }
  0x4f   : > { %1492 = vmatmul.mubr.msk.bf16.vlgmr.msra.gmra.mxu0 %vm397_vm1, %v841_v61 }
  0x50   : > { %1504 = vmatmul.mubr.msk.bf16.vlgmr.msra.gmra.mxu1 %vm397_vm1, %v941_v60  ;;  %1508 = vmatpush3.bf16.msra.mxu0 %v1599_v62 }
  0x51   : > { %1515 = vmatprep.mubr.msk.bf16.mxu0 %vm1645_vm0, %v1644_v1  ;;  %1509 = vmatprep.subr.bf16.mxu0 %v1644_v1 }
  0x54   : > { %1510 = vmatpush3.bf16.msra.mxu0 %v1600_v63 }
  0x55   : > { %1511 = vmatprep.subr.bf16.mxu0 %v1644_v1 }
  0x58   : > { %1512 = vmatpush3.bf16.msra.mxu0 %v1601_v0 }
  0x59   : > { %1513 = vmatprep.subr.bf16.mxu0 %v1644_v1 }
  0x5c   : > { %1514 = vmatpush3.bf16.msra.mxu0 %v1602_v4 }
  0x5f   : > { %1516 = vmatmul.mubr.msk.bf16.vlgmr.msra.gmra.mxu0 %vm397_vm1, %v1023_v5 }
  0xdf   : > { %v435_v7 = vpop.f32.mrf.mxu0 }
  0xe0   : > { %v502_v6 = vpop.f32.mrf.mxu1 }
  0xe1   : > { %v1421_v9 = vpop.f32.mrf.mxu0  ;;  %v503_v29 = vadd.f32 %v502_v6, %v435_v7 }
  0xe2   : > { %v1433_v8 = vpop.f32.mrf.mxu1 }
  0xe3   : > { %v438_v11 = vpop.f32.mrf.mxu0 }
  0xe4   : > { %v505_v10 = vpop.f32.mrf.mxu1 }
  0xe5   : > { %v1422_v13 = vpop.f32.mrf.mxu0 }
  0xe6   : > { %v1434_v12 = vpop.f32.mrf.mxu1 }
  0xef   : > { %v583_v15 = vpop.f32.mrf.mxu0 }
  0xf0   : > { %v661_v14 = vpop.f32.mrf.mxu1  ;;  %v589_v31 = vadd.f32 %v583_v15, %v503_v29 }
  0xf1   : > { %v1445_v17 = vpop.f32.mrf.mxu0 }
  0xf2   : > { %v1457_v16 = vpop.f32.mrf.mxu1  ;;  %v667_v36 = vadd.f32 %v661_v14, %v589_v31 }
  0xf3   : > { %v586_v19 = vpop.f32.mrf.mxu0 }
  0xf4   : > { %v664_v18 = vpop.f32.mrf.mxu1 }
  0xf5   : > { %v1446_v1 = vpop.f32.mrf.mxu0 }
  0xf6   : > { %v1458_v20 = vpop.f32.mrf.mxu1 }
  0xff   : > { %v752_v22 = vpop.f32.mrf.mxu0 }
 0x100   : > { %v834_v21 = vpop.f32.mrf.mxu1  ;;  %v758_v39 = vadd.f32 %v752_v22, %v667_v36 }
 0x101   : > { %v1469_v24 = vpop.f32.mrf.mxu0 }
 0x102   : > { %v1481_v23 = vpop.f32.mrf.mxu1  ;;  %v840_v41 = vadd.f32 %v834_v21, %v758_v39 }
 0x103   : > { %v755_v26 = vpop.f32.mrf.mxu0 }
 0x104   : > { %v837_v25 = vpop.f32.mrf.mxu1 }
 0x105   : > { %v1470_v28 = vpop.f32.mrf.mxu0 }
 0x106   : > { %v1482_v27 = vpop.f32.mrf.mxu1 }
 0x10f   : > { %v912_v32 = vpop.f32.mrf.mxu0 }
 0x110   : > { %v1003_v30 = vpop.f32.mrf.mxu1  ;;  %v918_v42 = vadd.f32 %v912_v32, %v840_v41 }
 0x111   : > { %v1493_v34 = vpop.f32.mrf.mxu0 }
 0x112   : > { %v1505_v33 = vpop.f32.mrf.mxu1  ;;  %v1009_v43 = vadd.f32 %v1003_v30, %v918_v42 }
 0x113   : > { %v915_v37 = vpop.f32.mrf.mxu0 }
 0x114   : > { %v1006_v35 = vpop.f32.mrf.mxu1 }
 0x115   : > { %v1494_v40 = vpop.f32.mrf.mxu0 }
 0x116   : > { %v1506_v38 = vpop.f32.mrf.mxu1 }
 0x11f   : > { %v1085_v44 = vpop.f32.mrf.mxu0 }
 0x120   : > { %v1091_v46 = vadd.f32 %v1085_v44, %v1009_v43 }
 0x121   : > { %v1517_v47 = vpop.f32.mrf.mxu0 }
 0x122   : > { %v1099_v48 = vadd.f32 %v1363_v45, %v1091_v46 }
 0x123   : > { %v1088_v49 = vpop.f32.mrf.mxu0 }
 0x124   : > { %v1100_v50 = vmax.f32 %v1099_v48, 0.0 }
 0x125   : > { %v1518_v51 = vpop.f32.mrf.mxu0 }
 0x126   : > { %v1101_v52 = vpack.c.bf16 %v1100_v50, %v1100_v50 }
 0x128   : > { %1103 = vst.msk [vmem:[%s340_s11] sm:$0xf] %vm1102_vm2, %v1101_v52 }
 0x129 PF: > { %s15_s22 = sadd.s32 1, %s1642_s22   ;;  %s1951_s18 = smov %s1634_s20 }
 0x12a   : > { %p12_p10 = scmp.ge.s32.totalorder %s15_s22, 18   ;;  %s1952_s19 = smov %s1638_s21 }
 0x12b   : > { %s1953_s20 = smov %s1956_s23  ;;  %s1954_s21 = smov %s1960_s24 }
 0x12c   :  { %14 = sbr.rel (!%p12_p10) target bundleno = 3 (0x3), region = 84 }

// kernel: gcn_forward.8
= control target key start
LH: loop header
LB: loop body
LE: loop exit
PB: predicated region body
PF: predicated region fallthrough
CT: control target
= control target key end

     0   :  { %s1762_s21 = smov 0   ;;  %s1764_s22 = smov 0   ;;  %s2034_s0 = inlined_call_operand.vmem [shape: bf16[2,10,10,64], index: 0, kind: input, shape index: {}, may-alias: {0,1,2}]   ;;  %s2035_s1 = inlined_call_operand.vmem [shape: bf16[2,10,10,64], index: 1, kind: input, shape index: {}, may-alias: {0,1,2}]   ;;  %s2036_s2 = inlined_call_operand.vmem [shape: bf16[2,10,10,64], index: 2, kind: input, shape index: {}, may-alias: {0,1,2}]   ;;  %s2037_s3 = inlined_call_operand.vmem [shape: bf16[9,64,64], index: 3, kind: input, shape index: {}]   ;;  %s2038_s4 = inlined_call_operand.vmem [shape: f32[1,64], index: 4, kind: input, shape index: {}]   ;;  %s2039_s5 = inlined_call_operand.vmem [shape: bf16[2,8,8,64], index: 5, kind: input, shape index: {}]   ;;  %s2040_s6 = inlined_call_operand.vmem [shape: bf16[2,8,8,64], index: 6, kind: output, shape index: {}]  }
   0x1   :  { %s1766_s23 = smov 0   ;;  %s1768_s24 = smov 0  }
   0x2   :  { %s1770_s25 = smov 0  }
   0x3 LB: > { %s25_s26 = sadd.s32 1, %s1715_s23  ;;  %s28_s27 = sadd.s32 1, %s1719_s24  ;;  %s1723_s25 = sphi %s1770_s25, %s16_s25   ;;  %s1719_s24 = sphi %s1768_s24, %s2044_s24   ;;  %s1715_s23 = sphi %s1766_s23, %s2043_s23   ;;  %s1711_s22 = sphi %s1764_s22, %s2042_s22   ;;  %s1707_s21 = sphi %s1762_s21, %s2041_s21  }
   0x4   : > { %p26_p0 = scmp.ge.s32.totalorder %s25_s26, 8  ;;  %p1318_p1 = scmp.ge.s32.totalorder %s1723_s25, 1 }
   0x5   : > { %p287_p2 = scmp.lt.s32.totalorder %s1723_s25, 17 }
   0x6   : > { %s2046_s26 = smov (%p26_p0, %s25_s26), 0  ;;  %s2048_s27 = smov (!%p26_p0, %s28_s27), %s1719_s24 }
   0x7   : > { %p288_p3 = pnand %p1318_p1, %p287_p2  ;;  %p30_p4 = scmp.ge.s32.totalorder %s2048_s27, 2 }
   0x8   : > { %p352_p5 = scmp.lt.s32.totalorder (!%p288_p3), %s1711_s22, 1  ;;  %p354_p6 = scmp.lt.s32.totalorder (!%p288_p3), %s1707_s21, 9 }
   0x9   : > { %s2050_s27 = smov (%p30_p4, %s2048_s27), 0  ;;  %291 = sbr.rel (%p288_p3) target bundleno = 299 (0x12b), region = 44 }
   0xa   : > { %s361_s11 = sadd.s32 (!%p288_p3), 1, %s1707_s21  ;;  %s372_s9 = sadd.s32 (!%p288_p3), 2, %s1707_s21 }
   0xb   : > { %p364_p7 = scmp.lt.s32.totalorder (!%p288_p3), %s361_s11, 9  ;;  %p375_p8 = scmp.lt.s32.totalorder (!%p288_p3), %s372_s9, 9 }
   0xc   : > { %p385_p9 = scmp.lt.s32.totalorder (!%p288_p3), %s1707_s21, 7 }
   0xe   : > { %v1643_v0 = vld [vmem:[%s2037_s3 + $0x38] sm:$0xff]   ;;  %v1725_v1 = vmov 0.0   ;;  %v1645_v3 = vld [vmem:[%s2037_s3 + $0x30] sm:$0xff]   ;;  %vm1726_vm0 = vmmov 0   ;;  %s2052_s22 = smov (!%p352_p5, %s1711_s22), 1  ;;  %v1647_v5 = vld [vmem:[%s2037_s3 + $0x28] sm:$0xff]  }
   0xf   : > { %1492 = vmatprep.subr.bf16.mxu0 %v1725_v1  ;;  %1504 = vmatprep.subr.bf16.mxu1 %v1725_v1  ;;  %v1644_v2 = vld [vmem:[%s2037_s3 + $0x18] sm:$0xff]   ;;  %v1646_v4 = vld [vmem:[%s2037_s3 + $0x10] sm:$0xff]   ;;  %s355_s12 = scalar_select %p354_p6, %s1707_s21, 9  ;;  %v1648_v6 = vld [vmem:[%s2037_s3 + $0x8] sm:$0xff]   ;;  %vm455_vm1 = vcmask 523264   ;;  %vm1163_vm2 = vcmask 519168  }
  0x10   : > { %1493 = vmatpush3.bf16.msra.mxu0 %v1643_v0  ;;  %1500 = vmatprep.mubr.msk.bf16.mxu0 %vm1726_vm0, %v1725_v1  ;;  %s1826_s15 = smul.u32 20, %s2052_s22  ;;  %v1649_v7 = vld [vmem:[%s2037_s3 + $0x20] sm:$0xff]   ;;  %v1653_v14 = vld [vmem:[%s2037_s3 + $0x78] sm:$0xff]   ;;  %s2054_s11 = smov (!%p364_p7, %s361_s11), 9  ;;  %v1655_v18 = vld [vmem:[%s2037_s3 + $0x70] sm:$0xff]  }
  0x11   : > { %1505 = vmatpush3.bf16.msra.mxu1 %v1644_v2  ;;  %1494 = vmatprep.subr.bf16.mxu0 %v1725_v1  ;;  %s1319_s18 = sshll.u32 %s355_s12, 1  ;;  %v1650_v8 = vld [vmem:[%s2037_s3] sm:$0xff]   ;;  %v1652_v16 = vld [vmem:[%s2037_s3 + $0x58] sm:$0xff]   ;;  %v1654_v19 = vld [vmem:[%s2037_s3 + $0x50] sm:$0xff]   ;;  %s2056_s9 = smov (!%p375_p8, %s372_s9), 9 }
  0x12   : > { %1506 = vmatprep.subr.bf16.mxu1 %v1725_v1  ;;  %1512 = vmatprep.mubr.msk.bf16.mxu1 %vm1726_vm0, %v1725_v1  ;;  %s358_s19 = sadd.s32 %s1826_s15, %s1319_s18  ;;  %v1657_v20 = vld [vmem:[%s2037_s3 + $0x68] sm:$0xff]   ;;  %v1659_v23 = vld [vmem:[%s2037_s3 + $0x60] sm:$0xff]   ;;  %v1663_v26 = vld [vmem:[%s2037_s3 + $0xb8] sm:$0xff]   ;;  %s2058_s21 = smov (!%p385_p9, %s1707_s21), 7 }
  0x13   : > { %s1320_s29 = sshll.u32 %s358_s19, 2  ;;  %s1321_s19 = sshll.u32 %s2054_s11, 1  ;;  %v1656_v22 = vld [vmem:[%s2037_s3 + $0x48] sm:$0xff]   ;;  %v1658_v25 = vld [vmem:[%s2037_s3 + $0x40] sm:$0xff]   ;;  %v1661_v29 = vld [vmem:[%s2037_s3 + $0x98] sm:$0xff]  }
  0x14   : > { %1495 = vmatpush3.bf16.msra.mxu0 %v1645_v3  ;;  %s1843_s10 = scalar_lea.vmem %s2034_s0, %s1320_s29  ;;  %s368_s29 = sadd.s32 %s1826_s15, %s1321_s19  ;;  %v1665_v32 = vld [vmem:[%s2037_s3 + $0xb0] sm:$0xff]   ;;  %v1667_v35 = vld [vmem:[%s2037_s3 + $0xa8] sm:$0xff]   ;;  %v1669_v40 = vld [vmem:[%s2037_s3 + $0xa0] sm:$0xff]  }
  0x15   : > { %1507 = vmatpush3.bf16.msra.mxu1 %v1646_v4  ;;  %1496 = vmatprep.subr.bf16.mxu0 %v1725_v1  ;;  %v400_v9 = vld [vmem:[%s1843_s10] sm:$0xf]  ;;  %v409_v10 = vld [vmem:[%s1843_s10 + $0x4] sm:$0x1]  ;;  %s1322_s8 = sshll.u32 %s368_s29, 2  ;;  %s1323_s11 = sshll.u32 %s2056_s9, 1 }
  0x16   : > { %1508 = vmatprep.subr.bf16.mxu1 %v1725_v1  ;;  %v1337_v11 = vcombine.low %v400_v9, %v409_v10  ;;  %v566_v21 = vld [vmem:[%s1843_s10] sm:$0xe]  ;;  %s1889_s10 = scalar_lea.vmem %s2035_s1, %s1322_s8  ;;  %v1664_v34 = vld [vmem:[%s2037_s3 + $0x90] sm:$0xff]   ;;  %s379_s9 = sadd.s32 %s1826_s15, %s1323_s11  ;;  %v1666_v38 = vld [vmem:[%s2037_s3 + $0x88] sm:$0xff]  }
  0x17   : > { %v1356_v24 = vcombine.low %v566_v21, %v409_v10  ;;  %v648_v27 = vld [vmem:[%s1889_s10] sm:$0xf]  ;;  %v727_v31 = vld [vmem:[%s1889_s10 + $0x4] sm:$0x1]  ;;  %s1324_s19 = sshll.u32 %s379_s9, 2  ;;  %v1672_v45 = vld [vmem:[%s2037_s3 + $0xf8] sm:$0xff]  }
  0x18   : > { %1497 = vmatpush3.bf16.msra.mxu0 %v1647_v5  ;;  %v425_v12 = vshrl.u32 %v1337_v11, 16  ;;  %v427_v13 = vshll.u32 %v1337_v11, 16  ;;  %v726_v30 = vld [vmem:[%s1889_s10] sm:$0xf]  ;;  %s1938_s29 = scalar_lea.vmem %s2036_s2, %s1324_s19  ;;  %v1670_v49 = vld [vmem:[%s2037_s3 + $0xd8] sm:$0xff]   ;;  %v1674_v51 = vld [vmem:[%s2037_s3 + $0xf0] sm:$0xff]  }
  0x19   : > { %1509 = vmatpush3.bf16.msra.mxu1 %v1648_v6  ;;  %1498 = vmatprep.subr.bf16.mxu0 %v1725_v1  ;;  %v579_v28 = vrot.slane %v1356_v24, 1  ;;  %v1383_v33 = vcombine.low %v726_v30, %v727_v31  ;;  %v817_v36 = vld [vmem:[%s1889_s10] sm:$0xe]  ;;  %v978_v47 = vld [vmem:[%s1938_s29 + $0x4] sm:$0x1]  ;;  %v1673_v52 = vld [vmem:[%s2037_s3 + $0xd0] sm:$0xff]  }
  0x1a   : > { %1510 = vmatprep.subr.bf16.mxu1 %v1725_v1  ;;  %v429_v15 = vrot.slane %v427_v13, 1  ;;  %v1397_v39 = vcombine.low %v817_v36, %v727_v31  ;;  %v1668_v43 = vld [vmem:[%s2037_s3 + $0x80] sm:$0xff]   ;;  %v1676_v54 = vld [vmem:[%s2037_s3 + $0xe8] sm:$0xff]   ;;  %v1680_v62 = vld [vmem:[%s2037_s3 + $0x118] sm:$0xff]  }
  0x1b   : > { %v745_v37 = vshll.u32 %v1383_v33, 16  ;;  %v743_v41 = vshrl.u32 %v1383_v33, 16  ;;  %v977_v46 = vld [vmem:[%s1938_s29] sm:$0xf]  ;;  %v1675_v55 = vld [vmem:[%s2037_s3 + $0xc8] sm:$0xff]   ;;  %v1681_v63 = vld [vmem:[%s2037_s3 + $0x110] sm:$0xff]  }
  0x1c   : > { %1499 = vmatpush3.bf16.msra.mxu0 %v1649_v7  ;;  %v430_v17 = vor.u32 %v429_v15, %v425_v12  ;;  %v830_v44 = vrot.slane %v1397_v39, 1  ;;  %v1424_v50 = vcombine.low %v977_v46, %v978_v47  ;;  %v1678_v58 = vld [vmem:[%s2037_s3 + $0xe0] sm:$0xff]   ;;  %v1682_v0 = vld [vmem:[%s2037_s3 + $0x108] sm:$0xff]  }
  0x1d   : > { %1511 = vmatpush3.bf16.msra.mxu1 %v1650_v8  ;;  %1516 = vmatprep.subr.bf16.mxu0 %v1725_v1  ;;  %v747_v42 = vrot.slane %v745_v37, 1  ;;  %v1677_v59 = vld [vmem:[%s2037_s3 + $0xc0] sm:$0xff]  }
  0x1e   : > { %1528 = vmatprep.subr.bf16.mxu1 %v1725_v1  ;;  %v996_v53 = vshll.u32 %v1424_v50, 16  ;;  %v994_v56 = vshrl.u32 %v1424_v50, 16  ;;  %v899_v61 = vld [vmem:[%s1938_s29] sm:$0xf] }
  0x1f   : > { %1501 = vmatmul.mubr.msk.bf16.vlgmr.msra.gmra.mxu0 %vm455_vm1, %v430_v17  ;;  %v748_v48 = vor.u32 %v747_v42, %v743_v41  ;;  %v1068_v2 = vld [vmem:[%s1938_s29] sm:$0xe]  ;;  %s1325_s29 = sshll.u32 %s2052_s22, 3  ;;  %v1444_v46 = vld [vmem:[%s2038_s4] ss:$0 sm:$0xff] }
  0x20   : > { %1513 = vmatmul.mubr.msk.bf16.vlgmr.msra.gmra.mxu1 %vm455_vm1, %v400_v9  ;;  %1517 = vmatpush3.bf16.msra.mxu0 %v1652_v16  ;;  %v998_v57 = vrot.slane %v996_v53, 1  ;;  %v1438_v3 = vcombine.low %v1068_v2, %v978_v47  ;;  %v1683_v4 = vld [vmem:[%s2037_s3 + $0x100] sm:$0xff]   ;;  %s388_s18 = sadd.s32 %s1325_s29, %s2058_s21 }
  0x21   : > { %1529 = vmatpush3.bf16.msra.mxu1 %v1653_v14  ;;  %1536 = vmatprep.mubr.msk.bf16.mxu1 %vm1726_vm0, %v1725_v1  ;;  %s1326_s19 = sshll.u32 %s388_s18, 2 }
  0x22   : > { %1530 = vmatprep.subr.bf16.mxu1 %v1725_v1  ;;  %1524 = vmatprep.mubr.msk.bf16.mxu0 %vm1726_vm0, %v1725_v1  ;;  %v999_v60 = vor.u32 %v998_v57, %v994_v56  ;;  %v1081_v5 = vrot.slane %v1438_v3, 1  ;;  %s390_s15 = scalar_lea.vmem %s2039_s5, %s1326_s19  ;;  %s398_s7 = scalar_lea.vmem %s2040_s6, %s1326_s19 }
  0x23   : > { %1518 = vmatprep.subr.bf16.mxu0 %v1725_v1 }
  0x24   : > { %1519 = vmatpush3.bf16.msra.mxu0 %v1654_v19 }
  0x25   : > { %1531 = vmatpush3.bf16.msra.mxu1 %v1655_v18  ;;  %1520 = vmatprep.subr.bf16.mxu0 %v1725_v1 }
  0x26   : > { %1532 = vmatprep.subr.bf16.mxu1 %v1725_v1 }
  0x28   : > { %1521 = vmatpush3.bf16.msra.mxu0 %v1656_v22 }
  0x29   : > { %1533 = vmatpush3.bf16.msra.mxu1 %v1657_v20  ;;  %1522 = vmatprep.subr.bf16.mxu0 %v1725_v1 }
  0x2a   : > { %1534 = vmatprep.subr.bf16.mxu1 %v1725_v1 }
  0x2c   : > { %1523 = vmatpush3.bf16.msra.mxu0 %v1658_v25 }
  0x2d   : > { %1535 = vmatpush3.bf16.msra.mxu1 %v1659_v23  ;;  %1540 = vmatprep.subr.bf16.mxu0 %v1725_v1 }
  0x2e   : > { %1552 = vmatprep.subr.bf16.mxu1 %v1725_v1 }
  0x2f   : > { %1525 = vmatmul.mubr.msk.bf16.vlgmr.msra.gmra.mxu0 %vm455_vm1, %v579_v28 }
  0x30   : > { %1537 = vmatmul.mubr.msk.bf16.vlgmr.msra.gmra.mxu1 %vm455_vm1, %v648_v27  ;;  %1541 = vmatpush3.bf16.msra.mxu0 %v1661_v29 }
  0x31   : > { %1553 = vmatpush3.bf16.msra.mxu1 %v1663_v26  ;;  %1560 = vmatprep.mubr.msk.bf16.mxu1 %vm1726_vm0, %v1725_v1 }
  0x32   : > { %1554 = vmatprep.subr.bf16.mxu1 %v1725_v1  ;;  %1548 = vmatprep.mubr.msk.bf16.mxu0 %vm1726_vm0, %v1725_v1 }
  0x33   : > { %1542 = vmatprep.subr.bf16.mxu0 %v1725_v1 }
  0x34   : > { %1543 = vmatpush3.bf16.msra.mxu0 %v1664_v34 }
  0x35   : > { %1555 = vmatpush3.bf16.msra.mxu1 %v1665_v32  ;;  %1544 = vmatprep.subr.bf16.mxu0 %v1725_v1 }
  0x36   : > { %1556 = vmatprep.subr.bf16.mxu1 %v1725_v1 }
  0x38   : > { %1545 = vmatpush3.bf16.msra.mxu0 %v1666_v38 }
  0x39   : > { %1557 = vmatpush3.bf16.msra.mxu1 %v1667_v35  ;;  %1546 = vmatprep.subr.bf16.mxu0 %v1725_v1 }
  0x3a   : > { %1558 = vmatprep.subr.bf16.mxu1 %v1725_v1 }
  0x3c   : > { %1547 = vmatpush3.bf16.msra.mxu0 %v1668_v43  ;;  %v1158_v43 = vld [vmem:[%s390_s15] sm:$0xf] }
  0x3d   : > { %1559 = vmatpush3.bf16.msra.mxu1 %v1669_v40  ;;  %1564 = vmatprep.subr.bf16.mxu0 %v1725_v1 }
  0x3e   : > { %1576 = vmatprep.subr.bf16.mxu1 %v1725_v1 }
  0x3f   : > { %1549 = vmatmul.mubr.msk.bf16.vlgmr.msra.gmra.mxu0 %vm455_vm1, %v748_v48  ;;  %v1159_v48 = vunpack.c.l.bf16 %v1158_v43 }
  0x40   : > { %1561 = vmatmul.mubr.msk.bf16.vlgmr.msra.gmra.mxu1 %vm455_vm1, %v830_v44  ;;  %1565 = vmatpush3.bf16.msra.mxu0 %v1670_v49 }
  0x41   : > { %1577 = vmatpush3.bf16.msra.mxu1 %v1672_v45  ;;  %1584 = vmatprep.mubr.msk.bf16.mxu1 %vm1726_vm0, %v1725_v1 }
  0x42   : > { %1578 = vmatprep.subr.bf16.mxu1 %v1725_v1  ;;  %1572 = vmatprep.mubr.msk.bf16.mxu0 %vm1726_vm0, %v1725_v1 }
  0x43   : > { %1566 = vmatprep.subr.bf16.mxu0 %v1725_v1 }
  0x44   : > { %1567 = vmatpush3.bf16.msra.mxu0 %v1673_v52 }
  0x45   : > { %1579 = vmatpush3.bf16.msra.mxu1 %v1674_v51  ;;  %1568 = vmatprep.subr.bf16.mxu0 %v1725_v1 }
  0x46   : > { %1580 = vmatprep.subr.bf16.mxu1 %v1725_v1 }
  0x48   : > { %1569 = vmatpush3.bf16.msra.mxu0 %v1675_v55 }
  0x49   : > { %1581 = vmatpush3.bf16.msra.mxu1 %v1676_v54  ;;  %1570 = vmatprep.subr.bf16.mxu0 %v1725_v1 }
  0x4a   : > { %1582 = vmatprep.subr.bf16.mxu1 %v1725_v1 }
  0x4c   : > { %1571 = vmatpush3.bf16.msra.mxu0 %v1677_v59 }
  0x4d   : > { %1583 = vmatpush3.bf16.msra.mxu1 %v1678_v58  ;;  %1588 = vmatprep.subr.bf16.mxu0 %v1725_v1 }
  0x4f   : > { %1573 = vmatmul.mubr.msk.bf16.vlgmr.msra.gmra.mxu0 %vm455_vm1, %v899_v61 }
  0x50   : > { %1585 = vmatmul.mubr.msk.bf16.vlgmr.msra.gmra.mxu1 %vm455_vm1, %v999_v60  ;;  %1589 = vmatpush3.bf16.msra.mxu0 %v1680_v62 }
  0x51   : > { %1596 = vmatprep.mubr.msk.bf16.mxu0 %vm1726_vm0, %v1725_v1  ;;  %1590 = vmatprep.subr.bf16.mxu0 %v1725_v1 }
  0x54   : > { %1591 = vmatpush3.bf16.msra.mxu0 %v1681_v63 }
  0x55   : > { %1592 = vmatprep.subr.bf16.mxu0 %v1725_v1 }
  0x58   : > { %1593 = vmatpush3.bf16.msra.mxu0 %v1682_v0 }
  0x59   : > { %1594 = vmatprep.subr.bf16.mxu0 %v1725_v1 }
  0x5c   : > { %1595 = vmatpush3.bf16.msra.mxu0 %v1683_v4 }
  0x5f   : > { %1597 = vmatmul.mubr.msk.bf16.vlgmr.msra.gmra.mxu0 %vm455_vm1, %v1081_v5 }
  0xdf   : > { %v493_v7 = vpop.f32.mrf.mxu0 }
  0xe0   : > { %v560_v6 = vpop.f32.mrf.mxu1 }
  0xe1   : > { %v1502_v9 = vpop.f32.mrf.mxu0  ;;  %v561_v29 = vadd.f32 %v560_v6, %v493_v7 }
  0xe2   : > { %v1514_v8 = vpop.f32.mrf.mxu1 }
  0xe3   : > { %v496_v11 = vpop.f32.mrf.mxu0 }
  0xe4   : > { %v563_v10 = vpop.f32.mrf.mxu1 }
  0xe5   : > { %v1503_v13 = vpop.f32.mrf.mxu0 }
  0xe6   : > { %v1515_v12 = vpop.f32.mrf.mxu1 }
  0xef   : > { %v641_v15 = vpop.f32.mrf.mxu0 }
  0xf0   : > { %v719_v14 = vpop.f32.mrf.mxu1  ;;  %v647_v31 = vadd.f32 %v641_v15, %v561_v29 }
  0xf1   : > { %v1526_v17 = vpop.f32.mrf.mxu0 }
  0xf2   : > { %v1538_v16 = vpop.f32.mrf.mxu1  ;;  %v725_v36 = vadd.f32 %v719_v14, %v647_v31 }
  0xf3   : > { %v644_v19 = vpop.f32.mrf.mxu0 }
  0xf4   : > { %v722_v18 = vpop.f32.mrf.mxu1 }
  0xf5   : > { %v1527_v20 = vpop.f32.mrf.mxu0 }
  0xf6   : > { %v1539_v1 = vpop.f32.mrf.mxu1 }
  0xff   : > { %v810_v22 = vpop.f32.mrf.mxu0 }
 0x100   : > { %v892_v21 = vpop.f32.mrf.mxu1  ;;  %v816_v39 = vadd.f32 %v810_v22, %v725_v36 }
 0x101   : > { %v1550_v24 = vpop.f32.mrf.mxu0 }
 0x102   : > { %v1562_v23 = vpop.f32.mrf.mxu1  ;;  %v898_v41 = vadd.f32 %v892_v21, %v816_v39 }
 0x103   : > { %v813_v26 = vpop.f32.mrf.mxu0 }
 0x104   : > { %v895_v25 = vpop.f32.mrf.mxu1 }
 0x105   : > { %v1551_v28 = vpop.f32.mrf.mxu0 }
 0x106   : > { %v1563_v27 = vpop.f32.mrf.mxu1 }
 0x10f   : > { %v970_v32 = vpop.f32.mrf.mxu0 }
 0x110   : > { %v1061_v30 = vpop.f32.mrf.mxu1  ;;  %v976_v42 = vadd.f32 %v970_v32, %v898_v41 }
 0x111   : > { %v1574_v34 = vpop.f32.mrf.mxu0 }
 0x112   : > { %v1586_v33 = vpop.f32.mrf.mxu1  ;;  %v1067_v44 = vadd.f32 %v1061_v30, %v976_v42 }
 0x113   : > { %v973_v37 = vpop.f32.mrf.mxu0 }
 0x114   : > { %v1064_v35 = vpop.f32.mrf.mxu1 }
 0x115   : > { %v1575_v40 = vpop.f32.mrf.mxu0 }
 0x116   : > { %v1587_v38 = vpop.f32.mrf.mxu1 }
 0x11f   : > { %v1143_v45 = vpop.f32.mrf.mxu0 }
 0x120   : > { %v1149_v47 = vadd.f32 %v1143_v45, %v1067_v44 }
 0x121   : > { %v1598_v49 = vpop.f32.mrf.mxu0 }
 0x122   : > { %v1157_v50 = vadd.f32 %v1444_v46, %v1149_v47 }
 0x123   : > { %v1146_v51 = vpop.f32.mrf.mxu0 }
 0x124   : > { %v1160_v52 = vadd.f32 %v1159_v48, %v1157_v50 }
 0x125   : > { %v1599_v53 = vpop.f32.mrf.mxu0 }
 0x126   : > { %v1161_v54 = vmax.f32 %v1160_v52, 0.0 }
 0x128   : > { %v1162_v55 = vpack.c.bf16 %v1161_v54, %v1161_v54 }
 0x12a   : > { %1164 = vst.msk [vmem:[%s398_s7] sm:$0xf] %vm1163_vm2, %v1162_v55 }
 0x12b PF: > { %s16_s25 = sadd.s32 1, %s1723_s25   ;;  %s2041_s21 = smov %s1715_s23 }
 0x12c   : > { %p13_p10 = scmp.ge.s32.totalorder %s16_s25, 18   ;;  %s2042_s22 = smov %s1719_s24 }
 0x12d   : > { %s2043_s23 = smov %s2046_s26  ;;  %s2044_s24 = smov %s2050_s27 }
 0x12e   :  { %15 = sbr.rel (!%p13_p10) target bundleno = 3 (0x3), region = 91 }

// kernel: gcn_forward.9
= control target key start
LH: loop header
LB: loop body
LE: loop exit
PB: predicated region body
PF: predicated region fallthrough
CT: control target
= control target key end

     0   :  { %13 = vsyncpa [#allocation3], 0  ;;  %s3222_s0 = inlined_call_operand.vmem [shape: bf16[2,64,64], index: 0, kind: input, shape index: {}]   ;;  %s3223_s1 = inlined_call_operand.vmem [shape: f32[64,1], index: 1, kind: input, shape index: {}]   ;;  %s3224_s2 = inlined_call_operand.vmem [shape: s32[64,1], index: 2, kind: input, shape index: {}]   ;;  %s3225_s3 = inlined_call_operand.vmem [shape: s32[64,1], index: 3, kind: input, shape index: {}]   ;;  %s3226_s4 = inlined_call_operand.vmem [shape: bf16[64,32], index: 4, kind: input, shape index: {}]   ;;  %s3227_s5 = inlined_call_operand.vmem [shape: f32[1,32], index: 5, kind: input, shape index: {}]   ;;  %s3228_s6 = inlined_call_operand.vmem [shape: bf16[32,6], index: 6, kind: input, shape index: {}]   ;;  %s3229_s7 = inlined_call_operand.vmem [shape: f32[1,6], index: 7, kind: input, shape index: {}]   ;;  %s3230_s8 = inlined_call_operand.hbm [shape: f32[2,1,6], index: 8, kind: output, shape index: {}]  }
   0x1   :  { %15 = vsyncpa [#allocation3 + $0x1], 0  ;;  %s1701_s27 = smov 0   ;;  %s1703_s28 = smov 0  }
   0x2   :  { %s1705_s29 = smov 0   ;;  %s1707_s30 = smov 0  }
   0x3 LB: > { %s1722_s9 = sadd.s32 4294967295, %s1652_s30   ;;  %s1468_s10 = sadd.s32 4294967294, %s1652_s30   ;;  %s1652_s30 = sphi %s1707_s30, %s3590_s30   ;;  %s1648_s29 = sphi %s1705_s29, %s3589_s29   ;;  %s1644_s28 = sphi %s1703_s28, %s3588_s28   ;;  %s1640_s27 = sphi %s1701_s27, %s3587_s27  }
   0x4   : > { %s1726_s11 = sadd.s32 1, %s1652_s30   ;;  %s201_s12 = sadd.s32 1, %s1648_s29 }
   0x5   : > { %s198_s13 = ssub.s32 %s1652_s30, %s1726_s11  ;;  %p211_p0 = scmp.ne.s32.totalorder %s1648_s29, %s1644_s28 }
   0x6   : > { %p199_p1 = scmp.eq.s32.totalorder %s198_s13, 0  ;;  %p212_p2 = scmp.eq.s32.totalorder %s1722_s9, 1 }
   0x7   : > { %p217_p3 = scmp.ne.s32.totalorder %s1644_s28, %s1640_s27  ;;  %p218_p4 = scmp.eq.s32.totalorder %s1468_s10, 1 }
   0x8   : > { %s1737_s14 = scalar_select %p199_p1, %s1648_s29, %s201_s12  }
   0x9   : > { %p1739_p5 = por %p212_p2, %p211_p0  ;;  %p1743_p6 = por %p218_p4, %p217_p3 }
   0xa   : > { %p1471_p7 = scmp.ge.s32.totalorder %s1652_s30, 1  ;;  %p265_p8 = scmp.lt.s32.totalorder %s1652_s30, 3 }
   0xc   : > { %p266_p9 = pnand %p1471_p7, %p265_p8 }
   0xe   : > { %269 = sbr.rel (%p266_p9) target bundleno = 604 (0x25c), region = 52 }
  0x13   : > { %v310_v0 = vld [vmem:[%s3223_s1 + $0x30] sm:$0xff]  ;;  %v308_v1 = vld [vmem:[%s3223_s1 + $0x20] sm:$0xff]  ;;  %p298_p10 = scmp.lt.s32.totalorder %s1722_s9, 1  ;;  %v1654_v2 = vmov 0   ;;  %v1582_v3 = vld [vmem:[%s3226_s4 + $0x18] sm:$0xff]   ;;  %vm388_vm6 = vcmask 523264  }
  0x14   : > { %1581 = vset.pattern.permute.xlu1 %v1654_v2  ;;  %1580 = vset.pattern.permute.xlu0 %v1654_v2  ;;  %v311_v4 = vld [vmem:[%s3223_s1 + $0x38] sm:$0xff]  ;;  %v309_v5 = vld [vmem:[%s3223_s1 + $0x28] sm:$0xff]  ;;  %v1583_v6 = vld [vmem:[%s3226_s4 + $0x10] sm:$0xff]   ;;  %s1494_s24 = sshll.u32 %s1722_s9, 4  ;;  %s1655_s17 = smov [#allocation2]  }
  0x15   : > { %498 = vperm.xlu1 %1581, %v310_v0   ;;  %488 = vperm.xlu0 %1580, %v308_v1   ;;  %s299_s23 = scalar_select %p298_p10, %s1722_s9, 1  ;;  %v1584_v7 = vld [vmem:[%s3226_s4 + $0x8] sm:$0xff]   ;;  %v1780_v9 = vld [vmem:[%s3224_s2 + $0x30] sm:$0xff]  ;;  %v1790_v11 = vld [vmem:[%s3224_s2] sm:$0xff] }
  0x16   : > { %1512 = vmatprep.subr.bf16.mxu0 %v1582_v3  ;;  %v305_v8 = vld [vmem:[%s3223_s1 + $0x8] sm:$0xff]  ;;  %v1785_v10 = vld [vmem:[%s3225_s3 + $0x30] sm:$0xff]  ;;  %vm539_vm0 = vcmp.gt.s32.totalorder %v1780_v9, 0  ;;  %v1797_v12 = vld [vmem:[%s3225_s3] sm:$0xff]  ;;  %vm533_vm2 = vcmp.gt.s32.totalorder %v1790_v11, 0  ;;  %s1411_s12 = scalar_lea.hbm %s3230_s8, %s1494_s24  ;;  %s1596_s18 = sshll.u32 %s1655_s17, 4  ;;  %s1597_s18 = int_to_ptr.vmem [resolvable:$false] %s1596_s18 }
  0x17   : > { %1513 = vmatpush3.bf16.msra.mxu0 %v1582_v3  ;;  %s1497_s19 = sshll.u32 %s299_s23, 5  ;;  %vm3237_vm1 = vcmp.gt.s32.totalorder %v1785_v10, 0  ;;  %v304_v13 = vld [vmem:[%s3223_s1] sm:$0xff]  ;;  %vm3234_vm4 = vcmp.gt.s32.totalorder %v1797_v12, 0  ;;  %v1823_v15 = vld [vmem:[%s3224_s2 + $0x38] sm:$0xff]  ;;  %v1843_v20 = vld [vmem:[%s3224_s2 + $0x10] sm:$0xff] }
  0x18   : > { %1514 = vmatprep.subr.bf16.mxu0 %v1583_v6  ;;  %s1803_s20 = scalar_lea.vmem %s3222_s0, %s1497_s19  ;;  %vm555_vm3 = vmand %vm539_vm0, %vm3237_vm1  ;;  %v1585_v14 = vld [vmem:[%s3226_s4] sm:$0xff]   ;;  %v1828_v16 = vld [vmem:[%s3225_s3 + $0x38] sm:$0xff]  ;;  %vm540_vm7 = vcmp.gt.s32.totalorder %v1823_v15, 0  ;;  %vm3231_vm10 = vcmp.gt.s32.totalorder %v1843_v20, 0  ;;  %v619_v30 = vsel %vm539_vm0, 1, %v1654_v2  ;;  %v613_v31 = vsel %vm533_vm2, 1, %v1654_v2 }
  0x19   : > { %503 = vperm.xlu1 %1581, %v311_v4   ;;  %493 = vperm.xlu0 %1580, %v309_v5   ;;  %vm549_vm5 = vmand %vm533_vm2, %vm3234_vm4  ;;  %v1586_v17 = vld [vmem:[%s1803_s20] sm:$0xff]   ;;  %vm3236_vm8 = vcmp.gt.s32.totalorder %v1828_v16, 0  ;;  %v563_v18 = vsel %vm555_vm3, 1, %v1654_v2  ;;  %v1848_v21 = vld [vmem:[%s3225_s3 + $0x10] sm:$0xff]  ;;  %vm3233_vm3 = vcmp.lt.s32.totalorder %v1785_v10, 7  ;;  %v620_v33 = vsel %vm540_vm7, 1, %v1654_v2 }
  0x1a   : > { %v557_v19 = vsel %vm549_vm5, 1, %v1654_v2  ;;  %vm556_vm9 = vmand %vm540_vm7, %vm3236_vm8  ;;  %1520 = vmatprep.mubr.msk.bf16.mxu0 %vm388_vm6, %v1586_v17  ;;  %v1854_v22 = vld [vmem:[%s3224_s2 + $0x8] sm:$0xff]  ;;  %vm3241_vm11 = vcmp.gt.s32.totalorder %v1848_v21, 0  ;;  %v306_v24 = vld [vmem:[%s3223_s1 + $0x10] sm:$0xff]  ;;  %vm3235_vm5 = vcmp.lt.s32.totalorder %v1797_v12, 7  ;;  %s296_s19 = sand.u32 1, %s1644_s28  }
  0x1b   : > { %1515 = vmatpush3.bf16.msra.mxu0 %v1583_v6  ;;  %v1859_v23 = vld [vmem:[%s3225_s3 + $0x8] sm:$0xff]  ;;  %vm3240_vm12 = vcmp.gt.s32.totalorder %v1854_v22, 0  ;;  %v564_v25 = vsel %vm556_vm9, 1, %v1654_v2  ;;  %vm551_vm14 = vmand %vm3231_vm10, %vm3241_vm11  ;;  %v1588_v27 = vld [vmem:[%s1803_s20 + $0x10] sm:$0xff]   ;;  %vm870_vm9 = vcmp.lt.s32.totalorder %v1790_v11, 7  ;;  %vm3239_vm10 = vcmp.lt.s32.totalorder %v1823_v15, 7 }
  0x1c   : > { %1516 = vmatprep.subr.bf16.mxu0 %v1584_v7  ;;  %vm3232_vm13 = vcmp.gt.s32.totalorder %v1859_v23, 0  ;;  %v1587_v26 = vld [vmem:[%s1803_s20 + $0x8] sm:$0xff]   ;;  %v559_v28 = vsel %vm551_vm14, 1, %v1654_v2  ;;  %v1589_v32 = vld [vmem:[%s1803_s20 + $0x18] sm:$0xff]   ;;  %vm3238_vm14 = vcmp.lt.s32.totalorder %v1780_v9, 7  ;;  %v1931_v38 = vsel %vm870_vm9, 1, %v1654_v2 }
  0x1d   : > { %473 = vperm.xlu1 %1581, %v305_v8   ;;  %468 = vperm.xlu0 %1580, %v304_v13   ;;  %vm550_vm15 = vmand %vm3240_vm12, %vm3232_vm13  ;;  %v1916_v36 = vld [vmem:[%s3224_s2 + $0x18] sm:$0xff]  ;;  %v1936_v39 = vsel %vm3239_vm10, 1, %v1654_v2  ;;  %v1950_v41 = vsel %vm3238_vm14, 1, %v1654_v2  ;;  %v614_v42 = vsel %vm3240_vm12, 1, %v1654_v2  ;;  %v1978_v46 = vld [vmem:[%s3224_s2 + $0x20] sm:$0xff]  ;;  %s297_s25 = scalar_lea.vmem [#allocation2], %s296_s19 }
  0x1e   : > { %v558_v29 = vsel %vm550_vm15, 1, %v1654_v2  ;;  %vm1901_vm15 = vmand %vm539_vm0, %vm3233_vm3  ;;  %v1921_v37 = vld [vmem:[%s3225_s3 + $0x18] sm:$0xff]  ;;  %vm693_vm3 = vcmp.lt.s32.totalorder %v1828_v16, 7  ;;  %v1992_v48 = vld [vmem:[%s3224_s2 + $0x28] sm:$0xff]  ;;  %vm3242_vm12 = vcmp.lt.s32.totalorder %v1978_v46, 7  ;;  %s1413_s26 = sshll.u32 %s297_s25, 4  ;;  %s1414_s26 = int_to_ptr.vmem [resolvable:$true] %s1413_s26 }
  0x1f   : > { %1517 = vmatpush3.bf16.msra.mxu0 %v1584_v7  ;;  %vm1909_vm13 = vmand %vm533_vm2, %vm3235_vm5  ;;  %vm3245_vm2 = vcmp.lt.s32.totalorder %v1843_v20, 7  ;;  %vm3244_vm5 = vcmp.lt.s32.totalorder %v1854_v22, 7  ;;  %v2023_v53 = vsel %vm3242_vm12, 1, %v1654_v2  ;;  %v307_v56 = vld [vmem:[%s3223_s1 + $0x18] sm:$0xff]  ;;  %vm3372_vm12 = vcmp.lt.s32.totalorder %v1797_v12, 7  ;;  %v2074_v61 = vld [vmem:[%s3225_s3 + $0x20] sm:$0xff]  ;;  %p1599_p0 = scmp.lt.s32.totalorder %s1414_s26, %s1597_s18 }
  0x20   : > { %1518 = vmatprep.subr.bf16.mxu0 %v1585_v14  ;;  %vm878_vm0 = vmand %vm870_vm9, %vm3234_vm4  ;;  %v1965_v44 = vsel %vm3245_vm2, 1, %v1654_v2  ;;  %v1970_v45 = vsel %vm3244_vm5, 1, %v1654_v2  ;;  %v708_v0 = vsel %vm1901_vm15, 1, %v1654_v2  ;;  %v702_v1 = vsel %vm1909_vm13, 1, %v1654_v2  ;;  %v2099_v3 = vld [vmem:[%s3225_s3 + $0x28] sm:$0xff]  ;;  %s1401_s23 = scalar_lea.sflag [#allocation3], %s296_s19 }
  0x21   : > { %584 = vperm.xlu1 %1581, %v563_v18   ;;  %566 = vperm.xlu0 %1580, %v557_v19   ;;  %v1940_v40 = vsel %vm878_vm0, 1, %v1654_v2  ;;  %vm885_vm4 = vmand %vm3239_vm10, %vm3236_vm8  ;;  %vm3248_vm8 = vcmp.gt.s32.totalorder %v1921_v37, 0  ;;  %vm3384_vm13 = vcmp.lt.s32.totalorder %v1854_v22, 7  ;;  %s1592_s13 = scalar_lea.vmem %s1414_s26, 16  ;;  %s1598_s9 = scalar_lea.vmem %s1597_s18, 32 }
  0x22   : > { %v1956_v43 = vsel %vm885_vm4, 1, %v1654_v2  ;;  %vm884_vm0 = vmand %vm3238_vm14, %vm3237_vm1  ;;  %vm3243_vm4 = vcmp.gt.s32.totalorder %v1916_v36, 0  ;;  %vm3247_vm14 = vcmp.lt.s32.totalorder %v1916_v36, 7  ;;  %p1593_p11 = scmp.ne.s32.totalorder %s1414_s26, %s1592_s13  ;;  %p1600_p1 = scmp.lt.s32.totalorder %s1598_s9, %s1592_s13 }
  0x23   : > { %1519 = vmatpush3.bf16.msra.mxu0 %v1585_v14  ;;  %v1981_v47 = vsel %vm884_vm0, 1, %v1654_v2  ;;  %vm880_vm1 = vmand %vm3245_vm2, %vm3241_vm11  ;;  %vm3366_vm0 = vcmp.gt.s32.totalorder %v1859_v23, 0  ;;  %v2005_v50 = vsel %vm3247_vm14, 1, %v1654_v2 }
  0x24   : > { %v1995_v49 = vsel %vm880_vm1, 1, %v1654_v2  ;;  %vm879_vm10 = vmand %vm3244_vm5, %vm3366_vm0  ;;  %vm687_vm1 = vcmp.lt.s32.totalorder %v1859_v23, 7  ;;  %vm3246_vm0 = vcmp.lt.s32.totalorder %v1992_v48, 7  ;;  %p1594_p12 = pnand %p1593_p11, %p1739_p5  ;;  %p1601_p2 = por %p1600_p1, %p1599_p0 }
  0x25   : > { %478 = vperm.xlu1 %1581, %v306_v24   ;;  %587 = vperm.xlu0 %1580, %v564_v25   ;;  %vm2011_vm11 = vmand %vm540_vm7, %vm693_vm3  ;;  %v2017_v52 = vsel %vm879_vm10, 1, %v1654_v2  ;;  %v2036_v55 = vsel %vm3246_vm0, 1, %v1654_v2  ;;  %vm3371_vm10 = vcmp.gt.s32.totalorder %v1843_v20, 0  ;;  %vm3376_vm0 = vcmp.gt.s32.totalorder %v1854_v22, 0 }
  0x26   : > { %1521 = vmatmul.mubr.msk.bf16.vlgmr.msra.gmra.mxu0 %vm388_vm6, %v1587_v26  ;;  %vm2029_vm7 = vmand %vm3243_vm4, %vm3248_vm8  ;;  %v615_v57 = vsel %vm3371_vm10, 1, %v1654_v2  ;;  %p1595_p13 = pneg %p1594_p12 }
  0x27   : > { %1524 = vmatprep.mubr.msk.bf16.mxu0 %vm388_vm6, %v1588_v27  ;;  %vm998_vm4 = vmand %vm870_vm9, %vm3372_vm12  ;;  %vm3379_vm12 = vcmp.lt.s32.totalorder %v1823_v15, 7  ;;  %v560_v8 = vsel %vm2029_vm7, 1, %v1654_v2 }
  0x28   : > { %vm3373_vm5 = vmmov %vm3371_vm10  ;;  %v2065_v60 = vsel %vm998_vm4, 1, %v1654_v2  ;;  %vm3382_vm4 = vcmp.lt.s32.totalorder %v1916_v36, 7  ;;  %p1602_p3 = pnand %p1601_p2, %p1595_p13 }
  0x29   : > { %572 = vperm.xlu1 %1581, %v559_v28   ;;  %569 = vperm.xlu0 %1580, %v558_v29   ;;  %vm2060_vm14 = vmand %vm3376_vm0, %vm687_vm1  ;;  %vm3381_vm0 = vcmp.lt.s32.totalorder %v1780_v9, 7  ;;  %v709_v9 = vsel %vm2011_vm11, 1, %v1654_v2  ;;  %v821_v29 = vsel %vm693_vm3, 1, %v1654_v2 }
  0x2a   : > { %vm1005_vm9 = vmand %vm3379_vm12, %vm693_vm3  ;;  %v703_v18 = vsel %vm2060_vm14, 1, %v1654_v2  ;;  %vm537_vm14 = vcmp.gt.s32.totalorder %v1978_v46, 0  ;;  %vm3399_vm3 = vcmp.gt.s32.totalorder %v1921_v37, 0 }
  0x2b   : > { %v2077_v62 = vsel %vm1005_vm9, 1, %v1654_v2  ;;  %vm881_vm12 = vmand %vm3382_vm4, %vm3248_vm8  ;;  %vm3383_vm9 = vcmp.lt.s32.totalorder %v1843_v20, 7  ;;  %vm3385_vm4 = vcmp.lt.s32.totalorder %v1978_v46, 7 }
  0x2c   : > { %v2102_v4 = vsel %vm881_vm12, 1, %v1654_v2  ;;  %vm999_vm15 = vmand %vm3384_vm13, %vm687_vm1 }
  0x2d   : > { %640 = vperm.xlu1 %1581, %v619_v30   ;;  %622 = vperm.xlu0 %1580, %v613_v31   ;;  %v2118_v6 = vsel %vm999_vm15, 1, %v1654_v2  ;;  %vm691_vm15 = vcmp.lt.s32.totalorder %v2099_v3, 7  ;;  %v815_v31 = vsel %vm687_vm1, 1, %v1654_v2 }
  0x2e   : > { %1525 = vmatmul.mubr.msk.bf16.gmra.mxu0 %vm388_vm6, %v1589_v32  ;;  %vm688_vm6 = vcmp.lt.s32.totalorder %v1848_v21, 7  ;;  %v617_v32 = vsel %vm537_vm14, 1, %v1654_v2 }
  0x2f   : > { %vm2052_vm2 = vmand %vm3373_vm5, %vm688_vm6  ;;  %vm3380_vm5 = vcmp.lt.s32.totalorder %v1785_v10, 7 }
  0x30   : > { %vm1004_vm10 = vmand %vm3381_vm0, %vm3380_vm5  ;;  %vm545_vm0 = vcmp.gt.s32.totalorder %v2074_v61, 0  ;;  %v704_v17 = vsel %vm2052_vm2, 1, %v1654_v2  ;;  %vm3393_vm2 = vcmp.gt.s32.totalorder %v1828_v16, 0 }
  0x31   : > { %625 = vperm.xlu1 %1581, %v614_v42   ;;  %643 = vperm.xlu0 %1580, %v620_v33   ;;  %v2084_v63 = vsel %vm1004_vm10, 1, %v1654_v2  ;;  %vm1000_vm5 = vmand %vm3383_vm9, %vm688_vm6  ;;  %vm689_vm10 = vcmp.lt.s32.totalorder %v1921_v37, 7  ;;  %vm546_vm9 = vcmp.gt.s32.totalorder %v2099_v3, 0  ;;  %v765_v24 = vsel %vm3393_vm2, 1, %v1654_v2 }
  0x32   : > { %v2110_v5 = vsel %vm1000_vm5, 1, %v1654_v2  ;;  %vm882_vm12 = vmand %vm3385_vm4, %vm545_vm0  ;;  %vm3386_vm5 = vcmp.lt.s32.totalorder %v1916_v36, 7  ;;  %vm3387_vm4 = vcmp.lt.s32.totalorder %v1992_v48, 7  ;;  %vm3398_vm2 = vcmp.gt.s32.totalorder %v1916_v36, 0 }
  0x33   : > { %v2126_v7 = vsel %vm882_vm12, 1, %v1654_v2  ;;  %vm1001_vm13 = vmand %vm3386_vm5, %vm689_vm10  ;;  %vm690_vm5 = vcmp.lt.s32.totalorder %v2074_v61, 7  ;;  %v817_v34 = vsel %vm689_vm10, 1, %v1654_v2  ;;  %v763_v37 = vsel %vm546_vm9, 1, %v1654_v2 }
  0x34   : > { %v2140_v11 = vsel %vm1001_vm13, 1, %v1654_v2  ;;  %vm883_vm12 = vmand %vm3387_vm4, %vm546_vm9  ;;  %vm3389_vm13 = vcmp.lt.s32.totalorder %v1978_v46, 7 }
  0x35   : > { %483 = vperm.xlu1 %1581, %v307_v56   ;;  %628 = vperm.xlu0 %1580, %v615_v57   ;;  %v2148_v13 = vsel %vm883_vm12, 1, %v1654_v2  ;;  %vm3388_vm7 = vmmov %vm3387_vm4  ;;  %vm3390_vm4 = vcmp.gt.s32.totalorder %v1785_v10, 0  ;;  %vm3391_vm12 = vcmp.gt.s32.totalorder %v1797_v12, 0 }
  0x36   : > { %vm1003_vm11 = vmand %vm3388_vm7, %vm691_vm15  ;;  %v764_v19 = vsel %vm3390_vm4, 1, %v1654_v2  ;;  %v758_v20 = vsel %vm3391_vm12, 1, %v1654_v2  ;;  %vm3394_vm7 = vcmp.gt.s32.totalorder %v1848_v21, 0  ;;  %vm3396_vm4 = vcmp.lt.s32.totalorder %v1797_v12, 7 }
  0x37   : > { %v2155_v14 = vsel %vm1003_vm11, 1, %v1654_v2  ;;  %vm1002_vm8 = vmand %vm3389_vm13, %vm690_vm5  ;;  %v760_v25 = vsel %vm3394_vm7, 1, %v1654_v2  ;;  %vm3395_vm11 = vcmp.gt.s32.totalorder %v1859_v23, 0  ;;  %v814_v27 = vsel %vm3396_vm4, 1, %v1654_v2 }
  0x38   : > { %v2162_v15 = vsel %vm1002_vm8, 1, %v1654_v2  ;;  %vm3392_vm8 = vcmp.gt.s32.totalorder %v1916_v36, 0  ;;  %v759_v26 = vsel %vm3395_vm11, 1, %v1654_v2  ;;  %vm553_vm13 = vmand %vm537_vm14, %vm545_vm0  ;;  %vm538_vm12 = vcmp.gt.s32.totalorder %v1992_v48, 0 }
  0x39   : > { %729 = vperm.xlu1 %1581, %v708_v0   ;;  %711 = vperm.xlu0 %1580, %v702_v1   ;;  %v616_v22 = vsel %vm3392_vm8, 1, %v1654_v2  ;;  %v561_v28 = vsel %vm553_vm13, 1, %v1654_v2  ;;  %vm3397_vm8 = vcmp.lt.s32.totalorder %v1785_v10, 7  ;;  %vm697_vm7 = vmand %vm3398_vm2, %vm689_vm10  ;;  %v816_v10 = vsel %vm688_vm6, 1, %v1654_v2 }
  0x3a   : > { %v820_v30 = vsel %vm3397_vm8, 1, %v1654_v2  ;;  %vm554_vm11 = vmand %vm538_vm12, %vm546_vm9  ;;  %v705_v12 = vsel %vm697_vm7, 1, %v1654_v2  ;;  %v761_v21 = vsel %vm3399_vm3, 1, %v1654_v2  ;;  %v618_v23 = vsel %vm538_vm12, 1, %v1654_v2 }
  0x3b   : > { %v562_v16 = vsel %vm554_vm11, 1, %v1654_v2  ;;  %vm698_vm6 = vmand %vm537_vm14, %vm690_vm5  ;;  %v762_v36 = vsel %vm545_vm0, 1, %v1654_v2 }
  0x3c   : > { %v706_v33 = vsel %vm698_vm6, 1, %v1654_v2  ;;  %vm699_vm1 = vmand %vm538_vm12, %vm691_vm15 }
  0x3d   : > { %575 = vperm.xlu1 %1581, %v560_v8   ;;  %732 = vperm.xlu0 %1580, %v709_v9   ;;  %v707_v35 = vsel %vm699_vm1, 1, %v1654_v2 }
  0x41   : > { %717 = vperm.xlu1 %1581, %v704_v17   ;;  %714 = vperm.xlu0 %1580, %v703_v18  }
  0x45   : > { %785 = vperm.xlu1 %1581, %v764_v19   ;;  %767 = vperm.xlu0 %1580, %v758_v20  }
  0x49   : > { %631 = vperm.xlu1 %1581, %v616_v22   ;;  %788 = vperm.xlu0 %1580, %v765_v24  }
  0x4d   : > { %773 = vperm.xlu1 %1581, %v760_v25   ;;  %770 = vperm.xlu0 %1580, %v759_v26   ;;  %v522_v25 = vlaneseq }
  0x51   : > { %823 = vperm.xlu1 %1581, %v814_v27   ;;  %578 = vperm.xlu0 %1580, %v561_v28  }
  0x55   : > { %844 = vperm.xlu1 %1581, %v821_v29   ;;  %841 = vperm.xlu0 %1580, %v820_v30   ;;  %v2372_v29 = vshrl.u32 %v522_v25, 7 }
  0x57   : > { %vm524_vm10 = vcmp.lt.s32.totalorder %v2372_v29, 1  ;;  %vm677_vm9 = vcmp.lt.s32.totalorder %v2372_v29, 7 }
  0x59   : > { %720 = vperm.xlu1 %1581, %v705_v12   ;;  %581 = vperm.xlu0 %1580, %v562_v16  }
  0x5d   : > { %829 = vperm.xlu1 %1581, %v816_v10   ;;  %826 = vperm.xlu0 %1580, %v815_v31  }
  0x61   : > { %895 = vperm.xlu1 %1581, %v1940_v40   ;;  %634 = vperm.xlu0 %1580, %v617_v32  }
  0x65   : > { %916 = vperm.xlu1 %1581, %v1956_v43   ;;  %913 = vperm.xlu0 %1580, %v1981_v47  }
  0x69   : > { %776 = vperm.xlu1 %1581, %v761_v21   ;;  %637 = vperm.xlu0 %1580, %v618_v23  }
  0x6d   : > { %901 = vperm.xlu1 %1581, %v1995_v49   ;;  %898 = vperm.xlu0 %1580, %v2017_v52  }
  0x71   : > { %951 = vperm.xlu1 %1581, %v1931_v38   ;;  %723 = vperm.xlu0 %1580, %v706_v33   ;;  %v819_v38 = vsel %vm691_vm15, 1, %v1654_v2 }
  0x75   : > { %972 = vperm.xlu1 %1581, %v1936_v39   ;;  %969 = vperm.xlu0 %1580, %v1950_v41   ;;  %v818_v39 = vsel %vm690_vm5, 1, %v1654_v2 }
  0x79   : > { %832 = vperm.xlu1 %1581, %v817_v34   ;;  %726 = vperm.xlu0 %1580, %v707_v35  }
  0x7d   : > { %957 = vperm.xlu1 %1581, %v1965_v44   ;;  %954 = vperm.xlu0 %1580, %v1970_v45  }
  0x81   : > { %1015 = vperm.xlu1 %1581, %v2065_v60   ;;  %779 = vperm.xlu0 %1580, %v762_v36  }
  0x85   : > { %1036 = vperm.xlu1 %1581, %v2077_v62   ;;  %1033 = vperm.xlu0 %1580, %v2084_v63  }
  0x89   : > { %904 = vperm.xlu1 %1581, %v2102_v4   ;;  %782 = vperm.xlu0 %1580, %v763_v37  }
  0x8d   : > { %1021 = vperm.xlu1 %1581, %v2110_v5   ;;  %1018 = vperm.xlu0 %1580, %v2118_v6  }
  0x90   : > { %v2270_v40 = vpop.permute.xlu1 %498  ;;  %v2272_v41 = vpop.permute.xlu0 %488 }
  0x91   : > { %3400 = vst [vmem:[#allocation5_spill] sm:$0xff] %v2270_v40  ;;  %3401 = vst [vmem:[#allocation6_spill] sm:$0xff] %v2272_v41  ;;  %838 = vperm.xlu1 %1581, %v819_v38   ;;  %835 = vperm.xlu0 %1580, %v818_v39  }
  0x94   : > { %v2274_v42 = vpop.permute.xlu1 %503  ;;  %v2276_v43 = vpop.permute.xlu0 %493 }
  0x95   : > { %3402 = vst [vmem:[#allocation7_spill] sm:$0xff] %v2274_v42  ;;  %3403 = vst [vmem:[#allocation8_spill] sm:$0xff] %v2276_v43  ;;  %907 = vperm.xlu1 %1581, %v2126_v7   ;;  %960 = vperm.xlu0 %1580, %v2005_v50  }
  0x98   : > { %v2280_v44 = vpop.permute.xlu1 %473  ;;  %v2282_v45 = vpop.permute.xlu0 %468 }
  0x99   : > { %3404 = vst [vmem:[#allocation9_spill] sm:$0xff] %v2280_v44  ;;  %3405 = vst [vmem:[#allocation10_spill] sm:$0xff] %v2282_v45  ;;  %1024 = vperm.xlu1 %1581, %v2140_v11   ;;  %910 = vperm.xlu0 %1580, %v2148_v13   ;;  %v1590_v11 = vld [vmem:[%s3228_s6 + $0x8] sm:$0xff]   ;;  %v1591_v13 = vld [vmem:[%s3228_s6] sm:$0xff]  }
  0x9a   : > { %1528 = vmatprep.subr.bf16.mxu1 %v1590_v11 }
  0x9b   : > { %1529 = vmatpush3.bf16.msra.mxu1 %v1590_v11 }
  0x9c   : > { %v2286_v2 = vpop.permute.xlu1 %584  ;;  %v2288_v46 = vpop.permute.xlu0 %566  ;;  %1530 = vmatprep.subr.bf16.mxu1 %v1591_v13 }
  0x9d   : > { %3406 = vst [vmem:[#allocation11_spill] sm:$0xff] %v2288_v46  ;;  %966 = vperm.xlu1 %1581, %v2036_v55   ;;  %963 = vperm.xlu0 %1580, %v2023_v53   ;;  %vm3291_vm11 = vcmp.eq.s32.totalorder %v2288_v46, 1 }
  0x9f   : > { %1531 = vmatpush3.bf16.msra.mxu1 %v1591_v13 }
  0xa0   : > { %v2292_v47 = vpop.permute.xlu1 %478  ;;  %v2294_v48 = vpop.permute.xlu0 %587 }
  0xa1   : > { %3407 = vst [vmem:[#allocation12_spill] sm:$0xff] %v2292_v47  ;;  %1030 = vperm.xlu1 %1581, %v2155_v14   ;;  %1027 = vperm.xlu0 %1580, %v2162_v15  }
  0xa4   : > { %v2298_v49 = vpop.permute.xlu1 %572  ;;  %v2300_v50 = vpop.permute.xlu0 %569 }
  0xa5   : > { %3408 = vst [vmem:[#allocation13_spill] sm:$0xff] %v2298_v49  ;;  %vm3279_vm0 = vcmp.eq.s32.totalorder %v2298_v49, 1 }
  0xa8   : > { %v2302_v51 = vpop.permute.xlu1 %640  ;;  %v2304_v52 = vpop.permute.xlu0 %622 }
  0xa9   : > { %3409 = vst [vmem:[#allocation14_spill] sm:$0xff] %v2302_v51  ;;  %3410 = vst [vmem:[#allocation15_spill] sm:$0xff] %v2304_v52  ;;  %vm3289_vm2 = vcmp.eq.s32.totalorder %v2304_v52, 1  ;;  %vm3296_vm3 = vcmp.eq.s32.totalorder %v2302_v51, 1 }
  0xac   : > { %v2306_v54 = vpop.permute.xlu1 %625  ;;  %v2308_v55 = vpop.permute.xlu0 %643 }
  0xad   : > { %3411 = vst [vmem:[#allocation16_spill] sm:$0xff] %v2306_v54  ;;  %3412 = vst [vmem:[#allocation17_spill] sm:$0xff] %v2308_v55  ;;  %vm3265_vm15 = vcmp.eq.s32.totalorder %v2306_v54, 1  ;;  %vm3280_vm5 = vcmp.eq.s32.totalorder %v2308_v55, 1 }
  0xb0   : > { %v2310_v53 = vpop.permute.xlu1 %483  ;;  %v2312_v56 = vpop.permute.xlu0 %628 }
  0xb1   : > { %3413 = vst [vmem:[#allocation18_spill] sm:$0xff] %v2310_v53  ;;  %3414 = vst [vmem:[#allocation19_spill] sm:$0xff] %v2312_v56  ;;  %vm3264_vm14 = vcmp.eq.s32.totalorder %v2312_v56, 1 }
  0xb4   : > { %v2314_v57 = vpop.permute.xlu1 %729  ;;  %v2316_v58 = vpop.permute.xlu0 %711 }
  0xb8   : > { %v2318_v59 = vpop.permute.xlu1 %575  ;;  %v2320_v60 = vpop.permute.xlu0 %732 }
  0xb9   : > { %3415 = vst [vmem:[#allocation20_spill] sm:$0xff] %v2318_v59  ;;  %vm3275_vm13 = vcmp.eq.s32.totalorder %v2318_v59, 1 }
  0xbc   : > { %v2322_v61 = vpop.permute.xlu1 %717  ;;  %v2324_v62 = vpop.permute.xlu0 %714 }
  0xbd   : > { %3416 = vst [vmem:[#allocation21_spill] sm:$0xff] %v2322_v61  ;;  %vm3297_vm6 = vcmp.eq.s32.totalorder %v2322_v61, 1 }
  0xc0   : > { %v2326_v63 = vpop.permute.xlu1 %785  ;;  %v2328_v0 = vpop.permute.xlu0 %767 }
  0xc4   : > { %v2330_v1 = vpop.permute.xlu1 %631  ;;  %v2332_v3 = vpop.permute.xlu0 %788 }
  0xc5   : > { %3417 = vst [vmem:[#allocation22_spill] sm:$0xff] %v2330_v1  ;;  %vm3258_vm4 = vcmp.eq.s32.totalorder %v2330_v1, 1 }
  0xc8   : > { %v2334_v4 = vpop.permute.xlu1 %773  ;;  %v2336_v5 = vpop.permute.xlu0 %770 }
  0xc9   : > { %3418 = vst [vmem:[#allocation23_spill] sm:$0xff] %v2334_v4  ;;  %3419 = vst [vmem:[#allocation24_spill] sm:$0xff] %v2336_v5 }
  0xcc   : > { %v2338_v6 = vpop.permute.xlu1 %823  ;;  %v2340_v7 = vpop.permute.xlu0 %578 }
  0xcd   : > { %3420 = vst [vmem:[#allocation25_spill] sm:$0xff] %v2338_v6 }
  0xd0   : > { %v2342_v8 = vpop.permute.xlu1 %844  ;;  %v2344_v9 = vpop.permute.xlu0 %841 }
  0xd4   : > { %v2352_v14 = vpop.permute.xlu1 %720  ;;  %v2354_v15 = vpop.permute.xlu0 %581 }
  0xd5   : > { %3421 = vst [vmem:[#allocation26_spill] sm:$0xff] %v2352_v14  ;;  %vm3283_vm12 = vcmp.eq.s32.totalorder %v2352_v14, 1 }
  0xd8   : > { %v2356_v17 = vpop.permute.xlu1 %829  ;;  %v2358_v18 = vpop.permute.xlu0 %826 }
  0xd9   : > { %3422 = vst [vmem:[#allocation27_spill] sm:$0xff] %v2356_v17  ;;  %3423 = vst [vmem:[#allocation28_spill] sm:$0xff] %v2358_v18 }
  0xdc   : > { %v2360_v19 = vpop.permute.xlu1 %895  ;;  %v2362_v20 = vpop.permute.xlu0 %634 }
  0xdd   : > { %3424 = vst [vmem:[#allocation29_spill] sm:$0xff] %v2360_v19  ;;  %3425 = vst [vmem:[#allocation30_spill] sm:$0xff] %v2362_v20  ;;  %vm3271_vm8 = vcmp.eq.s32.totalorder %v2362_v20, 1 }
  0xe0   : > { %v2364_v22 = vpop.permute.xlu1 %916  ;;  %v2366_v24 = vpop.permute.xlu0 %913 }
  0xe4   : > { %v2368_v26 = vpop.permute.xlu1 %776  ;;  %v2370_v27 = vpop.permute.xlu0 %637 }
  0xe5   : > { %3426 = vst [vmem:[#allocation31_spill] sm:$0xff] %v2368_v26  ;;  %3427 = vst [vmem:[#allocation32_spill] sm:$0xff] %v2370_v27  ;;  %vm3282_vm7 = vcmp.eq.s32.totalorder %v2368_v26, 1 }
  0xe6   : > { %v1522_v28 = vpop.f32.mrf.mxu0 }
  0xe7   : > { %v2380_v10 = vmul.f32 %v1522_v28, %v2292_v47 }
  0xe8   : > { %v2374_v30 = vpop.permute.xlu1 %901  ;;  %v2376_v12 = vpop.permute.xlu0 %898 }
  0xe9   : > { %3428 = vst [vmem:[#allocation33_spill] sm:$0xff] %v2374_v30  ;;  %3429 = vst [vmem:[#allocation34_spill] sm:$0xff] %v2376_v12  ;;  %v435_v16 = vpop.f32.mrf.mxu0  ;;  %v671_v38 = vrot.slane %v2380_v10, 1  ;;  %v516_v11 = vrot.slane %v2380_v10, 7  ;;  %v656_v13 = vsel %vm3258_vm4, %v2380_v10, 0.0  ;;  %vm3298_vm4 = vcmp.eq.s32.totalorder %v2286_v2, 1 }
  0xea   : > { %v2387_v32 = vmul.f32 %v2282_v45, %v435_v16 }
  0xeb   : > { %v1523_v31 = vpop.f32.mrf.mxu0 }
  0xec   : > { %v2390_v21 = vmul.f32 %v1523_v31, %v2310_v53  ;;  %v2392_v23 = vpop.permute.xlu1 %951  ;;  %v2394_v33 = vpop.permute.xlu0 %723  ;;  %v514_v25 = vrot.slane %v2387_v32, 7  ;;  %v2418_v28 = vsel %vm3265_vm15, %v2387_v32, 0.0  ;;  %vm3301_vm15 = vcmp.eq.s32.totalorder %v2356_v17, 1 }
  0xed   : > { %3430 = vst [vmem:[#allocation35_spill] sm:$0xff] %v2392_v23  ;;  %3431 = vst [vmem:[#allocation36_spill] sm:$0xff] %v2394_v33  ;;  %v438_v34 = vpop.f32.mrf.mxu0 }
  0xee   : > { %v2402_v35 = vmul.f32 %v2280_v44, %v438_v34  ;;  %v672_v37 = vrot.slane %v2390_v21, 1  ;;  %v3435_v1 = vrot.slane %v2390_v21, 7 }
  0xef   : > { %v1526_v39 = vpop.f32.mrf.mxu0 }
  0xf0   : > { %v515_v16 = vrot.slane %v2402_v35, 7  ;;  %v2422_v31 = vmul.f32 %v1526_v39, %v2270_v40  ;;  %v2424_v34 = vpop.permute.xlu1 %972  ;;  %v2426_v36 = vpop.permute.xlu0 %969  ;;  %v655_v53 = vsel %vm3264_vm14, %v2402_v35, 0.0  ;;  %v2437_v39 = vsel %vm3271_vm8, %v2390_v21, 0.0 }
  0xf1   : > { %3432 = vst [vmem:[#allocation37_spill] sm:$0xff] %v2424_v34  ;;  %3433 = vst [vmem:[#allocation38_spill] sm:$0xff] %v2426_v36  ;;  %v451_v44 = vpop.f32.mrf.mxu0  ;;  %vm3278_vm1 = vcmp.eq.s32.totalorder %v2424_v34, 1  ;;  %v2449_v56 = vsel %vm524_vm10, %v516_v11, %v3435_v1  ;;  %v2453_v54 = vsel %vm677_vm9, %v671_v38, %v672_v37  ;;  %vm3302_vm14 = vcmp.eq.s32.totalorder %v2334_v4, 1 }
  0xf2   : > { %3434 = vst [vmem:[#allocation39_spill] sm:$0xff] %v2437_v39  ;;  %v2442_v40 = vsel %vm524_vm10, %v514_v25, %v515_v16  ;;  %v520_v20 = vrot.slane %v2422_v31, 7  ;;  %v2460_v47 = vsel %vm3280_vm5, %v2422_v31, 0.0  ;;  %v2463_v45 = vmul.f32 %v2272_v41, %v451_v44 }
  0xf3   : > { %3436 = vst [vmem:[#allocation40_spill] sm:$0xff] %v2460_v47  ;;  %v1527_v39 = vpop.f32.mrf.mxu0  ;;  %v2467_v1 = vsel %vm524_vm10, %v515_v16, %v516_v11  ;;  %v599_v11 = vsel %vm3279_vm0, %v2442_v40, 0.0  ;;  %vm3303_vm8 = vcmp.eq.s32.totalorder %v2300_v50, 1  ;;  %v2489_v16 = vsel %vm3278_vm1, %v2387_v32, 0.0 }
  0xf4   : > { %v2473_v36 = vmul.f32 %v1527_v39, %v2274_v42  ;;  %v2475_v55 = vpop.permute.xlu1 %832  ;;  %v600_v44 = vsel %vm3275_vm13, %v2467_v1, 0.0  ;;  %v2480_v41 = vpop.permute.xlu0 %726  ;;  %3439 = vst [vmem:[#allocation43_spill] sm:$0xff] %v2489_v16  ;;  %v3285_v27 = vrot.slane %v2463_v45, 1  ;;  %v745_v59 = vsel %vm3283_vm12, %v2453_v54, 0.0 }
  0xf5   : > { %3437 = vst [vmem:[#allocation41_spill] sm:$0xff] %v2475_v55  ;;  %3438 = vst [vmem:[#allocation42_spill] sm:$0xff] %v2480_v41  ;;  %v608_v39 = vadd.f32 %v600_v44, %v2390_v21  ;;  %v454_v42 = vpop.f32.mrf.mxu0  ;;  %vm3304_vm13 = vcmp.eq.s32.totalorder %v2374_v30, 1  ;;  %v801_v34 = vsel %vm3282_vm7, %v2449_v56, 0.0  ;;  %vm3294_vm1 = vcmp.eq.s32.totalorder %v2475_v55, 1 }
  0xf6   : > { %v521_v47 = vrot.slane %v2473_v36, 7  ;;  %vm3309_vm0 = vcmp.eq.s32.totalorder %v2324_v62, 1  ;;  %v2509_v14 = vsel %vm677_vm9, %v672_v37, %v3285_v27  ;;  %v2512_v49 = vmul.f32 %v2276_v43, %v454_v42 }
  0xf7   : > { %v664_v44 = vadd.f32 %v656_v13, %v608_v39  ;;  %v607_v16 = vadd.f32 %v599_v11, %v2380_v10  ;;  %v653_v13 = vsel %vm3289_vm2, %v2473_v36, 0.0  ;;  %v3441_v42 = vrot.slane %v2402_v35, 1 }
  0xf8   : > { %v2519_v26 = vsel %vm524_vm10, %v520_v20, %v521_v47  ;;  %v2525_v39 = vpop.permute.xlu1 %957  ;;  %v2533_v27 = vpop.permute.xlu0 %954  ;;  %vm734_vm12 = vcmp.eq.s32.totalorder %v2316_v58, 1  ;;  %vm3311_vm7 = vcmp.eq.s32.totalorder %v2328_v0, 1  ;;  %v2540_v43 = vsel %vm524_vm10, %v521_v47, %v514_v25 }
  0xf9   : > { %3440 = vst [vmem:[#allocation44_spill] sm:$0xff] %v2525_v39  ;;  %v2531_v11 = vsel %vm677_vm9, %v3441_v42, %v671_v38  ;;  %3442 = vst [vmem:[#allocation45_spill] sm:$0xff] %v2533_v27  ;;  %v597_v37 = vsel %vm3291_vm11, %v2519_v26, 0.0  ;;  %v753_v52 = vadd.f32 %v745_v59, %v664_v44  ;;  %v519_v38 = vrot.slane %v2512_v49, 7 }
  0xfa   : > { %vm3316_vm2 = vcmp.eq.s32.totalorder %v2338_v6, 1  ;;  %v605_v42 = vadd.f32 %v597_v37, %v2387_v32  ;;  %v857_v41 = vsel %vm3294_vm1, %v2509_v14, 0.0  ;;  %v659_v47 = vsel %vm3296_vm3, %v2512_v49, 0.0 }
  0xfb   : > { %v663_v25 = vadd.f32 %v655_v53, %v607_v16  ;;  %vm3318_vm5 = vcmp.eq.s32.totalorder %v2340_v7, 1  ;;  %vm3314_vm11 = vcmp.eq.s32.totalorder %v2360_v19, 1  ;;  %v809_v59 = vadd.f32 %v801_v34, %v753_v52 }
  0xfc   : > { %v3443_v44 = vrot.slane %v2463_v45, 7  ;;  %v744_v55 = vsel %vm3297_vm6, %v2531_v11, 0.0  ;;  %vm3320_vm1 = vcmp.eq.s32.totalorder %v2354_v15, 1  ;;  %v661_v53 = vadd.f32 %v653_v13, %v605_v42  ;;  %v2576_v51 = vpop.permute.xlu0 %779 }
  0xfd   : > { %v2569_v16 = vsel %vm524_vm10, %v519_v38, %v520_v20  ;;  %v752_v34 = vadd.f32 %v744_v55, %v663_v25  ;;  %3445 = vst [vmem:[#allocation47_spill] sm:$0xff] %v2576_v51  ;;  %vm596_vm3 = vcmp.eq.s32.totalorder %v2294_v48, 1  ;;  %v800_v13 = vsel %vm3302_vm14, %v2467_v1, 0.0 }
  0xfe   : > { %v2560_v46 = vsel %vm524_vm10, %v3443_v44, %v519_v38  ;;  %v2574_v44 = vpop.permute.xlu1 %1015  ;;  %v856_v20 = vsel %vm3301_vm15, %v2453_v54, 0.0  ;;  %vm3305_vm6 = vcmp.eq.s32.totalorder %v2525_v39, 1  ;;  %v2588_v55 = vadd.f32 %v857_v41, %v809_v59 }
  0xff   : > { %v603_v52 = vsel %vm3298_vm4, %v2560_v46, 0.0  ;;  %3444 = vst [vmem:[#allocation46_spill] sm:$0xff] %v2574_v44  ;;  %vm3339_vm4 = vcmp.eq.s32.totalorder %v2394_v33, 1  ;;  %v808_v38 = vadd.f32 %v800_v13, %v752_v34  ;;  %v598_v42 = vsel %vm3303_vm8, %v2540_v43, 0.0 }
 0x100   : > { %v611_v37 = vadd.f32 %v603_v52, %v2422_v31  ;;  %v3446_v25 = vrot.slane %v2402_v35, 1  ;;  %v3447_v52 = vrot.slane %v2387_v32, 1  ;;  %v928_v41 = vsel %vm3304_vm13, %v2449_v56, 0.0 }
 0x101   : > { %v984_v59 = vsel %vm3305_vm6, %v2390_v21, 0.0  ;;  %v606_v34 = vadd.f32 %v598_v42, %v2402_v35  ;;  %vm797_vm15 = vcmp.eq.s32.totalorder %v2332_v3, 1  ;;  %v864_v13 = vadd.f32 %v856_v20, %v808_v38 }
 0x102   : > { %v2599_v4 = vsel %vm677_vm9, %v3447_v52, %v3446_v25  ;;  %v2601_v17 = vadd.f32 %v659_v47, %v611_v37  ;;  %vm3448_vm8 = vcmp.eq.s32.totalorder %v2336_v5, 1  ;;  %vm3310_vm13 = vcmp.eq.s32.totalorder %v2533_v27, 1  ;;  %v2619_v25 = vpop.permute.xlu1 %1036  ;;  %v2621_v52 = vpop.permute.xlu0 %1033 }
 0x103   : > { %v743_v47 = vsel %vm3309_vm0, %v2599_v4, 0.0  ;;  %v799_v37 = vsel %vm3448_vm8, %v2442_v40, 0.0  ;;  %3449 = vst [vmem:[#allocation48_spill] sm:$0xff] %v2619_v25  ;;  %3450 = vst [vmem:[#allocation49_spill] sm:$0xff] %v2621_v52  ;;  %v662_v42 = vadd.f32 %v2418_v28, %v606_v34  ;;  %vm3451_vm6 = vcmp.eq.s32.totalorder %v2358_v18, 1 }
 0x104   : > { %v855_v20 = vsel %vm3451_vm6, %v2531_v11, 0.0  ;;  %vm3452_vm14 = vcmp.eq.s32.totalorder %v2376_v12, 1  ;;  %v3453_v39 = vrot.slane %v2387_v32, 1  ;;  %v3454_v30 = vrot.slane %v2473_v36, 1 }
 0x105   : > { %v927_v38 = vsel %vm3452_vm14, %v2467_v1, 0.0  ;;  %vm741_vm8 = vcmp.eq.s32.totalorder %v2320_v60, 1  ;;  %v936_v28 = vadd.f32 %v928_v41, %v864_v13  ;;  %v983_v34 = vsel %vm3310_vm13, %v2380_v10, 0.0 }
 0x106   : > { %v2636_v5 = vsel %vm677_vm9, %v3454_v30, %v3453_v39  ;;  %v798_v32 = vsel %vm3311_vm7, %v2540_v43, 0.0  ;;  %vm740_vm14 = vcmp.eq.s32.totalorder %v2314_v57, 1  ;;  %v751_v30 = vadd.f32 %v743_v47, %v662_v42  ;;  %v2673_v27 = vpop.permute.xlu1 %904  ;;  %v2675_v12 = vpop.permute.xlu0 %782 }
 0x107   : > { %v742_v1 = vsel %vm734_vm12, %v2636_v5, 0.0  ;;  %v854_v41 = vsel %vm3316_vm2, %v2599_v4, 0.0  ;;  %vm3323_vm6 = vcmp.eq.s32.totalorder %v2574_v44, 1  ;;  %vm796_vm13 = vcmp.eq.s32.totalorder %v2326_v63, 1 }
 0x108   : > { %v750_v39 = vadd.f32 %v742_v1, %v661_v53  ;;  %vm852_vm0 = vcmp.eq.s32.totalorder %v2344_v9, 1  ;;  %v926_v10 = vsel %vm3314_vm11, %v2442_v40, 0.0  ;;  %vm3455_vm7 = vcmp.eq.s32.totalorder %v2392_v23, 1  ;;  %v3458_v40 = vld [vmem:[#allocation38_spill] sm:$0xff] }
 0x109   : > { %v982_v13 = vsel %vm3455_vm7, %v2402_v35, 0.0  ;;  %v3456_v53 = vrot.slane %v2463_v45, 7  ;;  %v3457_v47 = vrot.slane %v2390_v21, 7  ;;  %v601_v1 = vsel %vm3318_vm5, %v2449_v56, 0.0 }
 0x10a   : > { %vm924_vm11 = vcmp.eq.s32.totalorder %v2366_v24, 1  ;;  %vm3330_vm7 = vcmp.eq.s32.totalorder %v3458_v40, 1  ;;  %v807_v35 = vadd.f32 %v799_v37, %v751_v30  ;;  %v806_v23 = vadd.f32 %v798_v32, %v750_v39  ;;  %v3460_v39 = vld [vmem:[#allocation39_spill] sm:$0xff] }
 0x10b   : > { %v2668_v42 = vsel %vm524_vm10, %v3457_v47, %v3456_v53  ;;  %v609_v53 = vadd.f32 %v601_v1, %v2463_v45  ;;  %v3459_v47 = vld [vmem:[#allocation32_spill] sm:$0xff]  ;;  %v2684_v19 = vadd.f32 %v984_v59, %v936_v28  ;;  %v1046_v56 = vsel %vm3323_vm6, %v2531_v11, 0.0  ;;  %v3461_v59 = vld [vmem:[#allocation42_spill] sm:$0xff] }
 0x10c   : > { %v602_v21 = vsel %vm3320_vm1, %v2668_v42, 0.0  ;;  %vm650_vm2 = vcmp.eq.s32.totalorder %v3459_v47, 1  ;;  %vm3327_vm5 = vcmp.eq.s32.totalorder %v2576_v51, 1  ;;  %v604_v37 = vsel %vm596_vm3, %v2569_v16, 0.0  ;;  %v3466_v51 = vld [vmem:[#allocation40_spill] sm:$0xff] }
 0x10d   : > { %v863_v32 = vadd.f32 %v855_v20, %v807_v35  ;;  %v862_v30 = vadd.f32 %v854_v41, %v806_v23  ;;  %v665_v18 = vadd.f32 %v3460_v39, %v609_v53  ;;  %v746_v1 = vsel %vm3339_vm4, %v2509_v14, 0.0  ;;  %v2711_v41 = vpop.permute.xlu1 %1021  ;;  %v2713_v35 = vpop.permute.xlu0 %1018 }
 0x10e   : > { %vm3332_vm1 = vcmp.eq.s32.totalorder %v3461_v59, 1  ;;  %v610_v28 = vadd.f32 %v602_v21, %v2512_v49  ;;  %v802_v11 = vsel %vm3327_vm5, %v2668_v42, 0.0  ;;  %v612_v44 = vadd.f32 %v604_v37, %v2473_v36  ;;  %3464 = vst [vmem:[#allocation32_spill] sm:$0xff] %v2711_v41 }
 0x10f   : > { %v3462_v6 = vrot.slane %v2473_v36, 1  ;;  %v3463_v23 = vrot.slane %v2422_v31, 1  ;;  %v935_v53 = vadd.f32 %v927_v38, %v863_v32  ;;  %v934_v21 = vadd.f32 %v926_v10, %v862_v30 }
 0x110   : > { %v805_v39 = vsel %vm797_vm15, %v2519_v26, 0.0  ;;  %vm3465_vm6 = vcmp.eq.s32.totalorder %v2342_v8, 1  ;;  %v754_v61 = vadd.f32 %v746_v1, %v665_v18  ;;  %v668_v33 = vadd.f32 %v3466_v51, %v612_v44 }
 0x111   : > { %v2709_v20 = vsel %vm677_vm9, %v3463_v23, %v3462_v6  ;;  %v861_v37 = vsel %vm3465_vm6, %v2636_v5, 0.0  ;;  %vm3328_vm5 = vcmp.eq.s32.totalorder %v2619_v25, 1  ;;  %v3467_v6 = vmov %v3463_v23 }
 0x112   : > { %v3468_v23 = vrot.slane %v2512_v49, 1  ;;  %v991_v10 = vadd.f32 %v983_v34, %v935_v53  ;;  %v990_v32 = vadd.f32 %v982_v13, %v934_v21  ;;  %v749_v30 = vsel %vm741_vm8, %v2709_v20, 0.0  ;;  %v2745_v13 = vpop.permute.xlu1 %838  ;;  %v2747_v53 = vpop.permute.xlu0 %835 }
 0x113   : > { %vm3469_vm6 = vcmp.eq.s32.totalorder %v2364_v22, 1  ;;  %v2737_v18 = vadd.f32 %v802_v11, %v754_v61  ;;  %v757_v44 = vadd.f32 %v749_v30, %v668_v33  ;;  %v1053_v1 = vsel %vm3328_vm5, %v2599_v4, 0.0  ;;  %v2759_v4 = vld [vmem:[%s3227_s5] ss:$0 sm:$0xff]  ;;  %v3470_v11 = vld [vmem:[#allocation10_spill] sm:$0xff] }
 0x114   : > { %v2729_v38 = vsel %vm677_vm9, %v3468_v23, %v3467_v6  ;;  %v933_v51 = vsel %vm3469_vm6, %v2540_v43, 0.0  ;;  %v1054_v21 = vadd.f32 %v1046_v56, %v990_v32  ;;  %v804_v43 = vsel %vm796_vm13, %v2569_v16, 0.0 }
 0x115   : > { %v748_v34 = vsel %vm740_vm14, %v2729_v38, 0.0  ;;  %v860_v61 = vsel %vm852_vm0, %v2709_v20, 0.0  ;;  %v813_v33 = vadd.f32 %v805_v39, %v757_v44  ;;  %v932_v56 = vsel %vm924_vm11, %v2519_v26, 0.0 }
 0x116   : > { %v756_v6 = vadd.f32 %v748_v34, %v2601_v17  ;;  %v988_v17 = vsel %vm3330_vm7, %v2473_v36, 0.0  ;;  %vm3331_vm6 = vcmp.eq.s32.totalorder %v2621_v52, 1  ;;  %v1062_v23 = vmul.f32 %v1054_v21, %v3470_v11  ;;  %v3478_v52 = vld [vmem:[#allocation9_spill] sm:$0xff] }
 0x117   : > { %vm3334_vm5 = vcmp.eq.s32.totalorder %v2673_v27, 1  ;;  %v658_v30 = vsel %vm650_vm2, %v2463_v45, 0.0  ;;  %v869_v39 = vadd.f32 %v861_v37, %v813_v33  ;;  %v1052_v26 = vsel %vm3331_vm6, %v2636_v5, 0.0 }
 0x118   : > { %v812_v32 = vadd.f32 %v804_v43, %v756_v6  ;;  %v666_v44 = vadd.f32 %v658_v30, %v610_v28  ;;  %v3471_v34 = vrot.slane %v2512_v49, 1  ;;  %v3472_v36 = vrot.slane %v2463_v45, 1  ;;  %v2782_v6 = vpop.permute.xlu1 %907  ;;  %v2792_v30 = vpop.permute.xlu0 %960 }
 0x119   : > { %v1077_v43 = vadd.f32 %v2759_v4, %v1062_v23  ;;  %vm3337_vm7 = vcmp.eq.s32.totalorder %v2675_v12, 1  ;;  %v941_v33 = vadd.f32 %v933_v51, %v869_v39  ;;  %v929_v5 = vsel %vm3334_vm5, %v2668_v42, 0.0  ;;  %3473 = vst [vmem:[#allocation39_spill] sm:$0xff] %v2792_v30  ;;  %v3474_v23 = vld [vmem:[#allocation43_spill] sm:$0xff] }
 0x11a   : > { %v680_v21 = vsel %vm677_vm9, %v3472_v36, %v3471_v34  ;;  %v868_v25 = vadd.f32 %v860_v61, %v812_v32  ;;  %vm3333_vm6 = vcmp.eq.s32.totalorder %v2711_v41, 1  ;;  %v803_v51 = vsel %vm3337_vm7, %v2560_v46, 0.0 }
 0x11b   : > { %v747_v37 = vsel %vm3332_vm1, %v680_v21, 0.0  ;;  %v1085_v34 = vmax.f32 %v1077_v43, 0.0  ;;  %v1048_v61 = vsel %vm3333_vm6, %v2509_v14, 0.0  ;;  %vm3336_vm1 = vcmp.eq.s32.totalorder %v2713_v35, 1 }
 0x11c   : > { %v755_v28 = vadd.f32 %v747_v37, %v666_v44  ;;  %v940_v36 = vadd.f32 %v932_v56, %v868_v25  ;;  %v997_v32 = vadd.f32 %v3474_v23, %v941_v33  ;;  %v1056_v42 = vadd.f32 %v1048_v61, %v2684_v19  ;;  %v3476_v37 = vld [vmem:[#allocation12_spill] sm:$0xff]  ;;  %v2813_v23 = vpop.permute.xlu1 %1024 }
 0x11d   : > { %v1047_v39 = vsel %vm3336_vm1, %v2453_v54, 0.0  ;;  %v2807_v25 = vmul.f32 %v1085_v34, %v3470_v11  ;;  %vm3345_vm6 = vcmp.eq.s32.totalorder %v2745_v13, 1  ;;  %v937_v43 = vadd.f32 %v929_v5, %v2588_v55  ;;  %3477 = vst [vmem:[#allocation40_spill] sm:$0xff] %v2813_v23  ;;  %v3509_v11 = vld [vmem:[#allocation13_spill] sm:$0xff] }
 0x11e   : > { %v996_v56 = vadd.f32 %v988_v17, %v940_v36  ;;  %v1055_v44 = vadd.f32 %v1047_v39, %v991_v10  ;;  %v1061_v14 = vadd.f32 %v1053_v1, %v997_v32  ;;  %v1064_v33 = vmul.f32 %v1056_v42, %v3476_v37  ;;  %v3479_v10 = vld [vmem:[#allocation7_spill] sm:$0xff]  ;;  %v2824_v36 = vpop.permute.xlu0 %910  ;;  %v3480_v32 = vld [vmem:[#allocation5_spill] sm:$0xff] }
 0x11f   : > { %3475 = vst [vmem:[#allocation42_spill] sm:$0xff] %v2807_v25  ;;  %vm3338_vm5 = vcmp.eq.s32.totalorder %v2747_v53, 1  ;;  %v811_v61 = vadd.f32 %v803_v51, %v755_v28  ;;  %v859_v17 = vsel %vm3345_vm6, %v2729_v38, 0.0  ;;  %v3343_v1 = vrot.slane %v2807_v25, 7 }
 0x120   : > { %v1060_v19 = vadd.f32 %v1052_v26, %v996_v56  ;;  %v1063_v54 = vmul.f32 %v1055_v44, %v3478_v52  ;;  %v1069_v34 = vmul.f32 %v1061_v14, %v3479_v10  ;;  %v1079_v55 = vadd.f32 %v2759_v4, %v1064_v33 }
 0x121   : > { %v858_v5 = vsel %vm3338_vm5, %v680_v21, 0.0  ;;  %vm3344_vm1 = vcmp.eq.s32.totalorder %v2782_v6, 1  ;;  %vm3341_vm7 = vcmp.eq.s32.totalorder %v2792_v30, 1  ;;  %vm3340_vm5 = vcmp.eq.s32.totalorder %v2813_v23, 1 }
 0x122   : > { %v1068_v26 = vmul.f32 %v1060_v19, %v3480_v32  ;;  %v1078_v51 = vadd.f32 %v2759_v4, %v1063_v54  ;;  %v1084_v42 = vadd.f32 %v2759_v4, %v1069_v34  ;;  %v1087_v39 = vmax.f32 %v1079_v55, 0.0 }
 0x123   : > { %v866_v56 = vadd.f32 %v858_v5, %v2737_v18  ;;  %v930_v33 = vsel %vm3344_vm1, %v2560_v46, 0.0  ;;  %v985_v19 = vsel %vm3341_vm7, %v2463_v45, 0.0  ;;  %v967_v18 = vpop.permute.xlu1 %966  ;;  %v867_v5 = vadd.f32 %v859_v17, %v811_v61 }
 0x124   : > { %v1083_v44 = vadd.f32 %v2759_v4, %v1068_v26  ;;  %v1086_v14 = vmax.f32 %v1078_v51, 0.0  ;;  %v1092_v54 = vmax.f32 %v1084_v42, 0.0  ;;  %v2841_v28 = vmul.f32 %v1087_v39, %v3476_v37 }
 0x125   : > { %v993_v34 = vadd.f32 %v985_v19, %v937_v43  ;;  %v1049_v26 = vsel %vm3340_vm5, %v680_v21, 0.0  ;;  %vm3342_vm4 = vcmp.eq.s32.totalorder %v2824_v36, 1  ;;  %v938_v51 = vadd.f32 %v930_v33, %v866_v56  ;;  %v2853_v43 = vpop.permute.xlu0 %963  ;;  %v3481_v56 = vld [vmem:[#allocation15_spill] sm:$0xff] }
 0x126   : > { %v1091_v55 = vmax.f32 %v1083_v44, 0.0  ;;  %v2848_v46 = vmul.f32 %v1092_v54, %v3479_v10  ;;  %v931_v42 = vsel %vm3342_vm4, %v2569_v16, 0.0  ;;  %v2860_v21 = vmul.f32 %v1086_v14, %v3478_v52  ;;  %v3483_v16 = vld [vmem:[#allocation18_spill] sm:$0xff] }
 0x127   : > { %v1057_v45 = vadd.f32 %v1049_v26, %v993_v34  ;;  %vm979_vm5 = vcmp.eq.s32.totalorder %v967_v18, 1  ;;  %vm3482_vm7 = vcmp.eq.s32.totalorder %v3481_v56, 1  ;;  %v939_v34 = vadd.f32 %v931_v42, %v867_v5  ;;  %v1031_v5 = vpop.permute.xlu1 %1030 }
 0x128   : > { %v2856_v39 = vmul.f32 %v1091_v55, %v3480_v32  ;;  %v1108_v17 = vrot.slane %v2848_v46, 7  ;;  %v1133_v44 = vsel %vm3482_vm7, %v2848_v46, 0.0  ;;  %v1156_v33 = vrot.slane %v2848_v46, 1 }
 0x129   : > { %v1065_v19 = vmul.f32 %v1057_v45, %v3483_v16  ;;  %v987_v55 = vsel %vm979_vm5, %v2422_v31, 0.0  ;;  %vm978_vm4 = vcmp.eq.s32.totalorder %v2853_v43, 1  ;;  %v3484_v18 = vrot.slane %v2807_v25, 1 }
 0x12a   : > { %v3349_v54 = vrot.slane %v2856_v39, 7  ;;  %v1116_v14 = vsel %vm524_vm10, %v1108_v17, %v3343_v1  ;;  %v2883_v56 = vsel %vm979_vm5, %v2856_v39, 0.0  ;;  %vm3486_vm7 = vcmp.eq.s32.totalorder %v2300_v50, 1 }
 0x12b   : > { %v2879_v26 = vsel %vm677_vm9, %v1156_v33, %v3484_v18  ;;  %v1080_v45 = vadd.f32 %v2759_v4, %v1065_v19  ;;  %v1118_v42 = vsel %vm3486_vm7, %v1116_v14, 0.0  ;;  %vm3487_vm1 = vcmp.eq.s32.totalorder %v2328_v0, 1  ;;  %v3488_v19 = vld [vmem:[#allocation11_spill] sm:$0xff]  ;;  %v3491_v0 = vld [vmem:[#allocation17_spill] sm:$0xff] }
 0x12c   : > { %3485 = vst [vmem:[#allocation43_spill] sm:$0xff] %v2879_v26  ;;  %v1109_v31 = vsel %vm524_vm10, %v3349_v54, %v1108_v17  ;;  %v1165_v1 = vsel %vm734_vm12, %v2879_v26, 0.0  ;;  %v1181_v18 = vsel %vm3487_vm1, %v1116_v14, 0.0  ;;  %vm3489_vm6 = vcmp.eq.s32.totalorder %v3488_v19, 1  ;;  %v2901_v17 = vpop.permute.xlu0 %1027 }
 0x12d   : > { %v1117_v61 = vsel %vm3489_vm6, %v1109_v31, 0.0  ;;  %v1088_v10 = vmax.f32 %v1080_v45, 0.0  ;;  %v995_v32 = vadd.f32 %v987_v55, %v939_v34  ;;  %v986_v37 = vsel %vm978_vm4, %v2512_v49, 0.0 }
 0x12e   : > { %v1125_v50 = vadd.f32 %v1117_v61, %v2807_v25  ;;  %vm3490_vm5 = vcmp.eq.s32.totalorder %v2342_v8, 1  ;;  %vm1043_vm12 = vcmp.eq.s32.totalorder %v1031_v5, 1  ;;  %vm3492_vm1 = vcmp.eq.s32.totalorder %v3491_v0, 1 }
 0x12f   : > { %v2907_v58 = vsel %vm3490_vm5, %v2879_v26, 0.0  ;;  %v2912_v19 = vsel %vm3492_vm1, %v2856_v39, 0.0  ;;  %v2915_v34 = vmul.f32 %v1088_v10, %v3483_v16  ;;  %v1051_v49 = vsel %vm1043_vm12, %v2709_v20, 0.0  ;;  %v3495_v26 = vld [vmem:[#allocation8_spill] sm:$0xff] }
 0x130   : > { %v1155_v55 = vrot.slane %v2856_v39, 1  ;;  %v2922_v61 = vsel %vm797_vm15, %v1109_v31, 0.0  ;;  %v1141_v8 = vadd.f32 %v1133_v44, %v1125_v50  ;;  %v994_v45 = vadd.f32 %v986_v37, %v938_v51  ;;  %v3500_v50 = vld [vmem:[#allocation6_spill] sm:$0xff] }
 0x131   : > { %3493 = vst [vmem:[#allocation15_spill] sm:$0xff] %v2915_v34  ;;  %v1059_v54 = vadd.f32 %v1051_v49, %v995_v32  ;;  %vm1042_vm6 = vcmp.eq.s32.totalorder %v2901_v17, 1  ;;  %vm3494_vm7 = vcmp.eq.s32.totalorder %v2364_v22, 1  ;;  %v1104_v3 = vrot.slane %v2915_v34, 7  ;;  %v3534_v17 = vld [vmem:[#allocation24_spill] sm:$0xff] }
 0x132   : > { %v1157_v0 = vsel %vm677_vm9, %v1155_v55, %v1156_v33  ;;  %v2929_v10 = vsel %vm3494_vm7, %v1116_v14, 0.0  ;;  %v1050_v20 = vsel %vm1042_vm6, %v2729_v38, 0.0  ;;  %v1173_v16 = vadd.f32 %v1165_v1, %v1141_v8  ;;  %v3497_v1 = vld [vmem:[#allocation30_spill] sm:$0xff] }
 0x133   : > { %v1067_v44 = vmul.f32 %v1059_v54, %v3495_v26  ;;  %v1172_v37 = vsel %vm741_vm8, %v1157_v0, 0.0  ;;  %v2940_v32 = vsel %vm852_vm0, %v1157_v0, 0.0  ;;  %v2943_v22 = vsel %vm1043_vm12, %v1157_v0, 0.0  ;;  %v3501_v0 = vld [vmem:[#allocation16_spill] sm:$0xff] }
 0x134   : > { %v1058_v51 = vadd.f32 %v1050_v20, %v994_v45  ;;  %v3496_v33 = vrot.slane %v2841_v28, 7  ;;  %vm3498_vm15 = vcmp.eq.s32.totalorder %v3497_v1, 1  ;;  %v2954_v60 = vadd.f32 %v1181_v18, %v1173_v16  ;;  %v3503_v18 = vld [vmem:[#allocation19_spill] sm:$0xff] }
 0x135   : > { %v1137_v54 = vsel %vm3498_vm15, %v2915_v34, 0.0  ;;  %v1082_v9 = vadd.f32 %v2759_v4, %v1067_v44  ;;  %vm3499_vm0 = vcmp.eq.s32.totalorder %v2340_v7, 1  ;;  %v1152_v5 = vrot.slane %v2915_v34, 1  ;;  %v3505_v7 = vld [vmem:[#allocation22_spill] sm:$0xff] }
 0x136   : > { %v2949_v38 = vsel %vm524_vm10, %v3496_v33, %v1104_v3  ;;  %v1066_v49 = vmul.f32 %v1058_v51, %v3500_v50  ;;  %v1102_v8 = vrot.slane %v2860_v21, 7  ;;  %v1126_v45 = vadd.f32 %v1118_v42, %v2860_v21 }
 0x137   : > { %v1121_v14 = vsel %vm3499_vm0, %v2949_v38, 0.0  ;;  %vm3502_vm8 = vcmp.eq.s32.totalorder %v3501_v0, 1  ;;  %v1090_v16 = vmax.f32 %v1082_v9, 0.0  ;;  %vm3504_vm5 = vcmp.eq.s32.totalorder %v3503_v18, 1 }
 0x138   : > { %v1134_v20 = vsel %vm3502_vm8, %v2807_v25, 0.0  ;;  %v1135_v44 = vsel %vm3504_vm5, %v2860_v21, 0.0  ;;  %vm3506_vm12 = vcmp.eq.s32.totalorder %v3505_v7, 1  ;;  %v1150_v1 = vrot.slane %v2860_v21, 1 }
 0x139   : > { %v1136_v33 = vsel %vm3506_vm12, %v2841_v28, 0.0  ;;  %v1081_v51 = vadd.f32 %v2759_v4, %v1066_v49  ;;  %v3507_v52 = vrot.slane %v2841_v28, 7  ;;  %v3508_v9 = vrot.slane %v2807_v25, 7  ;;  %v3511_v4 = vld [vmem:[#allocation20_spill] sm:$0xff] }
 0x13a   : > { %v1142_v18 = vadd.f32 %v1134_v20, %v1126_v45  ;;  %v1098_v7 = vmul.f32 %v1090_v16, %v3495_v26  ;;  %vm3510_vm1 = vcmp.eq.s32.totalorder %v3509_v11, 1  ;;  %vm3512_vm7 = vcmp.eq.s32.totalorder %v3511_v4, 1  ;;  %v3514_v11 = vld [vmem:[#allocation14_spill] sm:$0xff] }
 0x13b   : > { %v2979_v42 = vsel %vm524_vm10, %v1102_v8, %v3507_v52  ;;  %v2985_v0 = vsel %vm524_vm10, %v3508_v9, %v1102_v8  ;;  %v1151_v52 = vrot.slane %v2841_v28, 1  ;;  %v1089_v23 = vmax.f32 %v1081_v51, 0.0 }
 0x13c   : > { %v1119_v40 = vsel %vm3510_vm1, %v2985_v0, 0.0  ;;  %v1120_v49 = vsel %vm3512_vm7, %v2979_v42, 0.0  ;;  %v3513_v8 = vrot.slane %v2807_v25, 1  ;;  %v1106_v20 = vrot.slane %v1098_v7, 7 }
 0x13d   : > { %v1127_v41 = vadd.f32 %v1119_v40, %v2841_v28  ;;  %v1128_v30 = vadd.f32 %v1120_v49, %v2915_v34  ;;  %vm3515_vm15 = vcmp.eq.s32.totalorder %v3514_v11, 1  ;;  %v1154_v9 = vrot.slane %v1098_v7, 1 }
 0x13e   : > { %v3001_v45 = vsel %vm677_vm9, %v3513_v8, %v1150_v1  ;;  %v1139_v16 = vsel %vm3515_vm15, %v1098_v7, 0.0  ;;  %v3007_v4 = vsel %vm924_vm11, %v1109_v31, 0.0  ;;  %v3010_v51 = vmul.f32 %v1089_v23, %v3500_v50 }
 0x13f   : > { %v1143_v40 = vadd.f32 %v1135_v44, %v1127_v41  ;;  %v1144_v49 = vadd.f32 %v1136_v33, %v1128_v30  ;;  %v3014_v25 = vsel %vm677_vm9, %v1151_v52, %v1152_v5  ;;  %v3516_v8 = vrot.slane %v2856_v39, 7 }
 0x140   : > { %v1158_v34 = vsel %vm677_vm9, %v1154_v9, %v1155_v55  ;;  %v3024_v24 = vsel %vm677_vm9, %v1150_v1, %v1151_v52  ;;  %vm3517_vm11 = vcmp.eq.s32.totalorder %v2324_v62, 1  ;;  %v1105_v23 = vrot.slane %v3010_v51, 7 }
 0x141   : > { %v1110_v11 = vsel %vm524_vm10, %v1106_v20, %v3516_v8  ;;  %v1166_v41 = vsel %vm3517_vm11, %v3001_v45, 0.0  ;;  %v1129_v31 = vadd.f32 %v1121_v14, %v3010_v51  ;;  %v1233_v44 = vsel %vm978_vm4, %v1098_v7, 0.0 }
 0x142   : > { %v1124_v30 = vsel %vm596_vm3, %v1110_v11, 0.0  ;;  %v1153_v33 = vrot.slane %v3010_v51, 1  ;;  %v1171_v1 = vsel %vm740_vm14, %v1158_v34, 0.0  ;;  %v1187_v62 = vsel %vm796_vm13, %v1110_v11, 0.0 }
 0x143   : > { %v1132_v55 = vadd.f32 %v1124_v30, %v2848_v46  ;;  %v1111_v48 = vsel %vm524_vm10, %v1105_v23, %v1106_v20  ;;  %v1112_v52 = vsel %vm524_vm10, %v1104_v3, %v1105_v23  ;;  %v1138_v43 = vsel %vm650_vm2, %v3010_v51, 0.0  ;;  %v3524_v23 = vld [vmem:[#allocation47_spill] sm:$0xff] }
 0x144   : > { %v1145_v14 = vadd.f32 %v1137_v54, %v1129_v31  ;;  %vm3518_vm4 = vcmp.eq.s32.totalorder %v2354_v15, 1  ;;  %vm3519_vm3 = vcmp.eq.s32.totalorder %v2286_v2, 1  ;;  %v3055_v30 = vsel %vm677_vm9, %v1153_v33, %v1154_v9  ;;  %v3521_v15 = vld [vmem:[#allocation36_spill] sm:$0xff] }
 0x145   : > { %v1148_v8 = vadd.f32 %v2912_v19, %v1132_v55  ;;  %v1122_v57 = vsel %vm3518_vm4, %v1112_v52, 0.0  ;;  %v1123_v63 = vsel %vm3519_vm3, %v1111_v48, 0.0  ;;  %v3060_v47 = vsel %vm677_vm9, %v1152_v5, %v1153_v33 }
 0x146   : > { %v1130_v20 = vadd.f32 %v1122_v57, %v1098_v7  ;;  %v1131_v3 = vadd.f32 %v1123_v63, %v2856_v39  ;;  %vm3520_vm10 = vcmp.eq.s32.totalorder %v2745_v13, 1  ;;  %vm3522_vm13 = vcmp.eq.s32.totalorder %v3521_v15, 1 }
 0x147   : > { %v1202_v19 = vsel %vm3520_vm10, %v1158_v34, 0.0  ;;  %v1180_v54 = vadd.f32 %v1172_v37, %v1148_v8  ;;  %v1169_v2 = vsel %vm3522_vm13, %v3060_v47, 0.0  ;;  %vm3523_vm2 = vcmp.eq.s32.totalorder %v3461_v59, 1 }
 0x148   : > { %v1170_v9 = vsel %vm3523_vm2, %v3055_v30, 0.0  ;;  %vm3525_vm14 = vcmp.eq.s32.totalorder %v3524_v23, 1  ;;  %v1146_v39 = vadd.f32 %v1138_v43, %v1130_v20  ;;  %v1147_v31 = vadd.f32 %v1139_v16, %v1131_v3 }
 0x149   : > { %v1185_v7 = vsel %vm3525_vm14, %v1112_v52, 0.0  ;;  %v1177_v29 = vadd.f32 %v1169_v2, %v1145_v14  ;;  %vm3526_vm9 = vcmp.eq.s32.totalorder %v2675_v12, 1  ;;  %v1196_v13 = vadd.f32 %v2922_v61, %v1180_v54  ;;  %v3530_v61 = vld [vmem:[#allocation21_spill] sm:$0xff] }
 0x14a   : > { %v1186_v5 = vsel %vm3526_vm9, %v1111_v48, 0.0  ;;  %vm3527_vm0 = vcmp.eq.s32.totalorder %v2747_v53, 1  ;;  %vm3528_vm8 = vcmp.eq.s32.totalorder %v2782_v6, 1  ;;  %vm3529_vm5 = vcmp.eq.s32.totalorder %v2824_v36, 1  ;;  %v3532_v53 = vld [vmem:[#allocation26_spill] sm:$0xff] }
 0x14b   : > { %v1201_v37 = vsel %vm3527_vm0, %v3055_v30, 0.0  ;;  %v1217_v55 = vsel %vm3528_vm8, %v1111_v48, 0.0  ;;  %v1218_v59 = vsel %vm3529_vm5, %v1110_v11, 0.0  ;;  %v1178_v33 = vadd.f32 %v1170_v9, %v1146_v39 }
 0x14c   : > { %v1179_v8 = vadd.f32 %v1171_v1, %v1147_v31  ;;  %v1193_v43 = vadd.f32 %v1185_v7, %v1177_v29  ;;  %v1249_v16 = vsel %vm1042_vm6, %v1158_v34, 0.0  ;;  %v1212_v12 = vadd.f32 %v2907_v58, %v1196_v13  ;;  %v3536_v34 = vld [vmem:[#allocation23_spill] sm:$0xff] }
 0x14d   : > { %vm3531_vm12 = vcmp.eq.s32.totalorder %v3530_v61, 1  ;;  %vm3533_vm1 = vcmp.eq.s32.totalorder %v3532_v53, 1  ;;  %v1174_v48 = vadd.f32 %v1166_v41, %v1142_v18  ;;  %v1194_v57 = vadd.f32 %v1186_v5, %v1178_v33  ;;  %v3538_v18 = vld [vmem:[#allocation31_spill] sm:$0xff]  ;;  %v3546_v5 = vld [vmem:[#allocation41_spill] sm:$0xff]  ;;  %v3551_v61 = vld [vmem:[#allocation34_spill] sm:$0xff] }
 0x14e   : > { %v1167_v14 = vsel %vm3531_vm12, %v3024_v24, 0.0  ;;  %v1168_v6 = vsel %vm3533_vm1, %v3014_v25, 0.0  ;;  %v1195_v36 = vadd.f32 %v1187_v62, %v1179_v8  ;;  %v1209_v11 = vadd.f32 %v1201_v37, %v1193_v43  ;;  %v3544_v31 = vld [vmem:[#allocation27_spill] sm:$0xff]  ;;  %v3549_v43 = vld [vmem:[#allocation29_spill] sm:$0xff] }
 0x14f   : > { %v1175_v63 = vadd.f32 %v1167_v14, %v1143_v40  ;;  %v1228_v1 = vadd.f32 %v2929_v10, %v1212_v12  ;;  %v1176_v20 = vadd.f32 %v1168_v6, %v1144_v49  ;;  %vm3535_vm6 = vcmp.eq.s32.totalorder %v3534_v17, 1  ;;  %v3540_v49 = vld [vmem:[#allocation25_spill] sm:$0xff]  ;;  %v3562_v17 = vld [vmem:[#allocation15_spill] sm:$0xff] }
 0x150   : > { %v1182_v58 = vsel %vm3535_vm6, %v2985_v0, 0.0  ;;  %vm3537_vm7 = vcmp.eq.s32.totalorder %v3536_v34, 1  ;;  %v1210_v54 = vadd.f32 %v1202_v19, %v1194_v57  ;;  %v1211_v15 = vadd.f32 %v2940_v32, %v1195_v36  ;;  %v3542_v19 = vld [vmem:[#allocation28_spill] sm:$0xff]  ;;  %v3553_v53 = vld [vmem:[#allocation33_spill] sm:$0xff]  ;;  %v3565_v34 = vld [vmem:[#allocation39_spill] sm:$0xff] }
 0x151   : > { %v1183_v3 = vsel %vm3537_vm7, %v2979_v42, 0.0  ;;  %v1225_v2 = vadd.f32 %v1217_v55, %v1209_v11  ;;  %vm3539_vm15 = vcmp.eq.s32.totalorder %v3538_v18, 1  ;;  %v1190_v40 = vadd.f32 %v1182_v58, %v1174_v48  ;;  %v3555_v48 = vld [vmem:[#allocation35_spill] sm:$0xff]  ;;  %v3569_v18 = vld [vmem:[#allocation40_spill] sm:$0xff] }
 0x152   : > { %v1184_v41 = vsel %vm3539_vm15, %v2949_v38, 0.0  ;;  %v1191_v62 = vadd.f32 %v1183_v3, %v1175_v63  ;;  %vm3541_vm11 = vcmp.eq.s32.totalorder %v3540_v49, 1  ;;  %v1226_v23 = vadd.f32 %v1218_v59, %v1210_v54  ;;  %v3576_v49 = vld [vmem:[#allocation10_spill] sm:$0xff] }
 0x153   : > { %v1192_v10 = vadd.f32 %v1184_v41, %v1176_v20  ;;  %v1197_v9 = vsel %vm3541_vm11, %v3001_v45, 0.0  ;;  %v1227_v7 = vadd.f32 %v3007_v4, %v1211_v15  ;;  %v1241_v39 = vadd.f32 %v1233_v44, %v1225_v2  ;;  %v3560_v20 = vld [vmem:[#allocation46_spill] sm:$0xff] }
 0x154   : > { %vm3543_vm4 = vcmp.eq.s32.totalorder %v3542_v19, 1  ;;  %vm3545_vm3 = vcmp.eq.s32.totalorder %v3544_v31, 1  ;;  %vm3547_vm10 = vcmp.eq.s32.totalorder %v3546_v5, 1  ;;  %v1205_v37 = vadd.f32 %v1197_v9, %v2954_v60  ;;  %v3571_v41 = vld [vmem:[#allocation38_spill] sm:$0xff]  ;;  %v3579_v31 = vld [vmem:[#allocation49_spill] sm:$0xff] }
 0x155   : > { %v1198_v32 = vsel %vm3543_vm4, %v3024_v24, 0.0  ;;  %v1199_v29 = vsel %vm3545_vm3, %v3014_v25, 0.0  ;;  %v1200_v13 = vsel %vm3547_vm10, %v3060_v47, 0.0  ;;  %v1242_v59 = vadd.f32 %v2883_v56, %v1226_v23 }
 0x156   : > { %v1206_v55 = vadd.f32 %v1198_v32, %v1190_v40  ;;  %v1257_v33 = vadd.f32 %v1249_v16, %v1241_v39  ;;  %v1207_v4 = vadd.f32 %v1199_v29, %v1191_v62  ;;  %v1208_v44 = vadd.f32 %v1200_v13, %v1192_v10  ;;  %v3573_v62 = vld [vmem:[#allocation42_spill] sm:$0xff]  ;;  %v3574_v10 = vld [vmem:[#allocation37_spill] sm:$0xff]  ;;  %v3578_v32 = vld [vmem:[#allocation43_spill] sm:$0xff] }
 0x157   : > { %vm3548_vm13 = vcmp.eq.s32.totalorder %v2673_v27, 1  ;;  %vm3550_vm2 = vcmp.eq.s32.totalorder %v3549_v43, 1  ;;  %vm3552_vm14 = vcmp.eq.s32.totalorder %v3551_v61, 1  ;;  %vm3554_vm9 = vcmp.eq.s32.totalorder %v3553_v53, 1  ;;  %v3586_v61 = vld [vmem:[#allocation7_spill] sm:$0xff] }
 0x158   : > { %v1216_v8 = vsel %vm3548_vm13, %v1112_v52, 0.0  ;;  %v1213_v12 = vsel %vm3550_vm2, %v2985_v0, 0.0  ;;  %v1214_v14 = vsel %vm3552_vm14, %v2979_v42, 0.0  ;;  %v1215_v60 = vsel %vm3554_vm9, %v2949_v38, 0.0  ;;  %v3557_v0 = vld [vmem:[#allocation45_spill] sm:$0xff] }
 0x159   : > { %v1258_v56 = vadd.f32 %v2943_v22, %v1242_v59  ;;  %v1221_v16 = vadd.f32 %v1213_v12, %v1205_v37  ;;  %v1222_v6 = vadd.f32 %v1214_v14, %v1206_v55  ;;  %vm3556_vm0 = vcmp.eq.s32.totalorder %v3555_v48, 1  ;;  %v3583_v59 = vld [vmem:[#allocation12_spill] sm:$0xff] }
 0x15a   : > { %v1229_v27 = vsel %vm3556_vm0, %v2860_v21, 0.0  ;;  %v1265_v52 = vmul.f32 %v1257_v33, %v3500_v50  ;;  %v1223_v57 = vadd.f32 %v1215_v60, %v1207_v4  ;;  %vm3558_vm8 = vcmp.eq.s32.totalorder %v3557_v0, 1  ;;  %v3563_v50 = vld [vmem:[#allocation44_spill] sm:$0xff]  ;;  %v3584_v4 = vld [vmem:[#allocation18_spill] sm:$0xff] }
 0x15b   : > { %v1230_v36 = vsel %vm3558_vm8, %v2841_v28, 0.0  ;;  %vm3559_vm5 = vcmp.eq.s32.totalorder %v2713_v35, 1  ;;  %v1266_v38 = vmul.f32 %v1258_v56, %v3495_v26  ;;  %v1237_v22 = vadd.f32 %v1229_v27, %v1221_v16  ;;  %v3567_v35 = vld [vmem:[#allocation32_spill] sm:$0xff] }
 0x15c   : > { %v1246_v42 = vsel %vm3559_vm5, %v3014_v25, 0.0  ;;  %v1238_v11 = vadd.f32 %v1230_v36, %v1222_v6  ;;  %v1224_v63 = vadd.f32 %v1216_v8, %v1208_v44  ;;  %vm3561_vm12 = vcmp.eq.s32.totalorder %v3560_v20, 1  ;;  %v1487_v60 = vld [vmem:[%s3229_s7] ss:$0 sm:$0xff] }
 0x15d   : > { %v1245_v21 = vsel %vm3561_vm12, %v3024_v24, 0.0  ;;  %vm3564_vm1 = vcmp.eq.s32.totalorder %v3563_v50, 1  ;;  %vm3566_vm6 = vcmp.eq.s32.totalorder %v3565_v34, 1  ;;  %vm3568_vm7 = vcmp.eq.s32.totalorder %v3567_v35, 1 }
 0x15e   : > { %v1231_v58 = vsel %vm3564_vm1, %v3562_v17, 0.0  ;;  %v1232_v28 = vsel %vm3566_vm6, %v3010_v51, 0.0  ;;  %v1247_v25 = vsel %vm3568_vm7, %v3060_v47, 0.0  ;;  %v1271_v26 = vpack.c.bf16 %v1266_v38, %v1265_v52  ;;  %v3577_v47 = vld [vmem:[#allocation9_spill] sm:$0xff] }
 0x15f   : > { %v1253_v3 = vadd.f32 %v1245_v21, %v1237_v22  ;;  %v1254_v54 = vadd.f32 %v1246_v42, %v1238_v11  ;;  %v1239_v15 = vadd.f32 %v1231_v58, %v1223_v57  ;;  %v1240_v2 = vadd.f32 %v1232_v28, %v1224_v63 }
 0x160   : > { %vm3570_vm15 = vcmp.eq.s32.totalorder %v3569_v18, 1  ;;  %vm3572_vm11 = vcmp.eq.s32.totalorder %v3571_v41, 1  ;;  %vm3575_vm4 = vcmp.eq.s32.totalorder %v3574_v10, 1  ;;  %vm3580_vm3 = vcmp.eq.s32.totalorder %v3579_v31, 1 }
 0x161   : > { %v1248_v24 = vsel %vm3570_vm15, %v3055_v30, 0.0  ;;  %v1235_v40 = vsel %vm3572_vm11, %v2848_v46, 0.0  ;;  %v1236_v51 = vsel %vm3575_vm4, %v3573_v62, 0.0  ;;  %v1261_v9 = vmul.f32 %v1253_v3, %v3576_v49  ;;  %v3581_v46 = vld [vmem:[#allocation48_spill] sm:$0xff] }
 0x162   : > { %v1262_v23 = vmul.f32 %v1254_v54, %v3577_v47  ;;  %v1255_v39 = vadd.f32 %v1247_v25, %v1239_v15  ;;  %v1243_v19 = vadd.f32 %v1235_v40, %v1227_v7  ;;  %v1251_v29 = vsel %vm3580_vm3, %v3578_v32, 0.0  ;;  %v3585_v7 = vld [vmem:[#allocation5_spill] sm:$0xff] }
 0x163   : > { %vm1296_vm10 = vcmask 261120   ;;  %v1256_v30 = vadd.f32 %v1248_v24, %v1240_v2  ;;  %v1244_v5 = vadd.f32 %v1236_v51, %v1228_v1  ;;  %vm3582_vm13 = vcmp.eq.s32.totalorder %v3581_v46, 1 }
 0x164   : > { %v1269_v13 = vpack.c.bf16 %v1262_v23, %v1261_v9  ;;  %v1252_v37 = vsel %vm3582_vm13, %v3001_v45, 0.0  ;;  %v1259_v55 = vadd.f32 %v1251_v29, %v1243_v19  ;;  %v1263_v33 = vmul.f32 %v1255_v39, %v3583_v59 }
 0x165   : > { %v1264_v44 = vmul.f32 %v1256_v30, %v3584_v4  ;;  %v1260_v8 = vadd.f32 %v1252_v37, %v1244_v5  ;;  %vm1374_vm2 = vcmask 48128   ;;  %vm1398_vm14 = vcmask 40960  }
 0x166   : > { %1532 = vmatprep.mubr.msk.bf16.mxu1 %vm1296_vm10, %v1269_v13  ;;  %v1267_v43 = vmul.f32 %v1259_v55, %v3585_v7 }
 0x167   : > { %v1270_v12 = vpack.c.bf16 %v1264_v44, %v1263_v33  ;;  %v1268_v14 = vmul.f32 %v1260_v8, %v3586_v61 }
 0x169   : > { %1533 = vmatmul.mubr.msk.bf16.vlgmr.msra.gmra.mxu1 %vm1296_vm10, %v1270_v12  ;;  %v1272_v1 = vpack.c.bf16 %v1268_v14, %v1267_v43 }
 0x16a   : > { %1536 = vmatprep.mubr.msk.bf16.mxu1 %vm1296_vm10, %v1271_v26 }
 0x171   : > { %1537 = vmatmul.mubr.msk.bf16.gmra.mxu1 %vm1296_vm10, %v1272_v1 }
 0x229   : > { %v1534_v45 = vpop.f32.mrf.mxu1 }
 0x22a   : > { %v1352_v48 = vadd.f32 %v1534_v45, %v1487_v60 }
 0x22b   : > { %v1343_v53 = vpop.f32.mrf.mxu1 }
 0x22c   : > { %v1344_v16 = vadd.f32 %v1487_v60, %v1343_v53  ;;  %v1378_v22 = vsel %vm1374_vm2, %v1352_v48, 0.0 }
 0x22d   : > { %v1535_v56 = vpop.f32.mrf.mxu1 }
 0x22e   : > { %v1375_v57 = vsel %vm1374_vm2, %v1344_v16, 0.0  ;;  %v1355_v0 = vadd.f32 %v1535_v56, %v1487_v60 }
 0x22f   : > { %v1346_v6 = vpop.f32.mrf.mxu1 }
 0x230   : > { %v1347_v27 = vadd.f32 %v1487_v60, %v1346_v6  ;;  %v1380_v21 = vsel %vm1374_vm2, %v1355_v0, 0.0 }
 0x231   : > { %v1538_v52 = vpop.f32.mrf.mxu1 }
 0x232   : > { %v1376_v36 = vsel %vm1374_vm2, %v1347_v27, 0.0  ;;  %v1368_v34 = vadd.f32 %v1538_v52, %v1487_v60 }
 0x233   : > { %v1377_v42 = vadd.f32 %v1376_v36, %v1375_v57  ;;  %v1359_v38 = vpop.f32.mrf.mxu1 }
 0x234   : > { %v1360_v11 = vadd.f32 %v1487_v60, %v1359_v38  ;;  %v1386_v54 = vsel %vm1374_vm2, %v1368_v34, 0.0 }
 0x235   : > { %v1379_v63 = vadd.f32 %v1378_v22, %v1377_v42  ;;  %v1539_v20 = vpop.f32.mrf.mxu1 }
 0x236   : > { %v1382_v17 = vsel %vm1374_vm2, %v1360_v11, 0.0  ;;  %v1371_v25 = vadd.f32 %v1539_v20, %v1487_v60 }
 0x237   : > { %v1381_v50 = vadd.f32 %v1380_v21, %v1379_v63  ;;  %v1362_v58 = vpop.f32.mrf.mxu1 }
 0x238   : > { %v1363_v28 = vadd.f32 %v1487_v60, %v1362_v58  ;;  %v1388_v2 = vsel %vm1374_vm2, %v1371_v25, 0.0 }
 0x239   : > { %v1383_v35 = vadd.f32 %v1382_v17, %v1381_v50 }
 0x23a   : > { %v1384_v26 = vsel %vm1374_vm2, %v1363_v28, 0.0 }
 0x23b   : > { %v1385_v3 = vadd.f32 %v1384_v26, %v1383_v35 }
 0x23d   : > { %v1387_v15 = vadd.f32 %v1386_v54, %v1385_v3 }
 0x23f   : > { %v1389_v18 = vadd.f32 %v1388_v2, %v1387_v15 }
 0x241   : > { %v1390_v24 = vrot.slane %v1389_v18, 4 }
 0x243   : > { %v1391_v41 = vadd.f32 %v1390_v24, %v1389_v18 }
 0x245   : > { %v1392_v40 = vrot.slane %v1391_v41, 2 }
 0x247   : > { %v1393_v62 = vadd.f32 %v1392_v40, %v1391_v41 }
 0x249   : > { %v1394_v10 = vrot.slane %v1393_v62, 1 }
 0x24b   : > { %v1395_v51 = vadd.f32 %v1394_v10, %v1393_v62 }
 0x24d   : > { %v1397_v49 = vmul.f32 0.015625, %v1395_v51 }
 0x24f   : > { %1399 = vst.msk [vmem:[%s297_s25] sm:$0x1] %vm1398_vm14, %v1397_v49 }
 0x250   : > { %1605 = shalt.err (!%p1602_p3)
}
 0x251   : > { %s1606_s21 = scalar_lea.hbm %s1411_s12, 16  ;;  %s1610_s24 = scalar_lea.hbm %s3230_s8, 32 }
 0x252   : > { %p1607_p4 = scmp.ne.s32.totalorder %s1411_s12, %s1606_s21  ;;  %p1611_p9 = scmp.lt.s32.totalorder %s1411_s12, %s3230_s8 }
 0x253   : > { %p1612_p10 = scmp.lt.s32.totalorder %s1610_s24, %s1606_s21 }
 0x254   : > { %p1608_p7 = pnand %p1607_p4, %p1739_p5 }
 0x255   : > { %p1613_p11 = por %p1612_p10, %p1611_p9 }
 0x256   : > { %p1609_p8 = pneg %p1608_p7 }
 0x258   : > { %p1614_p12 = pnand %p1613_p11, %p1609_p8 }
 0x25a   : > { %1617 = shalt.err (!%p1614_p12)
}
 0x25b   : > { %1540 = dma.vmem_to_hbm [thread:$0]  (%p1739_p5), %s1414_s26, 16, %s1411_s12, %s1401_s23  }
 0x25c PF: > { %p1546_p13 = scmp.ge.s32.totalorder %s1652_s30, 2  ;;  %s1425_s10 = sand.u32 1, %s1640_s27  }
 0x25d   : > { %s1426_s13 = scalar_lea.sflag [#allocation3], %s1425_s10 }
 0x25e   : > { %p1543_p0 = pnand %p1546_p13, %p1743_p6 }
 0x260   : > { %p1544_p1 = pneg %p1543_p0 }
 0x262   : > { %1635 = dma.done.wait (%p1544_p1), %s1426_s13, 16  }
 0x263   : > { %1637 = vsyncadd (%p1544_p1), %s1426_s13, 4294967280  ;;  %p18_p2 = scmp.ge.s32.totalorder %s1726_s11, 4   ;;  %s3587_s27 = smov %s1644_s28 }
 0x264   : > { %s3588_s28 = smov %s1648_s29  ;;  %s3589_s29 = smov %s1737_s14 }
 0x265   : > { %s3590_s30 = smov %s1726_s11  ;;  %20 = sbr.rel (!%p18_p2) target bundleno = 3 (0x3), region = 87 }
 0x26a   :  { %1430 = vsyncpa [#allocation3], 1 }
 0x26b   :  { %1432 = vsyncpa [#allocation3 + $0x1], 1 }

</bundles_post_ra>
